<compile_context>
chip_gen: v7x
topology: tpu7x:2x2x1
jax: 0.10.0
libtpu: 0.0.40
codegen_flags: <defaults>
</compile_context>

<pallas_src>
import numpy as np
import jax
import jax.numpy as jnp
from jax.experimental import pallas as pl
from jax.experimental.pallas import tpu as pltpu

LANES = 128


# ----------------------------- Pallas kernel --------------------------------
def _make_kernel(b_blk, length, seg, c2, num_class, num_out):
    """Build the kernel with static block / segment metadata closed over."""
    rows = b_blk * length
    f32 = jnp.float32
    bf16 = jnp.bfloat16

    def kernel(x_ref, w_ref, b_ref, out_ref):
        h = x_ref[0]                                   # (rows, Cin) f32
        b_all = b_ref[...]                             # (n_w, 128) f32

        # Border masks: zero the "previous" tap at l==0 and the "next" tap at
        # l==L-1 *within each sample* so sublane rolls never leak across samples
        # (== Conv1d padding=1 semantics).
        pos = jax.lax.broadcasted_iota(jnp.int32, (rows, 1), 0)
        m_prev = ((pos % length) != 0).astype(f32)
        m_next = ((pos % length) != (length - 1)).astype(f32)

        def wb(name):
            i, k, co = seg[name]                       # static ints
            return w_ref[i][:k, :co], b_all[i:i + 1, :co]

        def mm(a, w):
            # bf16 MXU operands, f32 accumulation.
            return jnp.dot(a.astype(bf16), w, preferred_element_type=f32)

        def conv3(h, name):
            # Conv1d(kernel=3, padding=1) with eval-mode BN folded in, expressed
            # as a single matmul over the tap-concatenated activations.
            w, b = wb(name)
            h_prev = pltpu.roll(h, shift=1, axis=0) * m_prev         # h[l-1]
            h_next = pltpu.roll(h, shift=rows - 1, axis=0) * m_next  # h[l+1]
            h_cat = jnp.concatenate([h_prev, h, h_next], axis=-1)    # (rows, 3*Cin)
            return mm(h_cat, w) + b

        # --- stem ---
        h = jnp.maximum(conv3(h, "w0"), 0.0)

        # --- basic block 1 (C1 -> C1), identity skip ---
        r = h
        h = jnp.maximum(conv3(h, "w1a"), 0.0)
        h = conv3(h, "w1b")
        h = jnp.maximum(h + r, 0.0)

        # --- basic block 2 (C1 -> C2), 1x1-conv skip ---
        wd, bd = wb("wds")
        r = mm(h, wd) + bd
        g = jnp.maximum(conv3(h, "w2a"), 0.0)
        g = conv3(g, "w2b")
        h = jnp.maximum(g + r, 0.0)                    # (rows, C2)

        # --- global average pool over L within each sample ---
        pooled = jnp.mean(h.reshape(b_blk, length, c2), axis=1)      # (b_blk, C2)

        # --- backbone head: Linear(C2 -> 32); Resnet_ts: x = relu(net_ts(tdata)) ---
        wf, bfc = wb("wfc")
        feat = jnp.maximum(mm(pooled, wf) + bfc, 0.0)                # (b_blk, 32)
        # z = li3_ts(x): Linear(32 -> 2)
        wl, bl = wb("wli")
        z = mm(feat, wl) + bl                                        # (b_blk, 2)

        # Lane-dense packed output: feat in lanes [0,32), z in [32,34), zeros after.
        pad = jnp.zeros((b_blk, LANES - num_class - num_out), f32)
        out_ref[...] = jnp.concatenate([feat, z, pad], axis=-1)[None]

    return kernel


# ------------------------------- wrapper -------------------------------------
@jax.jit
def resnet_ts_forward(tdata, params):
    """tdata: (N, Cin, L) float32 (PyTorch NCL).  Returns (z, x) like the module."""
    N, Cin, L = tdata.shape
    (w0, b0, w1a, b1a, w1b, b1b, w2a, b2a, w2b, b2b,
     wds, bds, wfc, bfc, wli, bli) = params

    c1 = w0.shape[1]
    c2 = w2a.shape[1]
    num_class = wfc.shape[1]
    num_out = wli.shape[1]
    assert num_class + num_out <= LANES

    # ---- batching: B_blk samples per grid step (target >= 256 MXU rows), but
    #      keep >= 2 grid steps when N >= 2 so both v7x TensorCores get work.
    b_blk = max(1, min((256 + L - 1) // L,
                       (N + 1) // 2 if N > 1 else 1))
    while (b_blk * L) % 8 != 0:        # keep the activation block sublane-aligned
        b_blk += 1
    n_blocks = (N + b_blk - 1) // b_blk
    n_pad = n_blocks * b_blk
    rows = b_blk * L

    # ---- activations: NCL -> (n_blocks, rows, Cin), zero-padded batch
    x = jnp.transpose(tdata, (0, 2, 1)).reshape(N * L, Cin)
    if n_pad != N:
        x = jnp.pad(x, ((0, (n_pad - N) * L), (0, 0)))
    x = x.reshape(n_blocks, rows, Cin)

    # ---- parameter slabs: one bf16 weight slab + one f32 bias slab (2 DMAs, not 16)
    names = ("w0", "w1a", "w1b", "w2a", "w2b", "wds", "wfc", "wli")
    weights = (w0, w1a, w1b, w2a, w2b, wds, wfc, wli)
    biases = (b0, b1a, b1b, b2a, b2b, bds, bfc, bli)
    k_pad = -(-max(w.shape[0] for w in weights) // 16) * 16    # bf16 sublane pack
    seg = {n: (i, w.shape[0], w.shape[1])
           for i, (n, w) in enumerate(zip(names, weights))}
    w_slab = jnp.stack([
        jnp.pad(w.astype(jnp.bfloat16),
                ((0, k_pad - w.shape[0]), (0, LANES - w.shape[1])))
        for w in weights])                                     # (8, k_pad, 128) bf16
    b_slab = jnp.stack([
        jnp.pad(b.reshape(-1), (0, LANES - b.shape[-1])).astype(jnp.float32)
        for b in biases])                                      # (8, 128) f32

    kernel = _make_kernel(b_blk, L, seg, c2, num_class, num_out)

    flops = n_pad * (2 * L * (3 * Cin) * c1                    # stem
                     + 2 * (2 * L * (3 * c1) * c1)             # block 1
                     + 2 * L * (3 * c1) * c2 + 2 * L * (3 * c2) * c2
                     + 2 * L * c1 * c2                         # block 2 (+ 1x1 skip)
                     + 2 * c2 * num_class + 2 * num_class * num_out)
    bytes_accessed = int(x.size * 4 + w_slab.size * 2 + b_slab.size * 4
                         + n_pad * LANES * 4)

    out = pl.pallas_call(
        kernel,
        out_shape=jax.ShapeDtypeStruct((n_blocks, b_blk, LANES), jnp.float32),
        grid_spec=pltpu.PrefetchScalarGridSpec(
            num_scalar_prefetch=0,
            grid=(n_blocks,),
            in_specs=[
                pl.BlockSpec((1, rows, Cin), lambda b: (b, 0, 0)),
                pl.BlockSpec(w_slab.shape, lambda b: (0, 0, 0)),
                pl.BlockSpec(b_slab.shape, lambda b: (0, 0)),
            ],
            out_specs=pl.BlockSpec((1, b_blk, LANES), lambda b: (b, 0, 0)),
        ),
        compiler_params=pltpu.CompilerParams(
            dimension_semantics=("parallel",)),
        cost_estimate=pl.CostEstimate(flops=flops, transcendentals=0,
                                      bytes_accessed=bytes_accessed),
    )(x, w_slab, b_slab)

    out = out.reshape(n_pad, LANES)[:N]
    feat = out[:, :num_class]
    z = out[:, num_class:num_class + num_out]
    return z, feat


# ------------------------- deterministic parameters --------------------------
def _folded_conv(key, ksize, cin, cout):
    """Conv1d weight (K, Cin, Cout) with eval-mode BatchNorm folded in."""
    kw, kb = jax.random.split(key)
    bound = 1.0 / np.sqrt(ksize * cin)
    w = jax.random.uniform(kw, (ksize, cin, cout), jnp.float32, -bound, bound)
    k1, k2, k3, k4 = jax.random.split(kb, 4)
    gamma = 1.0 + 0.1 * jax.random.normal(k1, (cout,), jnp.float32)
    beta = 0.1 * jax.random.normal(k2, (cout,), jnp.float32)
    mean = 0.1 * jax.random.normal(k3, (cout,), jnp.float32)
    var = 1.0 + 0.1 * jnp.abs(jax.random.normal(k4, (cout,), jnp.float32))
    scale = gamma * jax.lax.rsqrt(var + 1e-5)
    w_eff = w * scale[None, None, :]
    b_eff = (beta - mean * scale).reshape(1, cout)
    return w_eff.astype(jnp.float32), b_eff.astype(jnp.float32)


def _linear(key, cin, cout):
    kw, kb = jax.random.split(key)
    bound = 1.0 / np.sqrt(cin)
    w = jax.random.uniform(kw, (cin, cout), jnp.float32, -bound, bound)
    b = jax.random.uniform(kb, (1, cout), jnp.float32, -bound, bound)
    return w, b


def make_params(key, cin, c1=16, c2=32, num_class=32, num_out=2):
    ks = jax.random.split(key, 8)
    fuse = lambda w: w.reshape(-1, w.shape[-1])          # (3, Cin, Cout) -> (3*Cin, Cout)
    w0, b0 = _folded_conv(ks[0], 3, cin, c1)             # stem
    w1a, b1a = _folded_conv(ks[1], 3, c1, c1)            # block1 conv a
    w1b, b1b = _folded_conv(ks[2], 3, c1, c1)            # block1 conv b
    w2a, b2a = _folded_conv(ks[3], 3, c1, c2)            # block2 conv a
    w2b, b2b = _folded_conv(ks[4], 3, c2, c2)            # block2 conv b
    wds3, bds = _folded_conv(ks[5], 1, c1, c2)           # block2 1x1 downsample skip
    wfc, bfc = _linear(ks[6], c2, num_class)             # backbone fc -> 32
    wli, bli = _linear(ks[7], num_class, num_out)        # li3_ts: 32 -> 2
    return (fuse(w0), b0, fuse(w1a), b1a, fuse(w1b), b1b,
            fuse(w2a), b2a, fuse(w2b), b2b,
            wds3[0], bds, wfc, bfc, wli, bli)


# --------------------------------- main ---------------------------------------
if __name__ == "__main__":
    key = jax.random.PRNGKey(0)
    k_in, k_par = jax.random.split(key)

    # Small NCL time-series input; N=32 exercises the batched (2-step) grid.
    N, Cin, L = 32, 4, 16
    tdata = jax.random.normal(k_in, (N, Cin, L), jnp.float32)
    params = make_params(k_par, Cin)

    z, x = resnet_ts_forward(tdata, params)
    jax.block_until_ready((z, x))

    assert z.shape == (N, 2) and z.dtype == jnp.float32
    assert x.shape == (N, 32) and x.dtype == jnp.float32
    assert bool(jnp.all(x >= 0.0))           # x passed through ReLU
    print("KERNEL_OK")
</pallas_src>

<mosaic_0001>
module attributes {stable_mosaic.version = 11 : i64} {
  func.func @kernel(%arg0: i32, %arg1: memref<1x256x4xf32, #tpu.memory_space<vmem>>, %arg2: memref<8x96x128xbf16, #tpu.memory_space<vmem>>, %arg3: memref<8x128xf32, #tpu.memory_space<vmem>>, %arg4: memref<1x16x128xf32, #tpu.memory_space<vmem>>) attributes {dimension_semantics = [#tpu.dimension_semantics<parallel>], iteration_bounds = array<i64: 2>, scalar_prefetch = 0 : i64, scratch_operands = 0 : i64, tpu.core_type = #tpu.core_type<tc>, window_params = [{transform_indices = @transform_0, window_bounds = array<i64: 1, 256, 4>}, {pipeline_mode = #tpu.pipeline_mode<synchronous>, transform_indices = @transform_1, window_bounds = array<i64: 8, 96, 128>}, {pipeline_mode = #tpu.pipeline_mode<synchronous>, transform_indices = @transform_2, window_bounds = array<i64: 8, 128>}, {transform_indices = @transform_3, window_bounds = array<i64: 1, 16, 128>}]} {
    %c0 = arith.constant 0 : index
    %c0_0 = arith.constant 0 : index
    %c0_1 = arith.constant 0 : index
    %0 = vector.load %arg1[%c0, %c0_0, %c0_1] : memref<1x256x4xf32, #tpu.memory_space<vmem>>, vector<1x256x4xf32>
    %1 = vector.shape_cast %0 : vector<1x256x4xf32> to vector<256x4xf32>
    %c0_2 = arith.constant 0 : index
    %c0_3 = arith.constant 0 : index
    %2 = vector.load %arg3[%c0_2, %c0_3] : memref<8x128xf32, #tpu.memory_space<vmem>>, vector<8x128xf32>
    %3 = tpu.iota {dimensions = array<i32: 0>} : vector<256x1xi32>
    %c16_i32 = arith.constant 16 : i32
    %c0_i32 = arith.constant 0 : i32
    %4 = arith.cmpi eq, %c16_i32, %c0_i32 : i32
    %c1_i32 = arith.constant 1 : i32
    %5 = arith.select %4, %c1_i32, %c16_i32 : i32
    %6 = vector.broadcast %5 : i32 to vector<256x1xi32>
    %7 = arith.remsi %3, %6 : vector<256x1xi32>
    %c0_i32_4 = arith.constant 0 : i32
    %8 = vector.broadcast %c0_i32_4 : i32 to vector<256x1xi32>
    %9 = arith.cmpi ne, %7, %8 : vector<256x1xi32>
    %c0_i32_5 = arith.constant 0 : i32
    %10 = vector.broadcast %c0_i32_5 : i32 to vector<256x1xi32>
    %11 = arith.cmpi slt, %7, %10 : vector<256x1xi32>
    %c0_i32_6 = arith.constant 0 : i32
    %12 = arith.cmpi slt, %5, %c0_i32_6 : i32
    %13 = vector.broadcast %12 : i1 to vector<256x1xi1>
    %14 = vector.broadcast %13 : vector<256x1xi1> to vector<256x1xi1>
    %15 = arith.xori %11, %14 : vector<256x1xi1>
    %16 = arith.andi %15, %9 : vector<256x1xi1>
    %17 = vector.broadcast %5 : i32 to vector<256x1xi32>
    %18 = arith.addi %7, %17 : vector<256x1xi32>
    %19 = arith.select %16, %18, %7 : vector<256x1xi1>, vector<256x1xi32>
    %c0_i32_7 = arith.constant 0 : i32
    %20 = vector.broadcast %c0_i32_7 : i32 to vector<256x1xi32>
    %21 = arith.cmpi ne, %19, %20 : vector<256x1xi32>
    %22 = arith.extui %21 : vector<256x1xi1> to vector<256x1xi32>
    %23 = arith.sitofp %22 : vector<256x1xi32> to vector<256x1xf32>
    %c16_i32_8 = arith.constant 16 : i32
    %c0_i32_9 = arith.constant 0 : i32
    %24 = arith.cmpi eq, %c16_i32_8, %c0_i32_9 : i32
    %c1_i32_10 = arith.constant 1 : i32
    %25 = arith.select %24, %c1_i32_10, %c16_i32_8 : i32
    %26 = vector.broadcast %25 : i32 to vector<256x1xi32>
    %27 = arith.remsi %3, %26 : vector<256x1xi32>
    %c0_i32_11 = arith.constant 0 : i32
    %28 = vector.broadcast %c0_i32_11 : i32 to vector<256x1xi32>
    %29 = arith.cmpi ne, %27, %28 : vector<256x1xi32>
    %c0_i32_12 = arith.constant 0 : i32
    %30 = vector.broadcast %c0_i32_12 : i32 to vector<256x1xi32>
    %31 = arith.cmpi slt, %27, %30 : vector<256x1xi32>
    %c0_i32_13 = arith.constant 0 : i32
    %32 = arith.cmpi slt, %25, %c0_i32_13 : i32
    %33 = vector.broadcast %32 : i1 to vector<256x1xi1>
    %34 = vector.broadcast %33 : vector<256x1xi1> to vector<256x1xi1>
    %35 = arith.xori %31, %34 : vector<256x1xi1>
    %36 = arith.andi %35, %29 : vector<256x1xi1>
    %37 = vector.broadcast %25 : i32 to vector<256x1xi32>
    %38 = arith.addi %27, %37 : vector<256x1xi32>
    %39 = arith.select %36, %38, %27 : vector<256x1xi1>, vector<256x1xi32>
    %c15_i32 = arith.constant 15 : i32
    %40 = vector.broadcast %c15_i32 : i32 to vector<256x1xi32>
    %41 = arith.cmpi ne, %39, %40 : vector<256x1xi32>
    %42 = arith.extui %41 : vector<256x1xi1> to vector<256x1xi32>
    %43 = arith.sitofp %42 : vector<256x1xi32> to vector<256x1xf32>
    %c0_14 = arith.constant 0 : index
    %c0_15 = arith.constant 0 : index
    %c0_16 = arith.constant 0 : index
    %44 = vector.load %arg2[%c0_14, %c0_15, %c0_16] : memref<8x96x128xbf16, #tpu.memory_space<vmem>>, vector<1x96x128xbf16>
    %45 = vector.shape_cast %44 : vector<1x96x128xbf16> to vector<96x128xbf16>
    %46 = vector.extract_strided_slice %45 {offsets = [0, 0], sizes = [12, 16], strides = [1, 1]} : vector<96x128xbf16> to vector<12x16xbf16>
    %47 = vector.extract_strided_slice %2 {offsets = [0, 0], sizes = [1, 16], strides = [1, 1]} : vector<8x128xf32> to vector<1x16xf32>
    %c1_i32_17 = arith.constant 1 : i32
    %48 = tpu.dynamic_rotate %1 by %c1_i32_17 dim 0 : vector<256x4xf32>, i32 -> vector<256x4xf32>
    %49 = vector.broadcast %23 : vector<256x1xf32> to vector<256x4xf32>
    %50 = arith.mulf %48, %49 : vector<256x4xf32>
    %c255_i32 = arith.constant 255 : i32
    %51 = tpu.dynamic_rotate %1 by %c255_i32 dim 0 : vector<256x4xf32>, i32 -> vector<256x4xf32>
    %52 = vector.broadcast %43 : vector<256x1xf32> to vector<256x4xf32>
    %53 = arith.mulf %51, %52 : vector<256x4xf32>
    %54 = tpu.concatenate %50, %1, %53 in 1 : vector<256x4xf32>, vector<256x4xf32>, vector<256x4xf32> -> vector<256x12xf32>
    %55 = arith.truncf %54 : vector<256x12xf32> to vector<256x12xbf16>
    %cst = arith.constant dense<0.000000e+00> : vector<256x16xf32>
    %56 = tpu.matmul %55, %46, %cst {dimension_numbers = #tpu.dot_dimension_numbers<[1], [0], [0], [1], [0, 0, 1, 1], [], []>} : vector<256x12xbf16>, vector<12x16xbf16>, vector<256x16xf32> -> vector<256x16xf32>
    %57 = vector.broadcast %47 : vector<1x16xf32> to vector<256x16xf32>
    %58 = arith.addf %56, %57 : vector<256x16xf32>
    %cst_18 = arith.constant 0.000000e+00 : f32
    %59 = vector.broadcast %cst_18 : f32 to vector<256x16xf32>
    %60 = arith.maximumf %58, %59 : vector<256x16xf32>
    %c1 = arith.constant 1 : index
    %c0_19 = arith.constant 0 : index
    %c0_20 = arith.constant 0 : index
    %61 = vector.load %arg2[%c1, %c0_19, %c0_20] : memref<8x96x128xbf16, #tpu.memory_space<vmem>>, vector<1x96x128xbf16>
    %62 = vector.shape_cast %61 : vector<1x96x128xbf16> to vector<96x128xbf16>
    %63 = vector.extract_strided_slice %62 {offsets = [0, 0], sizes = [48, 16], strides = [1, 1]} : vector<96x128xbf16> to vector<48x16xbf16>
    %64 = vector.extract_strided_slice %2 {offsets = [1, 0], sizes = [1, 16], strides = [1, 1]} : vector<8x128xf32> to vector<1x16xf32>
    %c1_i32_21 = arith.constant 1 : i32
    %65 = tpu.dynamic_rotate %60 by %c1_i32_21 dim 0 : vector<256x16xf32>, i32 -> vector<256x16xf32>
    %66 = vector.broadcast %23 : vector<256x1xf32> to vector<256x16xf32>
    %67 = arith.mulf %65, %66 : vector<256x16xf32>
    %c255_i32_22 = arith.constant 255 : i32
    %68 = tpu.dynamic_rotate %60 by %c255_i32_22 dim 0 : vector<256x16xf32>, i32 -> vector<256x16xf32>
    %69 = vector.broadcast %43 : vector<256x1xf32> to vector<256x16xf32>
    %70 = arith.mulf %68, %69 : vector<256x16xf32>
    %71 = tpu.concatenate %67, %60, %70 in 1 : vector<256x16xf32>, vector<256x16xf32>, vector<256x16xf32> -> vector<256x48xf32>
    %72 = arith.truncf %71 : vector<256x48xf32> to vector<256x48xbf16>
    %cst_23 = arith.constant dense<0.000000e+00> : vector<256x16xf32>
    %73 = tpu.matmul %72, %63, %cst_23 {dimension_numbers = #tpu.dot_dimension_numbers<[1], [0], [0], [1], [0, 0, 1, 1], [], []>} : vector<256x48xbf16>, vector<48x16xbf16>, vector<256x16xf32> -> vector<256x16xf32>
    %74 = vector.broadcast %64 : vector<1x16xf32> to vector<256x16xf32>
    %75 = arith.addf %73, %74 : vector<256x16xf32>
    %cst_24 = arith.constant 0.000000e+00 : f32
    %76 = vector.broadcast %cst_24 : f32 to vector<256x16xf32>
    %77 = arith.maximumf %75, %76 : vector<256x16xf32>
    %c2 = arith.constant 2 : index
    %c0_25 = arith.constant 0 : index
    %c0_26 = arith.constant 0 : index
    %78 = vector.load %arg2[%c2, %c0_25, %c0_26] : memref<8x96x128xbf16, #tpu.memory_space<vmem>>, vector<1x96x128xbf16>
    %79 = vector.shape_cast %78 : vector<1x96x128xbf16> to vector<96x128xbf16>
    %80 = vector.extract_strided_slice %79 {offsets = [0, 0], sizes = [48, 16], strides = [1, 1]} : vector<96x128xbf16> to vector<48x16xbf16>
    %81 = vector.extract_strided_slice %2 {offsets = [2, 0], sizes = [1, 16], strides = [1, 1]} : vector<8x128xf32> to vector<1x16xf32>
    %c1_i32_27 = arith.constant 1 : i32
    %82 = tpu.dynamic_rotate %77 by %c1_i32_27 dim 0 : vector<256x16xf32>, i32 -> vector<256x16xf32>
    %83 = vector.broadcast %23 : vector<256x1xf32> to vector<256x16xf32>
    %84 = arith.mulf %82, %83 : vector<256x16xf32>
    %c255_i32_28 = arith.constant 255 : i32
    %85 = tpu.dynamic_rotate %77 by %c255_i32_28 dim 0 : vector<256x16xf32>, i32 -> vector<256x16xf32>
    %86 = vector.broadcast %43 : vector<256x1xf32> to vector<256x16xf32>
    %87 = arith.mulf %85, %86 : vector<256x16xf32>
    %88 = tpu.concatenate %84, %77, %87 in 1 : vector<256x16xf32>, vector<256x16xf32>, vector<256x16xf32> -> vector<256x48xf32>
    %89 = arith.truncf %88 : vector<256x48xf32> to vector<256x48xbf16>
    %cst_29 = arith.constant dense<0.000000e+00> : vector<256x16xf32>
    %90 = tpu.matmul %89, %80, %cst_29 {dimension_numbers = #tpu.dot_dimension_numbers<[1], [0], [0], [1], [0, 0, 1, 1], [], []>} : vector<256x48xbf16>, vector<48x16xbf16>, vector<256x16xf32> -> vector<256x16xf32>
    %91 = vector.broadcast %81 : vector<1x16xf32> to vector<256x16xf32>
    %92 = arith.addf %90, %91 : vector<256x16xf32>
    %93 = arith.addf %92, %60 : vector<256x16xf32>
    %cst_30 = arith.constant 0.000000e+00 : f32
    %94 = vector.broadcast %cst_30 : f32 to vector<256x16xf32>
    %95 = arith.maximumf %93, %94 : vector<256x16xf32>
    %c5 = arith.constant 5 : index
    %c0_31 = arith.constant 0 : index
    %c0_32 = arith.constant 0 : index
    %96 = vector.load %arg2[%c5, %c0_31, %c0_32] : memref<8x96x128xbf16, #tpu.memory_space<vmem>>, vector<1x96x128xbf16>
    %97 = vector.shape_cast %96 : vector<1x96x128xbf16> to vector<96x128xbf16>
    %98 = vector.extract_strided_slice %97 {offsets = [0, 0], sizes = [16, 32], strides = [1, 1]} : vector<96x128xbf16> to vector<16x32xbf16>
    %99 = vector.extract_strided_slice %2 {offsets = [5, 0], sizes = [1, 32], strides = [1, 1]} : vector<8x128xf32> to vector<1x32xf32>
    %100 = arith.truncf %95 : vector<256x16xf32> to vector<256x16xbf16>
    %cst_33 = arith.constant dense<0.000000e+00> : vector<256x32xf32>
    %101 = tpu.matmul %100, %98, %cst_33 {dimension_numbers = #tpu.dot_dimension_numbers<[1], [0], [0], [1], [0, 0, 1, 1], [], []>} : vector<256x16xbf16>, vector<16x32xbf16>, vector<256x32xf32> -> vector<256x32xf32>
    %102 = vector.broadcast %99 : vector<1x32xf32> to vector<256x32xf32>
    %103 = arith.addf %101, %102 : vector<256x32xf32>
    %c3 = arith.constant 3 : index
    %c0_34 = arith.constant 0 : index
    %c0_35 = arith.constant 0 : index
    %104 = vector.load %arg2[%c3, %c0_34, %c0_35] : memref<8x96x128xbf16, #tpu.memory_space<vmem>>, vector<1x96x128xbf16>
    %105 = vector.shape_cast %104 : vector<1x96x128xbf16> to vector<96x128xbf16>
    %106 = vector.extract_strided_slice %105 {offsets = [0, 0], sizes = [48, 32], strides = [1, 1]} : vector<96x128xbf16> to vector<48x32xbf16>
    %107 = vector.extract_strided_slice %2 {offsets = [3, 0], sizes = [1, 32], strides = [1, 1]} : vector<8x128xf32> to vector<1x32xf32>
    %c1_i32_36 = arith.constant 1 : i32
    %108 = tpu.dynamic_rotate %95 by %c1_i32_36 dim 0 : vector<256x16xf32>, i32 -> vector<256x16xf32>
    %109 = vector.broadcast %23 : vector<256x1xf32> to vector<256x16xf32>
    %110 = arith.mulf %108, %109 : vector<256x16xf32>
    %c255_i32_37 = arith.constant 255 : i32
    %111 = tpu.dynamic_rotate %95 by %c255_i32_37 dim 0 : vector<256x16xf32>, i32 -> vector<256x16xf32>
    %112 = vector.broadcast %43 : vector<256x1xf32> to vector<256x16xf32>
    %113 = arith.mulf %111, %112 : vector<256x16xf32>
    %114 = tpu.concatenate %110, %95, %113 in 1 : vector<256x16xf32>, vector<256x16xf32>, vector<256x16xf32> -> vector<256x48xf32>
    %115 = arith.truncf %114 : vector<256x48xf32> to vector<256x48xbf16>
    %cst_38 = arith.constant dense<0.000000e+00> : vector<256x32xf32>
    %116 = tpu.matmul %115, %106, %cst_38 {dimension_numbers = #tpu.dot_dimension_numbers<[1], [0], [0], [1], [0, 0, 1, 1], [], []>} : vector<256x48xbf16>, vector<48x32xbf16>, vector<256x32xf32> -> vector<256x32xf32>
    %117 = vector.broadcast %107 : vector<1x32xf32> to vector<256x32xf32>
    %118 = arith.addf %116, %117 : vector<256x32xf32>
    %cst_39 = arith.constant 0.000000e+00 : f32
    %119 = vector.broadcast %cst_39 : f32 to vector<256x32xf32>
    %120 = arith.maximumf %118, %119 : vector<256x32xf32>
    %c4 = arith.constant 4 : index
    %c0_40 = arith.constant 0 : index
    %c0_41 = arith.constant 0 : index
    %121 = vector.load %arg2[%c4, %c0_40, %c0_41] : memref<8x96x128xbf16, #tpu.memory_space<vmem>>, vector<1x96x128xbf16>
    %122 = vector.shape_cast %121 : vector<1x96x128xbf16> to vector<96x128xbf16>
    %123 = vector.extract_strided_slice %122 {offsets = [0, 0], sizes = [96, 32], strides = [1, 1]} : vector<96x128xbf16> to vector<96x32xbf16>
    %124 = vector.extract_strided_slice %2 {offsets = [4, 0], sizes = [1, 32], strides = [1, 1]} : vector<8x128xf32> to vector<1x32xf32>
    %c1_i32_42 = arith.constant 1 : i32
    %125 = tpu.dynamic_rotate %120 by %c1_i32_42 dim 0 : vector<256x32xf32>, i32 -> vector<256x32xf32>
    %126 = vector.broadcast %23 : vector<256x1xf32> to vector<256x32xf32>
    %127 = arith.mulf %125, %126 : vector<256x32xf32>
    %c255_i32_43 = arith.constant 255 : i32
    %128 = tpu.dynamic_rotate %120 by %c255_i32_43 dim 0 : vector<256x32xf32>, i32 -> vector<256x32xf32>
    %129 = vector.broadcast %43 : vector<256x1xf32> to vector<256x32xf32>
    %130 = arith.mulf %128, %129 : vector<256x32xf32>
    %131 = tpu.concatenate %127, %120, %130 in 1 : vector<256x32xf32>, vector<256x32xf32>, vector<256x32xf32> -> vector<256x96xf32>
    %132 = arith.truncf %131 : vector<256x96xf32> to vector<256x96xbf16>
    %cst_44 = arith.constant dense<0.000000e+00> : vector<256x32xf32>
    %133 = tpu.matmul %132, %123, %cst_44 {dimension_numbers = #tpu.dot_dimension_numbers<[1], [0], [0], [1], [0, 0, 1, 1], [], []>} : vector<256x96xbf16>, vector<96x32xbf16>, vector<256x32xf32> -> vector<256x32xf32>
    %134 = vector.broadcast %124 : vector<1x32xf32> to vector<256x32xf32>
    %135 = arith.addf %133, %134 : vector<256x32xf32>
    %136 = arith.addf %135, %103 : vector<256x32xf32>
    %cst_45 = arith.constant 0.000000e+00 : f32
    %137 = vector.broadcast %cst_45 : f32 to vector<256x32xf32>
    %138 = arith.maximumf %136, %137 : vector<256x32xf32>
    %139 = vector.shape_cast %138 : vector<256x32xf32> to vector<16x16x32xf32>
    %cst_46 = arith.constant dense<0.000000e+00> : vector<16x32xf32>
    %140 = vector.multi_reduction <add>, %139, %cst_46 [1] : vector<16x16x32xf32> to vector<16x32xf32>
    %cst_47 = arith.constant 1.600000e+01 : f32
    %141 = vector.broadcast %cst_47 : f32 to vector<16x32xf32>
    %142 = arith.divf %140, %141 : vector<16x32xf32>
    %c6 = arith.constant 6 : index
    %c0_48 = arith.constant 0 : index
    %c0_49 = arith.constant 0 : index
    %143 = vector.load %arg2[%c6, %c0_48, %c0_49] : memref<8x96x128xbf16, #tpu.memory_space<vmem>>, vector<1x96x128xbf16>
    %144 = vector.shape_cast %143 : vector<1x96x128xbf16> to vector<96x128xbf16>
    %145 = vector.extract_strided_slice %144 {offsets = [0, 0], sizes = [32, 32], strides = [1, 1]} : vector<96x128xbf16> to vector<32x32xbf16>
    %146 = vector.extract_strided_slice %2 {offsets = [6, 0], sizes = [1, 32], strides = [1, 1]} : vector<8x128xf32> to vector<1x32xf32>
    %147 = arith.truncf %142 : vector<16x32xf32> to vector<16x32xbf16>
    %cst_50 = arith.constant dense<0.000000e+00> : vector<16x32xf32>
    %148 = tpu.matmul %147, %145, %cst_50 {dimension_numbers = #tpu.dot_dimension_numbers<[1], [0], [0], [1], [0, 0, 1, 1], [], []>} : vector<16x32xbf16>, vector<32x32xbf16>, vector<16x32xf32> -> vector<16x32xf32>
    %149 = vector.broadcast %146 : vector<1x32xf32> to vector<16x32xf32>
    %150 = arith.addf %148, %149 : vector<16x32xf32>
    %cst_51 = arith.constant 0.000000e+00 : f32
    %151 = vector.broadcast %cst_51 : f32 to vector<16x32xf32>
    %152 = arith.maximumf %150, %151 : vector<16x32xf32>
    %c7 = arith.constant 7 : index
    %c0_52 = arith.constant 0 : index
    %c0_53 = arith.constant 0 : index
    %153 = vector.load %arg2[%c7, %c0_52, %c0_53] : memref<8x96x128xbf16, #tpu.memory_space<vmem>>, vector<1x96x128xbf16>
    %154 = vector.shape_cast %153 : vector<1x96x128xbf16> to vector<96x128xbf16>
    %155 = vector.extract_strided_slice %154 {offsets = [0, 0], sizes = [32, 2], strides = [1, 1]} : vector<96x128xbf16> to vector<32x2xbf16>
    %156 = vector.extract_strided_slice %2 {offsets = [7, 0], sizes = [1, 2], strides = [1, 1]} : vector<8x128xf32> to vector<1x2xf32>
    %157 = arith.truncf %152 : vector<16x32xf32> to vector<16x32xbf16>
    %cst_54 = arith.constant dense<0.000000e+00> : vector<16x2xf32>
    %158 = tpu.matmul %157, %155, %cst_54 {dimension_numbers = #tpu.dot_dimension_numbers<[1], [0], [0], [1], [0, 0, 1, 1], [], []>} : vector<16x32xbf16>, vector<32x2xbf16>, vector<16x2xf32> -> vector<16x2xf32>
    %159 = vector.broadcast %156 : vector<1x2xf32> to vector<16x2xf32>
    %160 = arith.addf %158, %159 : vector<16x2xf32>
    %cst_55 = arith.constant 0.000000e+00 : f32
    %161 = vector.broadcast %cst_55 : f32 to vector<16x94xf32>
    %162 = tpu.concatenate %152, %160, %161 in 1 : vector<16x32xf32>, vector<16x2xf32>, vector<16x94xf32> -> vector<16x128xf32>
    %163 = vector.shape_cast %162 : vector<16x128xf32> to vector<1x16x128xf32>
    %c0_56 = arith.constant 0 : index
    %c0_57 = arith.constant 0 : index
    %c0_58 = arith.constant 0 : index
    %164 = vector.load %arg4[%c0_56, %c0_57, %c0_58] : memref<1x16x128xf32, #tpu.memory_space<vmem>>, vector<1x16x128xf32>
    tpu.vector_store %arg4[%c0_56, %c0_57, %c0_58], %163 {strides = array<i32>} : memref<1x16x128xf32, #tpu.memory_space<vmem>>, vector<1x16x128xf32>,
    return
  }
  func.func @transform_0(%arg0: i32) -> (i32, i32, i32) {
    %c0_i32 = arith.constant 0 : i32
    %c0_i32_0 = arith.constant 0 : i32
    %c0_i32_1 = arith.constant 0 : i32
    return %arg0, %c0_i32, %c0_i32_0 : i32, i32, i32
  }
  func.func @transform_1(%arg0: i32) -> (i32, i32, i32) {
    %c0_i32 = arith.constant 0 : i32
    %c0_i32_0 = arith.constant 0 : i32
    %c0_i32_1 = arith.constant 0 : i32
    %c0_i32_2 = arith.constant 0 : i32
    return %c0_i32, %c0_i32_0, %c0_i32_1 : i32, i32, i32
  }
  func.func @transform_2(%arg0: i32) -> (i32, i32) {
    %c0_i32 = arith.constant 0 : i32
    %c0_i32_0 = arith.constant 0 : i32
    %c0_i32_1 = arith.constant 0 : i32
    return %c0_i32, %c0_i32_0 : i32, i32
  }
  func.func @transform_3(%arg0: i32) -> (i32, i32, i32) {
    %c0_i32 = arith.constant 0 : i32
    %c0_i32_0 = arith.constant 0 : i32
    %c0_i32_1 = arith.constant 0 : i32
    return %arg0, %c0_i32, %c0_i32_0 : i32, i32, i32
  }
}

</mosaic_0001>

<bundles_post_ra>
// kernel: resnet_ts_forward.1
= control target key start
LH: loop header
LB: loop body
LE: loop exit
PB: predicated region body
PF: predicated region fallthrough
CT: control target
= control target key end

     0   :  { %s7097_s12 = smov 0   ;;  %s10204_s0 = inlined_call_operand.vmem [shape: f32[2,256,4], index: 0, kind: input, shape index: {}]   ;;  %s10205_s1 = inlined_call_operand.vmem [shape: bf16[8,96,128], index: 1, kind: input, shape index: {}]   ;;  %s10206_s2 = inlined_call_operand.vmem [shape: f32[8,128], index: 2, kind: input, shape index: {}]   ;;  %s10207_s3 = inlined_call_operand.vmem [shape: f32[2,16,128], index: 3, kind: output, shape index: {}]  }
   0x1 LB: > { %s5560_s13 = sadd.s32 4294967295, %s7068_s12   ;;  %p5564_p0 = scmp.ge.s32.totalorder %s7068_s12, 1  ;;  %s7068_s12 = sphi %s7097_s12, %s13_s12  }
   0x2   : > { %p137_p1 = scmp.lt.s32.totalorder %s7068_s12, 3 }
   0x4   : > { %p138_p2 = pnand %p5564_p0, %p137_p1 }
   0x6   : > { %141 = sbr.rel (%p138_p2) target bundleno = 2422 (0x976), region = 32 }
   0xd   : > { %p161_p3 = scmp.lt.s32.totalorder %s5560_s13, 1  ;;  %v205_v0 = vlaneseq  ;;  %s7070_s18 = smov 4   ;;  %v10231_v28 = vmov 0.0  }
   0xe   : > { %s7072_s19 = smov 8   ;;  %s7073_s28 = smov 16  }
   0xf   : > { %s10611_s13 = smov (!%p161_p3, %s5560_s13), 1  ;;  %v7107_v1 = vshrl.u32 %v205_v0, 7  ;;  %s7074_s4 = smov 32  }
  0x10   : > { %s5762_s14 = sshll.u32 %s10611_s13, 8  ;;  %s7075_s15 = smov 64  }
  0x11   : > { %vm848_vm0 = vcmp.lt.s32.totalorder %v7107_v1, 1  ;;  %v207_v2 = vadd.s32 8, %v7107_v1  ;;  %v209_v3 = vadd.s32 24, %v7107_v1  ;;  %s7116_s17 = scalar_lea.vmem %s10204_s0, %s5762_s14  ;;  %vm945_vm1 = vcmp.lt.s32.totalorder %v7107_v1, 7  ;;  %s5763_s26 = sshll.u32 %s10611_s13, 4 }
  0x12   : > { %v211_v4 = vadd.s32 40, %v7107_v1  ;;  %v7121_v5 = vadd.s32 56, %v7107_v1  ;;  %v7124_v6 = vadd.s32 72, %v7107_v1  ;;  %v7127_v7 = vld [vmem:[%s7116_s17] sm:$0xff]  ;;  %v7130_v8 = vld [vmem:[%s7116_s17 + $0x8] sm:$0xff]  ;;  %v7133_v9 = vld [vmem:[%s7116_s17 + $0x10] sm:$0xff]  ;;  %s170_s29 = scalar_lea.vmem %s10207_s3, %s5763_s26 }
  0x13   : > { %v249_v10 = vand.u32 15, %v207_v2  ;;  %v263_v11 = vand.u32 15, %v209_v3  ;;  %v7136_v12 = vadd.s32 88, %v7107_v1  ;;  %v10222_v13 = vrot.slane %v7130_v8, 7  ;;  %v7143_v16 = vld [vmem:[%s7116_s17 + $0x18] sm:$0xff]  ;;  %v7146_v17 = vld [vmem:[%s7116_s17 + $0x28] sm:$0xff] }
  0x14   : > { %v914_v14 = vrot.slane %v7130_v8, 1  ;;  %v6237_v15 = vpack.i.bf16 %v7130_v8, %v7127_v7  ;;  %v7149_v18 = vadd.s32 104, %v7107_v1  ;;  %v10219_v19 = vrot.slane %v7127_v7, 1  ;;  %v7160_v25 = vld [vmem:[%s7116_s17 + $0x20] sm:$0xff]  ;;  %v7163_v26 = vld [vmem:[%s7116_s17 + $0x30] sm:$0xff]  ;;  %v7199_v40 = vld [vmem:[%s7116_s17 + $0x38] sm:$0xff] }
  0x15   : > { %v10228_v20 = vrot.slane %v7143_v16, 7  ;;  %v916_v21 = vrot.slane %v7143_v16, 1  ;;  %v6242_v22 = vpack.i.bf16 %v7143_v16, %v7133_v9  ;;  %v10227_v23 = vrot.slane %v7133_v9, 7  ;;  %v7221_v49 = vld [vmem:[%s7116_s17 + $0x48] sm:$0xff]  ;;  %v7227_v53 = vld [vmem:[%s7116_s17 + $0x40] sm:$0xff]  ;;  %v7238_v57 = vld [vmem:[%s7116_s17 + $0x50] sm:$0xff] }
  0x16   : > { %6238 = vrot.lane.b32.xlu0 %v6237_v15, %s7070_s18  ;;  %v915_v24 = vrot.slane %v7133_v9, 1  ;;  %vm719_vm2 = vcmp.ne.s32.totalorder %v249_v10, 15  ;;  %v10226_v27 = vrot.slane %v7146_v17, 7  ;;  %v976_v30 = vsel %vm945_vm1, %v10219_v19, %v914_v14  ;;  %v7407_v19 = vld [vmem:[%s7116_s17 + $0xb0] sm:$0xff] }
  0x17   : > { %v7167_v29 = vsel %vm719_vm2, 1.0, %v10231_v28  ;;  %v10217_v31 = vrot.slane %v7163_v26, 7  ;;  %v918_v32 = vrot.slane %v7146_v17, 1  ;;  %v7181_v33 = vsel %vm848_vm0, %v10222_v13, %v10227_v23 }
  0x18   : > { %10327 = vst [vmem:[#allocation2_spill] sm:$0xff] %v7167_v29  ;;  %v975_v34 = vsel %vm945_vm1, %v914_v14, %v915_v24  ;;  %v6247_v35 = vpack.i.bf16 %v7146_v17, %v7160_v25  ;;  %v10223_v36 = vrot.slane %v7160_v25, 7  ;;  %v917_v39 = vrot.slane %v7160_v25, 1 }
  0x19   : > { %v979_v37 = vmul.f32 %v7167_v29, %v975_v34  ;;  %v7195_v38 = vsel %vm848_vm0, %v10226_v27, %v10217_v31  ;;  %vm721_vm3 = vcmp.ne.s32.totalorder %v263_v11, 15  ;;  %v974_v43 = vsel %vm945_vm1, %v915_v24, %v916_v21  ;;  %v7534_v29 = vld [vmem:[%s7116_s17 + $0xe0] sm:$0xff] }
  0x1a   : > { %6243 = vrot.lane.b32.xlu0 %v6242_v22, %s7070_s18  ;;  %v7208_v41 = vsel %vm848_vm0, %v10228_v20, %v10223_v36  ;;  %v7211_v42 = vsel %vm721_vm3, 1.0, %v10231_v28  ;;  %v277_v44 = vand.u32 15, %v211_v4  ;;  %v973_v46 = vsel %vm945_vm1, %v916_v21, %v917_v39  ;;  %v7251_v4 = vld [vmem:[%s7116_s17 + $0x58] sm:$0xff]  ;;  %v7265_v21 = vld [vmem:[%s7116_s17 + $0x68] sm:$0xff] }
  0x1b   : > { %10328 = vst [vmem:[#allocation3_spill] sm:$0xff] %v7211_v42  ;;  %v6252_v45 = vpack.i.bf16 %v979_v37, %v976_v30  ;;  %v919_v47 = vrot.slane %v7163_v26, 1  ;;  %v972_v48 = vsel %vm945_vm1, %v917_v39, %v918_v32  ;;  %v981_v50 = vmul.f32 %v7211_v42, %v973_v46  ;;  %v7280_v30 = vld [vmem:[%s7116_s17 + $0x60] sm:$0xff]  ;;  %v7516_v42 = vld [vmem:[%s7116_s17 + $0xe8] sm:$0xff] }
  0x1c   : > { %vm723_vm4 = vcmp.ne.s32.totalorder %v277_v44, 15  ;;  %v10218_v51 = vrot.slane %v7199_v40, 7  ;;  %v920_v52 = vrot.slane %v7199_v40, 1  ;;  %v6262_v56 = vpack.i.bf16 %v7199_v40, %v7163_v26 }
  0x1d   : > { %6253 = vrot.lane.b32.xlu1 %v6252_v45, %s7072_s19  ;;  %v7231_v54 = vsel %vm723_vm4, 1.0, %v10231_v28  ;;  %v971_v55 = vsel %vm945_vm1, %v918_v32, %v919_v47  ;;  %v10214_v58 = vrot.slane %v7221_v49, 7  ;;  %v6257_v59 = vpack.i.bf16 %v981_v50, %v974_v43 }
  0x1e   : > { %10329 = vst [vmem:[#allocation4_spill] sm:$0xff] %v7231_v54  ;;  %6248 = vrot.lane.b32.xlu0 %v6247_v35, %s7070_s18  ;;  %v983_v60 = vmul.f32 %v7231_v54, %v971_v55  ;;  %v10211_v61 = vrot.slane %v7238_v57, 7  ;;  %v922_v62 = vrot.slane %v7221_v49, 1  ;;  %v6272_v63 = vpack.i.bf16 %v7221_v49, %v7227_v53  ;;  %v7290_v35 = vld [vmem:[%s7116_s17 + $0x70] sm:$0xff] }
  0x1f   : > { %v10213_v0 = vrot.slane %v7227_v53, 7  ;;  %v921_v2 = vrot.slane %v7227_v53, 1  ;;  %v291_v3 = vand.u32 15, %v7121_v5  ;;  %v970_v14 = vsel %vm945_vm1, %v919_v47, %v920_v52 }
  0x20   : > { %v6267_v10 = vpack.i.bf16 %v983_v60, %v972_v48  ;;  %v7259_v11 = vsel %vm848_vm0, %v10214_v58, %v10211_v61  ;;  %v305_v15 = vand.u32 15, %v7124_v6  ;;  %v923_v24 = vrot.slane %v7238_v57, 1  ;;  %v7383_v58 = vld [vmem:[%s7116_s17 + $0x98] sm:$0xff] }
  0x21   : > { %6258 = vrot.lane.b32.xlu1 %v6257_v59, %s7072_s19  ;;  %v7274_v5 = vsel %vm848_vm0, %v10218_v51, %v10213_v0  ;;  %vm725_vm5 = vcmp.ne.s32.totalorder %v291_v3, 15  ;;  %v969_v22 = vsel %vm945_vm1, %v920_v52, %v921_v2  ;;  %v968_v32 = vsel %vm945_vm1, %v921_v2, %v922_v62  ;;  %v7404_v51 = vld [vmem:[%s7116_s17 + $0xa8] sm:$0xff] }
  0x22   : > { %6268 = vrot.lane.b32.xlu0 %v6267_v10, %s7072_s19  ;;  %v7284_v6 = vsel %vm725_vm5, 1.0, %v10231_v28  ;;  %vm727_vm6 = vcmp.ne.s32.totalorder %v305_v15, 15  ;;  %v10212_v34 = vrot.slane %v7251_v4, 7  ;;  %v967_v43 = vsel %vm945_vm1, %v922_v62, %v923_v24  ;;  %v7317_v62 = vld [vmem:[%s7116_s17 + $0x78] sm:$0xff] }
  0x23   : > { %10330 = vst [vmem:[#allocation5_spill] sm:$0xff] %v7284_v6  ;;  %v985_v37 = vmul.f32 %v7284_v6, %v969_v22  ;;  %v7294_v39 = vsel %vm727_vm6, 1.0, %v10231_v28  ;;  %v924_v44 = vrot.slane %v7251_v4, 1  ;;  %v10210_v46 = vrot.slane %v7265_v21, 7 }
  0x24   : > { %10331 = vst [vmem:[#allocation6_spill] sm:$0xff] %v7294_v39  ;;  %v987_v45 = vmul.f32 %v7294_v39, %v967_v43  ;;  %v10208_v47 = vrot.slane %v7290_v35, 7  ;;  %v926_v50 = vrot.slane %v7265_v21, 1  ;;  %v10209_v52 = vrot.slane %v7280_v30, 7 }
  0x25   : > { %6263 = vrot.lane.b32.xlu1 %v6262_v56, %s7070_s18  ;;  %v6277_v48 = vpack.i.bf16 %v985_v37, %v970_v14  ;;  %v925_v60 = vrot.slane %v7280_v30, 1  ;;  %v319_v56 = vand.u32 15, %v7136_v12  ;;  %v6282_v2 = vpack.i.bf16 %v7251_v4, %v7238_v57  ;;  %v7332_v14 = vld [vmem:[%s7116_s17 + $0x80] sm:$0xff] }
  0x26   : > { %6273 = vrot.lane.b32.xlu0 %v6272_v63, %s7070_s18  ;;  %v6287_v55 = vpack.i.bf16 %v987_v45, %v968_v32  ;;  %v7312_v59 = vsel %vm848_vm0, %v10210_v46, %v10208_v47  ;;  %v7327_v63 = vsel %vm848_vm0, %v10212_v34, %v10209_v52  ;;  %v333_v3 = vand.u32 15, %v7149_v18  ;;  %v7341_v32 = vld [vmem:[%s7116_s17 + $0x88] sm:$0xff]  ;;  %v7351_v45 = vld [vmem:[%s7116_s17 + $0x90] sm:$0xff] }
  0x27   : > { %v927_v10 = vrot.slane %v7290_v35, 1  ;;  %v6297_v12 = vpack.i.bf16 %v7265_v21, %v7280_v30  ;;  %vm729_vm7 = vcmp.ne.s32.totalorder %v319_v56, 15  ;;  %v965_v15 = vsel %vm945_vm1, %v924_v44, %v925_v60 }
  0x28   : > { %v966_v22 = vsel %vm945_vm1, %v923_v24, %v924_v44  ;;  %v7345_v18 = vsel %vm729_vm7, 1.0, %v10231_v28  ;;  %vm731_vm8 = vcmp.ne.s32.totalorder %v333_v3, 15  ;;  %v10221_v43 = vrot.slane %v7317_v62, 7 }
  0x29   : > { %6278 = vrot.lane.b32.xlu1 %v6277_v48, %s7072_s19  ;;  %10332 = vst [vmem:[#allocation7_spill] sm:$0xff] %v7345_v18  ;;  %v963_v37 = vsel %vm945_vm1, %v926_v50, %v927_v10  ;;  %v989_v56 = vmul.f32 %v7345_v18, %v965_v15  ;;  %v7356_v24 = vsel %vm731_vm8, 1.0, %v10231_v28  ;;  %v964_v44 = vsel %vm945_vm1, %v925_v60, %v926_v50 }
  0x2a   : > { %6288 = vrot.lane.b32.xlu0 %v6287_v55, %s7072_s19  ;;  %10333 = vst [vmem:[#allocation8_spill] sm:$0xff] %v7356_v24  ;;  %v10216_v48 = vrot.slane %v7341_v32, 7  ;;  %v991_v3 = vmul.f32 %v7356_v24, %v963_v37  ;;  %v928_v47 = vrot.slane %v7317_v62, 1  ;;  %v6302_v52 = vpack.i.bf16 %v7317_v62, %v7290_v35 }
  0x2b   : > { %v10215_v55 = vrot.slane %v7351_v45, 7  ;;  %v930_v15 = vrot.slane %v7341_v32, 1  ;;  %v10220_v46 = vrot.slane %v7332_v14, 7  ;;  %v929_v61 = vrot.slane %v7332_v14, 1 }
  0x2c   : > { %v221_v50 = vadd.s32 120, %v7107_v1  ;;  %v6292_v60 = vpack.i.bf16 %v989_v56, %v966_v22  ;;  %v6317_v34 = vpack.i.bf16 %v7341_v32, %v7332_v14  ;;  %v223_v0 = vadd.s32 136, %v7107_v1 }
  0x2d   : > { %6283 = vrot.lane.b32.xlu1 %v6282_v2, %s7070_s18  ;;  %v7377_v37 = vsel %vm848_vm0, %v10216_v48, %v10215_v55  ;;  %v6307_v2 = vpack.i.bf16 %v991_v3, %v964_v44  ;;  %v7392_v22 = vsel %vm848_vm0, %v10221_v43, %v10220_v46  ;;  %v931_v55 = vrot.slane %v7351_v45, 1  ;;  %v7396_v48 = vld [vmem:[%s7116_s17 + $0xa0] sm:$0xff] }
  0x2e   : > { %6298 = vrot.lane.b32.xlu0 %v6297_v12, %s7070_s18  ;;  %v347_v56 = vand.u32 15, %v221_v50  ;;  %v961_v31 = vsel %vm945_vm1, %v928_v47, %v929_v61  ;;  %v962_v12 = vsel %vm945_vm1, %v927_v10, %v928_v47  ;;  %v361_v44 = vand.u32 15, %v223_v0 }
  0x2f   : > { %v10230_v3 = vrot.slane %v7383_v58, 7  ;;  %v959_v50 = vsel %vm945_vm1, %v930_v15, %v931_v55  ;;  %v960_v46 = vsel %vm945_vm1, %v929_v61, %v930_v15  ;;  %v10225_v43 = vrot.slane %v7404_v51, 7 }
  0x30   : > { %vm733_vm9 = vcmp.ne.s32.totalorder %v347_v56, 15  ;;  %vm735_vm10 = vcmp.ne.s32.totalorder %v361_v44, 15  ;;  %v932_v0 = vrot.slane %v7383_v58, 1  ;;  %v10224_v10 = vrot.slane %v7407_v19, 7 }
  0x31   : > { %6293 = vrot.lane.b32.xlu1 %v6292_v60, %s7072_s19  ;;  %v7416_v47 = vsel %vm733_vm9, 1.0, %v10231_v28  ;;  %v7423_v13 = vsel %vm735_vm10, 1.0, %v10231_v28  ;;  %v934_v61 = vrot.slane %v7404_v51, 1  ;;  %v10229_v15 = vrot.slane %v7396_v48, 7 }
  0x32   : > { %10334 = vst [vmem:[#allocation9_spill] sm:$0xff] %v7416_v47  ;;  %6308 = vrot.lane.b32.xlu0 %v6307_v2, %s7072_s19  ;;  %v993_v56 = vmul.f32 %v7416_v47, %v961_v31  ;;  %10335 = vst [vmem:[#allocation10_spill] sm:$0xff] %v7423_v13  ;;  %v995_v60 = vmul.f32 %v7423_v13, %v959_v50  ;;  %v7434_v44 = vsel %vm848_vm0, %v10225_v43, %v10224_v10  ;;  %v7457_v13 = vld [vmem:[%s7116_s17 + $0xb8] sm:$0xff]  ;;  %vm1406_vm3 = vcmask 1045504  }
  0x33   : > { %10336 = vst [vmem:[#allocation11_spill] sm:$0xff] %v7434_v44  ;;  %v933_v31 = vrot.slane %v7396_v48, 1  ;;  %v225_v2 = vadd.s32 152, %v7107_v1  ;;  %v7444_v50 = vsel %vm848_vm0, %v10230_v3, %v10229_v15  ;;  %v227_v36 = vadd.s32 168, %v7107_v1 }
  0x34   : > { %v6312_v10 = vpack.i.bf16 %v993_v56, %v962_v12  ;;  %v6322_v43 = vpack.i.bf16 %v7383_v58, %v7351_v45  ;;  %v935_v23 = vrot.slane %v7407_v19, 1  ;;  %v6327_v20 = vpack.i.bf16 %v995_v60, %v960_v46  ;;  %v7470_v46 = vld [vmem:[%s7116_s17 + $0xd0] sm:$0xff] }
  0x35   : > { %6303 = vrot.lane.b32.xlu1 %v6302_v52, %s7070_s18  ;;  %v375_v27 = vand.u32 15, %v225_v2  ;;  %v6337_v15 = vpack.i.bf16 %v7404_v51, %v7396_v48  ;;  %v957_v3 = vsel %vm945_vm1, %v932_v0, %v933_v31  ;;  %v389_v28 = vand.u32 15, %v227_v36  ;;  %v7460_v52 = vld [vmem:[%s7116_s17 + $0xc8] sm:$0xff] }
  0x36   : > { %6318 = vrot.lane.b32.xlu0 %v6317_v34, %s7070_s18  ;;  %v958_v12 = vsel %vm945_vm1, %v931_v55, %v932_v0  ;;  %v955_v56 = vsel %vm945_vm1, %v934_v61, %v935_v23  ;;  %v7467_v34 = vld [vmem:[%s7116_s17 + $0xc0] sm:$0xff]  ;;  %v10246_v60 = vrot.slane %v7460_v52, 7  ;;  %v10337_v2 = vmov 0.0  }
  0x37   : > { %vm737_vm11 = vcmp.ne.s32.totalorder %v375_v27, 15  ;;  %vm739_vm12 = vcmp.ne.s32.totalorder %v389_v28, 15  ;;  %v10245_v27 = vrot.slane %v7470_v46, 7  ;;  %v936_v24 = vrot.slane %v7457_v13, 1 }
  0x38   : > { %v7474_v47 = vsel %vm737_vm11, 1.0, %v10337_v2  ;;  %v7481_v0 = vsel %vm739_vm12, 1.0, %v10337_v2  ;;  %v229_v36 = vadd.s32 184, %v7107_v1  ;;  %v956_v18 = vsel %vm945_vm1, %v933_v31, %v934_v61 }
  0x39   : > { %10338 = vst [vmem:[#allocation12_spill] sm:$0xff] %v7474_v47  ;;  %6313 = vrot.lane.b32.xlu1 %v6312_v10, %s7072_s19  ;;  %v997_v55 = vmul.f32 %v7474_v47, %v957_v3  ;;  %10339 = vst [vmem:[#allocation13_spill] sm:$0xff] %v7481_v0  ;;  %v999_v28 = vmul.f32 %v7481_v0, %v955_v56  ;;  %v7493_v10 = vsel %vm848_vm0, %v10246_v60, %v10245_v27  ;;  %vm1266_vm8 = vcmask 31744  }
  0x3a   : > { %6328 = vrot.lane.b32.xlu0 %v6327_v20, %s7072_s19  ;;  %10340 = vst [vmem:[#allocation14_spill] sm:$0xff] %v7493_v10  ;;  %v937_v3 = vrot.slane %v7467_v34, 1  ;;  %v938_v20 = vrot.slane %v7460_v52, 1  ;;  %v10341_v56 = vrot.slane %v7467_v34, 7  ;;  %v10342_v0 = vrot.slane %v7457_v13, 7 }
  0x3b   : > { %v231_v27 = vadd.s32 200, %v7107_v1  ;;  %v403_v60 = vand.u32 15, %v229_v36  ;;  %v939_v39 = vrot.slane %v7470_v46, 1  ;;  %v6332_v61 = vpack.i.bf16 %v997_v55, %v958_v12 }
  0x3c   : > { %v7506_v47 = vsel %vm848_vm0, %v10342_v0, %v10341_v56  ;;  %v6342_v31 = vpack.i.bf16 %v7457_v13, %v7407_v19  ;;  %v6357_v6 = vpack.i.bf16 %v7460_v52, %v7467_v34  ;;  %v6347_v0 = vpack.i.bf16 %v999_v28, %v956_v18  ;;  %v7522_v56 = vld [vmem:[%s7116_s17 + $0xd8] sm:$0xff] }
  0x3d   : > { %10343 = vst [vmem:[#allocation15_spill] sm:$0xff] %v7506_v47  ;;  %6323 = vrot.lane.b32.xlu1 %v6322_v43, %s7070_s18  ;;  %v417_v54 = vand.u32 15, %v231_v27  ;;  %vm741_vm13 = vcmp.ne.s32.totalorder %v403_v60, 15  ;;  %v953_v36 = vsel %vm945_vm1, %v936_v24, %v937_v3  ;;  %v7525_v43 = vld [vmem:[%s7116_s17 + $0xf0] sm:$0xff]  ;;  %v951_v27 = vsel %vm945_vm1, %v938_v20, %v939_v39 }
  0x3e   : > { %6338 = vrot.lane.b32.xlu0 %v6337_v15, %s7070_s18  ;;  %v7529_v55 = vsel %vm741_vm13, 1.0, %v10337_v2  ;;  %v10259_v18 = vrot.slane %v7525_v43, 7  ;;  %v954_v15 = vsel %vm945_vm1, %v935_v23, %v936_v24  ;;  %v10262_v12 = vrot.slane %v7534_v29, 7 }
  0x3f   : > { %10344 = vst [vmem:[#allocation16_spill] sm:$0xff] %v7529_v55  ;;  %vm743_vm14 = vcmp.ne.s32.totalorder %v417_v54, 15  ;;  %v1001_v54 = vmul.f32 %v7529_v55, %v953_v36  ;;  %v940_v10 = vrot.slane %v7522_v56, 1  ;;  %v10346_v47 = vrot.slane %v7516_v42, 7 }
  0x40   : > { %v7540_v60 = vsel %vm743_vm14, 1.0, %v10337_v2  ;;  %v233_v24 = vadd.s32 216, %v7107_v1  ;;  %v941_v55 = vrot.slane %v7534_v29, 1  ;;  %v235_v44 = vadd.s32 232, %v7107_v1 }
  0x41   : > { %10345 = vst [vmem:[#allocation17_spill] sm:$0xff] %v7540_v60  ;;  %6333 = vrot.lane.b32.xlu1 %v6332_v61, %s7072_s19  ;;  %v7553_v23 = vsel %vm848_vm0, %v10346_v47, %v10259_v18  ;;  %v1003_v28 = vmul.f32 %v7540_v60, %v951_v27  ;;  %v10348_v61 = vrot.slane %v7522_v56, 7  ;;  %v952_v47 = vsel %vm945_vm1, %v937_v3, %v938_v20 }
  0x42   : > { %10347 = vst [vmem:[#allocation18_spill] sm:$0xff] %v7553_v23  ;;  %6348 = vrot.lane.b32.xlu0 %v6347_v0, %s7072_s19  ;;  %v942_v0 = vrot.slane %v7516_v42, 1  ;;  %v431_v18 = vand.u32 15, %v233_v24  ;;  %v943_v27 = vrot.slane %v7525_v43, 1  ;;  %v445_v60 = vand.u32 15, %v235_v44 }
  0x43   : > { %v7564_v36 = vsel %vm848_vm0, %v10348_v61, %v10262_v12  ;;  %v6352_v23 = vpack.i.bf16 %v1001_v54, %v954_v15  ;;  %v237_v61 = vadd.s32 248, %v7107_v1  ;;  %v6367_v12 = vpack.i.bf16 %v1003_v28, %v952_v47 }
  0x44   : > { %10349 = vst [vmem:[#allocation19_spill] sm:$0xff] %v7564_v36  ;;  %vm745_vm15 = vcmp.ne.s32.totalorder %v431_v18, 15  ;;  %v949_v3 = vsel %vm945_vm1, %v940_v10, %v941_v55  ;;  %vm747_vm2 = vcmp.ne.s32.totalorder %v445_v60, 15  ;;  %v947_v44 = vsel %vm945_vm1, %v942_v0, %v943_v27 }
  0x45   : > { %6343 = vrot.lane.b32.xlu1 %v6342_v31, %s7070_s18  ;;  %v7576_v36 = vsel %vm745_vm15, 1.0, %v10337_v2  ;;  %v7581_v20 = vsel %vm747_vm2, 1.0, %v10337_v2  ;;  %v7586_v31 = vld [vmem:[%s7116_s17 + $0xf8] sm:$0xff]  ;;  %v459_v18 = vand.u32 15, %v237_v61  ;;  %v10350_v15 = vrot.slane %v7143_v16, 7 }
  0x46   : > { %6358 = vrot.lane.b32.xlu0 %v6357_v6, %s7070_s18  ;;  %v7037_v6 = vld [vmem:[%s10205_s1] sm:$0xff]   ;;  %v10351_v28 = vrot.slane %v7133_v9, 7  ;;  %v10352_v54 = vrot.slane %v7146_v17, 7  ;;  %v10353_v24 = vrot.slane %v7160_v25, 7  ;;  %v816_v61 = vrot.slane %v7127_v7, 7 }
  0x47   : > { %v6362_v16 = vpack.i.bf16 %v7522_v56, %v7470_v46  ;;  %v6377_v9 = vpack.i.bf16 %v7516_v42, %v7534_v29  ;;  %v950_v17 = vsel %vm945_vm1, %v939_v39, %v940_v10  ;;  %v1007_v25 = vmul.f32 %v7581_v20, %v947_v44  ;;  %6221 = vmatprep.subr.msk.bf16.mxu0 %vm1406_vm3, %v7037_v6 }
  0x48   : > { %v7597_v60 = vsel %vm848_vm0, %v10351_v28, %v10350_v15  ;;  %v7605_v47 = vsel %vm848_vm0, %v10353_v24, %v10352_v54  ;;  %v1005_v15 = vmul.f32 %v7576_v36, %v949_v3  ;;  %v944_v28 = vrot.slane %v7586_v31, 1 }
  0x49   : > { %6353 = vrot.lane.b32.xlu1 %v6352_v23, %s7072_s19  ;;  %v948_v23 = vsel %vm945_vm1, %v941_v55, %v942_v0  ;;  %vm749_vm4 = vcmp.ne.s32.totalorder %v459_v18, 15  ;;  %v10354_v54 = vrot.slane %v7130_v8, 7  ;;  %v10355_v44 = vrot.slane %v7127_v7, 1 }
  0x4a   : > { %6368 = vrot.lane.b32.xlu0 %v6367_v12, %s7072_s19  ;;  %v6372_v12 = vpack.i.bf16 %v1005_v15, %v950_v17  ;;  %v6387_v39 = vpack.i.bf16 %v1007_v25, %v948_v23  ;;  %v7628_v10 = vsel %vm749_vm4, 1.0, %v10337_v2  ;;  %v1408_v0 = vsel %vm1406_vm3, %v7037_v6, 0 }
  0x4b   : > { %v879_v3 = vsel %vm848_vm0, %v816_v61, %v10354_v54  ;;  %v977_v55 = vsel %vm945_vm1, %v944_v28, %v10355_v44  ;;  %5884 = vmatpush3.bf16.msra.mxu0 %v1408_v0  ;;  %v10356_v8 = vrot.slane %v7199_v40, 7  ;;  %v10357_v18 = vrot.slane %v7163_v26, 7 }
  0x4c   : > { %v10360_v15 = vrot.slane %v7251_v4, 7  ;;  %v10361_v6 = vrot.slane %v7238_v57, 7  ;;  %v6382_v26 = vpack.i.bf16 %v7586_v31, %v7525_v43  ;;  %v10363_v17 = vrot.slane %v7280_v30, 7 }
  0x4d   : > { %6363 = vrot.lane.b32.xlu1 %v6362_v16, %s7070_s18  ;;  %v7640_v24 = vsel %vm848_vm0, %v10357_v18, %v10356_v8  ;;  %v10358_v16 = vrot.slane %v7221_v49, 7  ;;  %v1009_v49 = vmul.f32 %v7628_v10, %v977_v55  ;;  %v10364_v57 = vrot.slane %v7317_v62, 7 }
  0x4e   : > { %6378 = vrot.lane.b32.xlu0 %v6377_v9, %s7070_s18  ;;  %v10359_v9 = vrot.slane %v7227_v53, 7  ;;  %v7656_v40 = vsel %vm848_vm0, %v10361_v6, %v10360_v15  ;;  %v10362_v53 = vrot.slane %v7265_v21, 7  ;;  %v10365_v25 = vrot.slane %v7290_v35, 7 }
  0x4f   : > { %v946_v54 = vsel %vm945_vm1, %v943_v27, %v944_v28  ;;  %v10366_v21 = vrot.slane %v7341_v32, 7  ;;  %v10367_v30 = vrot.slane %v7332_v14, 7  ;;  %v10368_v62 = vrot.slane %v7383_v58, 7 }
  0x50   : > { %v7648_v7 = vsel %vm848_vm0, %v10359_v9, %v10358_v16  ;;  %v7668_v4 = vsel %vm848_vm0, %v10363_v17, %v10362_v53  ;;  %v7676_v23 = vsel %vm848_vm0, %v10365_v25, %v10364_v57  ;;  %v6392_v35 = vpack.i.bf16 %v1009_v49, %v946_v54 }
  0x51   : > { %6373 = vrot.lane.b32.xlu1 %v6372_v12, %s7072_s19  ;;  %v7687_v12 = vsel %vm848_vm0, %v10367_v30, %v10366_v21  ;;  %v10369_v44 = vrot.slane %v7351_v45, 7  ;;  %v10370_v27 = vrot.slane %v7404_v51, 7  ;;  %v10371_v32 = vrot.slane %v7396_v48, 7 }
  0x52   : > { %6388 = vrot.lane.b32.xlu0 %v6387_v39, %s7072_s19  ;;  %v10372_v28 = vrot.slane %v7457_v13, 7  ;;  %v10373_v55 = vrot.slane %v7407_v19, 7  ;;  %v10374_v45 = vrot.slane %v7460_v52, 7  ;;  %v10375_v51 = vrot.slane %v7467_v34, 7 }
  0x53   : > { %v7696_v39 = vsel %vm848_vm0, %v10369_v44, %v10368_v62  ;;  %v7704_v14 = vsel %vm848_vm0, %v10371_v32, %v10370_v27  ;;  %v10376_v0 = vrot.slane %v7522_v56, 7  ;;  %v10377_v13 = vrot.slane %v7470_v46, 7 }
  0x54   : > { %v7712_v58 = vsel %vm848_vm0, %v10373_v55, %v10372_v28  ;;  %v7721_v48 = vsel %vm848_vm0, %v10375_v51, %v10374_v45  ;;  %v10378_v8 = vrot.slane %v7516_v42, 7  ;;  %v10379_v18 = vrot.slane %v7534_v29, 7 }
  0x55   : > { %6383 = vrot.lane.b32.xlu1 %v6382_v26, %s7070_s18  ;;  %v7729_v19 = vsel %vm848_vm0, %v10377_v13, %v10376_v0  ;;  %v208_v34 = vadd.s32 16, %v7107_v1  ;;  %v242_v16 = vand.u32 15, %v7107_v1  ;;  %v210_v56 = vadd.s32 32, %v7107_v1 }
  0x56   : > { %v7737_v52 = vsel %vm848_vm0, %v10379_v18, %v10378_v8  ;;  %v847_v46 = vrot.slane %v7586_v31, 7  ;;  %v212_v26 = vadd.s32 48, %v7107_v1  ;;  %v214_v49 = vadd.s32 64, %v7107_v1  ;;  %v204_v31 = vld [vmem:[%s10206_s2] sm:$0xff] }
  0x57   : > { %v256_v9 = vand.u32 15, %v208_v34  ;;  %vm622_vm5 = vcmp.ne.s32.totalorder %v242_v16, 0  ;;  %v270_v15 = vand.u32 15, %v210_v56  ;;  %vm1299_vm9 = vcmask 64512  }
  0x58   : > { %v7744_v42 = vsel %vm622_vm5, 1.0, %v10337_v2  ;;  %v880_v29 = vsel %vm848_vm0, %v847_v46, %v816_v61  ;;  %v284_v21 = vand.u32 15, %v212_v26  ;;  %v216_v61 = vadd.s32 80, %v7107_v1 }
  0x59   : > { %6393 = vrot.lane.b32.xlu1 %v6392_v35, %s7072_s19  ;;  %vm624_vm6 = vcmp.ne.s32.totalorder %v256_v9, 0  ;;  %vm626_vm7 = vcmp.ne.s32.totalorder %v270_v15, 0  ;;  %v881_v25 = vmul.f32 %v7744_v42, %v880_v29  ;;  %v298_v62 = vand.u32 15, %v214_v49 }
  0x5a   : > { %v7753_v57 = vsel %vm624_vm6, 1.0, %v10337_v2  ;;  %v7757_v30 = vsel %vm626_vm7, 1.0, %v10337_v2  ;;  %v218_v44 = vadd.s32 96, %v7107_v1  ;;  %vm628_vm10 = vcmp.ne.s32.totalorder %v284_v21, 0 }
  0x5b   : > { %10380 = vst [vmem:[#allocation20_spill] sm:$0xff] %v7753_v57  ;;  %v883_v35 = vmul.f32 %v7753_v57, %v7181_v33  ;;  %v885_v13 = vmul.f32 %v7757_v30, %v7208_v41  ;;  %vm1357_vm11 = vcmask 97280   ;;  %v312_v34 = vand.u32 15, %v216_v61 }
  0x5c   : > { %vm630_vm12 = vcmp.ne.s32.totalorder %v298_v62, 0  ;;  %v326_v9 = vand.u32 15, %v218_v44  ;;  %v7773_v41 = vsel %vm628_vm10, 1.0, %v10337_v2  ;;  %v220_v62 = vadd.s32 112, %v7107_v1 }
  0x5d   : > { %vm632_vm13 = vcmp.ne.s32.totalorder %v312_v34, 0 }
  0x5e   : > { %vm634_vm14 = vcmp.ne.s32.totalorder %v326_v9, 0 }
  0x88   : > { %v6239_v6 = vpop.permute.xlu0 %6238 }
  0x89   : > { %v6241_v53 = vunpack.i.h.bf16 %v6239_v6  ;;  %v6240_v17 = vunpack.i.l.bf16 %v6239_v6 }
  0x8b   : > { %v1267_v55 = vsel %vm1266_vm8, %v881_v25, %v6240_v17  ;;  %v1268_v45 = vsel %vm1266_vm8, %v879_v3, %v6241_v53 }
  0x8c   : > { %v6244_v54 = vpop.permute.xlu0 %6243 }
  0x8d   : > { %v6246_v27 = vunpack.i.h.bf16 %v6244_v54  ;;  %v6245_v32 = vunpack.i.l.bf16 %v6244_v54 }
  0x8f   : > { %v6254_v28 = vpop.permute.xlu1 %6253  ;;  %v1270_v3 = vsel %vm1266_vm8, %v7597_v60, %v6246_v27  ;;  %v1269_v15 = vsel %vm1266_vm8, %v883_v35, %v6245_v32  ;;  %v7780_v60 = vsel %vm630_vm12, 1.0, %v10337_v2  ;;  %v887_v32 = vmul.f32 %v7773_v41, %v7195_v38 }
  0x90   : > { %v6256_v51 = vunpack.i.h.bf16 %v6254_v28  ;;  %v6255_v0 = vunpack.i.l.bf16 %v6254_v28  ;;  %v6249_v8 = vpop.permute.xlu0 %6248  ;;  %v7795_v38 = vsel %vm632_vm13, 1.0, %v10337_v2  ;;  %vm7076_vm13 = vmmov 0  }
  0x91   : > { %v6251_v18 = vunpack.i.h.bf16 %v6249_v8  ;;  %v6250_v33 = vunpack.i.l.bf16 %v6249_v8 }
  0x92   : > { %v1300_v16 = vsel %vm1299_vm9, %v1267_v55, %v6255_v0  ;;  %v1301_v56 = vsel %vm1299_vm9, %v1268_v45, %v6256_v51  ;;  %v889_v45 = vmul.f32 %v7780_v60, %v7274_v5 }
  0x93   : > { %v6259_v6 = vpop.permute.xlu1 %6258  ;;  %v1332_v29 = vpack.c.bf16 %v1301_v56, %v1300_v16  ;;  %v1272_v26 = vsel %vm1266_vm8, %v7605_v47, %v6251_v18  ;;  %v1271_v49 = vsel %vm1266_vm8, %v885_v13, %v6250_v33  ;;  %v222_v47 = vadd.s32 128, %v7107_v1 }
  0x94   : > { %v6261_v53 = vunpack.i.h.bf16 %v6259_v6  ;;  %v6260_v17 = vunpack.i.l.bf16 %v6259_v6  ;;  %v6269_v25 = vpop.permute.xlu0 %6268  ;;  %v340_v16 = vand.u32 15, %v220_v62 }
  0x95   : > { %5885 = vmatprep.mubr.msk.bf16.mxu0 %vm1357_vm11, %v1332_v29  ;;  %v6271_v54 = vunpack.i.h.bf16 %v6269_v25  ;;  %v6270_v21 = vunpack.i.l.bf16 %v6269_v25  ;;  %v354_v5 = vand.u32 15, %v222_v47  ;;  %v226_v47 = vadd.s32 160, %v7107_v1 }
  0x96   : > { %v1303_v61 = vsel %vm1299_vm9, %v1270_v3, %v6261_v53  ;;  %v1302_v35 = vsel %vm1299_vm9, %v1269_v15, %v6260_v17  ;;  %v7798_v3 = vsel %vm634_vm14, 1.0, %v10337_v2  ;;  %vm7808_vm15 = vcmp.ne.s32.totalorder %v340_v16, 0 }
  0x97   : > { %v1304_v44 = vsel %vm1299_vm9, %v1271_v49, %v6270_v21  ;;  %v1305_v27 = vsel %vm1299_vm9, %v1272_v26, %v6271_v54  ;;  %v6264_v28 = vpop.permute.xlu1 %6263  ;;  %v1333_v55 = vpack.c.bf16 %v1303_v61, %v1302_v35  ;;  %10381 = vst [vmem:[#allocation21_spill] sm:$0xff] %v7798_v3  ;;  %vm638_vm2 = vcmp.ne.s32.totalorder %v354_v5, 0 }
  0x98   : > { %v6274_v51 = vpop.permute.xlu0 %6273  ;;  %v1334_v0 = vpack.c.bf16 %v1305_v27, %v1304_v44  ;;  %v6266_v13 = vunpack.i.h.bf16 %v6264_v28  ;;  %v6265_v8 = vunpack.i.l.bf16 %v6264_v28  ;;  %v891_v44 = vmul.f32 %v7795_v38, %v7259_v11 }
  0x99   : > { %5886 = vmatmul.mubr.msk.bf16.vlgmr.msra.gmra.mrb[0].mxu0 %vm1357_vm11, %v1333_v55  ;;  %v6276_v18 = vunpack.i.h.bf16 %v6274_v51  ;;  %v6275_v33 = vunpack.i.l.bf16 %v6274_v51  ;;  %v893_v27 = vmul.f32 %v7798_v3, %v7327_v63  ;;  %v7828_v11 = vsel %vm638_vm2, 1.0, %v10337_v2 }
  0x9a   : > { %5889 = vmatprep.mubr.msk.bf16.mxu0 %vm1357_vm11, %v1334_v0  ;;  %v1274_v26 = vsel %vm1266_vm8, %v7640_v24, %v6266_v13  ;;  %v1273_v49 = vsel %vm1266_vm8, %v887_v32, %v6265_v8  ;;  %v7825_v8 = vsel %vm7808_vm15, 1.0, %v10337_v2  ;;  %10385 = vst [vmem:[#allocation23_spill] sm:$0xff] %v7828_v11  ;;  %vm5344_vm14 = vcmask 1041409  }
  0x9b   : > { %v6279_v56 = vpop.permute.xlu1 %6278  ;;  %v1276_v34 = vsel %vm1266_vm8, %v7648_v7, %v6276_v18  ;;  %v1275_v9 = vsel %vm1266_vm8, %v889_v45, %v6275_v33  ;;  %v224_v7 = vadd.s32 144, %v7107_v1  ;;  %10384 = vst [vmem:[#allocation22_spill] sm:$0xff] %v7825_v8  ;;  %v382_v18 = vand.u32 15, %v226_v47 }
  0x9c   : > { %v6281_v15 = vunpack.i.h.bf16 %v6279_v56  ;;  %v6280_v6 = vunpack.i.l.bf16 %v6279_v56  ;;  %v6289_v29 = vpop.permute.xlu0 %6288  ;;  %vm5346_vm15 = vcmask 1042434   ;;  %vm5348_vm2 = vcmask 1043459  }
  0x9d   : > { %v6291_v53 = vunpack.i.h.bf16 %v6289_v29  ;;  %v6290_v17 = vunpack.i.l.bf16 %v6289_v29  ;;  %v368_v63 = vand.u32 15, %v224_v7  ;;  %v897_v7 = vmul.f32 %v7828_v11, %v7392_v22 }
  0x9e   : > { %v1306_v25 = vsel %vm1299_vm9, %v1273_v49, %v6280_v6  ;;  %v1307_v54 = vsel %vm1299_vm9, %v1274_v26, %v6281_v15  ;;  %vm642_vm4 = vcmp.ne.s32.totalorder %v382_v18, 0 }
  0x9f   : > { %v1308_v61 = vsel %vm1299_vm9, %v1275_v9, %v6290_v17  ;;  %v1309_v35 = vsel %vm1299_vm9, %v1276_v34, %v6291_v53  ;;  %v6284_v62 = vpop.permute.xlu1 %6283  ;;  %v1335_v24 = vpack.c.bf16 %v1307_v54, %v1306_v25  ;;  %v895_v53 = vmul.f32 %v7825_v8, %v7312_v59 }
  0xa0   : > { %v6299_v32 = vpop.permute.xlu0 %6298  ;;  %v1336_v28 = vpack.c.bf16 %v1309_v35, %v1308_v61  ;;  %v6286_v55 = vunpack.i.h.bf16 %v6284_v62  ;;  %v6285_v45 = vunpack.i.l.bf16 %v6284_v62  ;;  %vm640_vm3 = vcmp.ne.s32.totalorder %v368_v63, 0 }
  0xa1   : > { %5890 = vmatmul.mubr.msk.bf16.gmra.mrb[4].mxu0 %vm1357_vm11, %v1335_v24  ;;  %v6301_v51 = vunpack.i.h.bf16 %v6299_v32  ;;  %v6300_v0 = vunpack.i.l.bf16 %v6299_v32  ;;  %v7849_v32 = vsel %vm640_vm3, 1.0, %v10337_v2  ;;  %vm5350_vm3 = vcmask 1044484  }
  0xa2   : > { %5893 = vmatprep.mubr.msk.bf16.mxu0 %vm1357_vm11, %v1336_v28  ;;  %v1278_v9 = vsel %vm1266_vm8, %v7656_v40, %v6286_v55  ;;  %v1277_v15 = vsel %vm1266_vm8, %v891_v44, %v6285_v45  ;;  %v230_v40 = vadd.s32 192, %v7107_v1  ;;  %10386 = vst [vmem:[#allocation24_spill] sm:$0xff] %v7849_v32  ;;  %v7852_v28 = vsel %vm642_vm4, 1.0, %v10337_v2 }
  0xa3   : > { %v6294_v13 = vpop.permute.xlu1 %6293  ;;  %v1280_v33 = vsel %vm1266_vm8, %v7668_v4, %v6301_v51  ;;  %v1279_v16 = vsel %vm1266_vm8, %v893_v27, %v6300_v0  ;;  %v228_v4 = vadd.s32 176, %v7107_v1  ;;  %10387 = vst [vmem:[#allocation25_spill] sm:$0xff] %v7852_v28  ;;  %vm5352_vm4 = vcmask 1045509  }
  0xa4   : > { %v6296_v56 = vunpack.i.h.bf16 %v6294_v13  ;;  %v6295_v5 = vunpack.i.l.bf16 %v6294_v13  ;;  %v6309_v34 = vpop.permute.xlu0 %6308  ;;  %v410_v22 = vand.u32 15, %v230_v40 }
  0xa5   : > { %v6311_v6 = vunpack.i.h.bf16 %v6309_v34  ;;  %v6310_v29 = vunpack.i.l.bf16 %v6309_v34  ;;  %v396_v44 = vand.u32 15, %v228_v4 }
  0xa6   : > { %v1310_v26 = vsel %vm1299_vm9, %v1277_v15, %v6295_v5  ;;  %v1311_v49 = vsel %vm1299_vm9, %v1278_v9, %v6296_v56  ;;  %vm646_vm6 = vcmp.ne.s32.totalorder %v410_v22, 0 }
  0xa7   : > { %v1312_v17 = vsel %vm1299_vm9, %v1279_v16, %v6310_v29  ;;  %v1313_v25 = vsel %vm1299_vm9, %v1280_v33, %v6311_v6  ;;  %v6304_v54 = vpop.permute.xlu1 %6303  ;;  %v1337_v21 = vpack.c.bf16 %v1311_v49, %v1310_v26  ;;  %vm7862_vm5 = vcmp.ne.s32.totalorder %v396_v44, 0 }
  0xa8   : > { %v6319_v61 = vpop.permute.xlu0 %6318  ;;  %v1338_v35 = vpack.c.bf16 %v1313_v25, %v1312_v17  ;;  %v6306_v62 = vunpack.i.h.bf16 %v6304_v54  ;;  %v6305_v24 = vunpack.i.l.bf16 %v6304_v54  ;;  %v234_v29 = vadd.s32 224, %v7107_v1 }
  0xa9   : > { %5894 = vmatmul.mubr.msk.bf16.gmra.mrb[8].mxu0 %vm1357_vm11, %v1337_v21  ;;  %v6321_v59 = vunpack.i.h.bf16 %v6319_v61  ;;  %v6320_v47 = vunpack.i.l.bf16 %v6319_v61  ;;  %v899_v26 = vmul.f32 %v7849_v32, %v7377_v37  ;;  %v901_v49 = vmul.f32 %v7852_v28, %v7444_v50 }
  0xaa   : > { %5897 = vmatprep.mubr.msk.bf16.mxu0 %vm1357_vm11, %v1338_v35  ;;  %v1282_v63 = vsel %vm1266_vm8, %v7676_v23, %v6306_v62  ;;  %v1281_v18 = vsel %vm1266_vm8, %v895_v53, %v6305_v24  ;;  %v7882_v37 = vsel %vm646_vm6, 1.0, %v10337_v2  ;;  %v438_v61 = vand.u32 15, %v234_v29 }
  0xab   : > { %v6314_v27 = vpop.permute.xlu1 %6313  ;;  %v1284_v55 = vsel %vm1266_vm8, %v7687_v12, %v6321_v59  ;;  %v1283_v45 = vsel %vm1266_vm8, %v897_v7, %v6320_v47  ;;  %v232_v12 = vadd.s32 208, %v7107_v1  ;;  %v7879_v7 = vsel %vm7862_vm5, 1.0, %v10337_v2  ;;  %10391 = vst [vmem:[#allocation27_spill] sm:$0xff] %v7882_v37 }
  0xac   : > { %v6316_v51 = vunpack.i.h.bf16 %v6314_v27  ;;  %v6315_v0 = vunpack.i.l.bf16 %v6314_v27  ;;  %v6329_v13 = vpop.permute.xlu0 %6328  ;;  %10390 = vst [vmem:[#allocation26_spill] sm:$0xff] %v7879_v7  ;;  %vm650_vm10 = vcmp.ne.s32.totalorder %v438_v61, 0  ;;  %vm5354_vm5 = vcmask 1046534  }
  0xad   : > { %v6331_v33 = vunpack.i.h.bf16 %v6329_v13  ;;  %v6330_v16 = vunpack.i.l.bf16 %v6329_v13  ;;  %v424_v50 = vand.u32 15, %v232_v12  ;;  %v10392_v13 = vld [vmem:[#allocation11_spill] sm:$0xff]  ;;  %v7904_v29 = vsel %vm650_vm10, 1.0, %v10337_v2 }
  0xae   : > { %v1314_v56 = vsel %vm1299_vm9, %v1281_v18, %v6315_v0  ;;  %v1315_v5 = vsel %vm1299_vm9, %v1282_v63, %v6316_v51  ;;  %v903_v63 = vmul.f32 %v7879_v7, %v10392_v13  ;;  %vm5356_vm6 = vcmask 1047559  }
  0xaf   : > { %v1316_v9 = vsel %vm1299_vm9, %v1283_v45, %v6330_v16  ;;  %v1317_v15 = vsel %vm1299_vm9, %v1284_v55, %v6331_v33  ;;  %v6324_v6 = vpop.permute.xlu1 %6323  ;;  %v1339_v23 = vpack.c.bf16 %v1315_v5, %v1314_v56  ;;  %v10393_v16 = vld [vmem:[#allocation15_spill] sm:$0xff]  ;;  %vm648_vm7 = vcmp.ne.s32.totalorder %v424_v50, 0 }
  0xb0   : > { %v6339_v53 = vpop.permute.xlu0 %6338  ;;  %v1340_v4 = vpack.c.bf16 %v1317_v15, %v1316_v9  ;;  %v6326_v17 = vunpack.i.h.bf16 %v6324_v6  ;;  %v6325_v25 = vunpack.i.l.bf16 %v6324_v6  ;;  %10395 = vst [vmem:[#allocation15_spill] sm:$0xff] %v7904_v29 }
  0xb1   : > { %5898 = vmatmul.mubr.msk.bf16.gmra.mrb[12].mxu0 %vm1357_vm11, %v1339_v23  ;;  %v6341_v54 = vunpack.i.h.bf16 %v6339_v53  ;;  %v6340_v21 = vunpack.i.l.bf16 %v6339_v53  ;;  %v7901_v23 = vsel %vm648_vm7, 1.0, %v10337_v2  ;;  %vm5500_vm7 = vcmask 277504  }
  0xb2   : > { %5901 = vmatprep.mubr.msk.bf16.mxu0 %vm1357_vm11, %v1340_v4  ;;  %v1286_v44 = vsel %vm1266_vm8, %v7696_v39, %v6326_v17  ;;  %v1285_v27 = vsel %vm1266_vm8, %v899_v26, %v6325_v25  ;;  %v905_v39 = vmul.f32 %v7882_v37, %v10393_v16  ;;  %10394 = vst [vmem:[#allocation11_spill] sm:$0xff] %v7901_v23  ;;  %v236_v26 = vadd.s32 240, %v7107_v1 }
  0xb3   : > { %v6334_v40 = vpop.permute.xlu1 %6333  ;;  %v1288_v35 = vsel %vm1266_vm8, %v7704_v14, %v6341_v54  ;;  %v1287_v62 = vsel %vm1266_vm8, %v901_v49, %v6340_v21 }
  0xb4   : > { %v6336_v24 = vunpack.i.h.bf16 %v6334_v40  ;;  %v6335_v59 = vunpack.i.l.bf16 %v6334_v40  ;;  %v6349_v47 = vpop.permute.xlu0 %6348 }
  0xb5   : > { %v6351_v22 = vunpack.i.h.bf16 %v6349_v47  ;;  %v6350_v55 = vunpack.i.l.bf16 %v6349_v47  ;;  %v452_v47 = vand.u32 15, %v236_v26 }
  0xb6   : > { %v1318_v45 = vsel %vm1299_vm9, %v1285_v27, %v6335_v59  ;;  %v1319_v51 = vsel %vm1299_vm9, %v1286_v44, %v6336_v24  ;;  %v10396_v44 = vld [vmem:[#allocation14_spill] sm:$0xff] }
  0xb7   : > { %v1320_v0 = vsel %vm1299_vm9, %v1287_v62, %v6350_v55  ;;  %v1321_v14 = vsel %vm1299_vm9, %v1288_v35, %v6351_v22  ;;  %v6344_v18 = vpop.permute.xlu1 %6343  ;;  %v1341_v33 = vpack.c.bf16 %v1319_v51, %v1318_v45  ;;  %v907_v27 = vmul.f32 %v7901_v23, %v10396_v44  ;;  %v10397_v22 = vld [vmem:[#allocation19_spill] sm:$0xff] }
  0xb8   : > { %v6359_v56 = vpop.permute.xlu0 %6358  ;;  %v1342_v5 = vpack.c.bf16 %v1321_v14, %v1320_v0  ;;  %v6346_v34 = vunpack.i.h.bf16 %v6344_v18  ;;  %v6345_v12 = vunpack.i.l.bf16 %v6344_v18  ;;  %vm652_vm12 = vcmp.ne.s32.totalorder %v452_v47, 0 }
  0xb9   : > { %5902 = vmatmul.mubr.msk.bf16.gmra.mrb[16].mxu0 %vm1357_vm11, %v1341_v33  ;;  %v6361_v9 = vunpack.i.h.bf16 %v6359_v56  ;;  %v6360_v15 = vunpack.i.l.bf16 %v6359_v56  ;;  %v7932_v26 = vsel %vm652_vm12, 1.0, %v10337_v2 }
  0xba   : > { %5905 = vmatprep.mubr.msk.bf16.mxu0 %vm1357_vm11, %v1342_v5  ;;  %v1290_v54 = vsel %vm1266_vm8, %v7712_v58, %v6346_v34  ;;  %v1289_v21 = vsel %vm1266_vm8, %v903_v63, %v6345_v12  ;;  %v909_v58 = vmul.f32 %v7904_v29, %v10397_v22  ;;  %10398 = vst [vmem:[#allocation14_spill] sm:$0xff] %v7932_v26 }
  0xbb   : > { %v6354_v6 = vpop.permute.xlu1 %6353  ;;  %v1292_v49 = vsel %vm1266_vm8, %v7721_v48, %v6361_v9  ;;  %v1291_v53 = vsel %vm1266_vm8, %v905_v39, %v6360_v15 }
  0xbc   : > { %v6356_v4 = vunpack.i.h.bf16 %v6354_v6  ;;  %v6355_v17 = vunpack.i.l.bf16 %v6354_v6  ;;  %v6369_v25 = vpop.permute.xlu0 %6368 }
  0xbd   : > { %v6371_v40 = vunpack.i.h.bf16 %v6369_v25  ;;  %v6370_v50 = vunpack.i.l.bf16 %v6369_v25  ;;  %v10399_v25 = vld [vmem:[#allocation18_spill] sm:$0xff] }
  0xbe   : > { %v1322_v61 = vsel %vm1299_vm9, %v1289_v21, %v6355_v17  ;;  %v1323_v35 = vsel %vm1299_vm9, %v1290_v54, %v6356_v4 }
  0xbf   : > { %v1324_v62 = vsel %vm1299_vm9, %v1291_v53, %v6370_v50  ;;  %v1325_v48 = vsel %vm1299_vm9, %v1292_v49, %v6371_v40  ;;  %v6364_v24 = vpop.permute.xlu1 %6363  ;;  %v1343_v59 = vpack.c.bf16 %v1323_v35, %v1322_v61  ;;  %v10400_v40 = vrot.slane %v7525_v43, 7 }
  0xc0   : > { %v6379_v55 = vpop.permute.xlu0 %6378  ;;  %v1344_v45 = vpack.c.bf16 %v1325_v48, %v1324_v62  ;;  %v6366_v51 = vunpack.i.h.bf16 %v6364_v24  ;;  %v6365_v0 = vunpack.i.l.bf16 %v6364_v24  ;;  %v1350_v43 = vsub.s32 0, %v7107_v1 }
  0xc1   : > { %5906 = vmatmul.mubr.msk.bf16.gmra.mrb[20].mxu0 %vm1357_vm11, %v1343_v59  ;;  %v6381_v14 = vunpack.i.h.bf16 %v6379_v55  ;;  %v6380_v13 = vunpack.i.l.bf16 %v6379_v55  ;;  %v849_v50 = vsel %vm848_vm0, %v10400_v40, %v847_v46 }
  0xc2   : > { %5909 = vmatprep.mubr.msk.bf16.mxu0 %vm1357_vm11, %v1344_v45  ;;  %v1294_v5 = vsel %vm1266_vm8, %v7729_v19, %v6366_v51  ;;  %v1293_v34 = vsel %vm1266_vm8, %v907_v27, %v6365_v0  ;;  %v911_v19 = vmul.f32 %v7932_v26, %v10399_v25  ;;  %v7955_v46 = vrot.slane %v204_v31, %v1350_v43  ;;  %v7038_v27 = vld [vmem:[%s10205_s1 + $0x30] sm:$0xff]   ;;  %v7039_v0 = vld [vmem:[%s10205_s1 + $0x38] sm:$0xff]  }
  0xc3   : > { %v6374_v63 = vpop.permute.xlu1 %6373  ;;  %v1296_v18 = vsel %vm1266_vm8, %v7737_v52, %v6381_v14  ;;  %v1295_v33 = vsel %vm1266_vm8, %v909_v58, %v6380_v13  ;;  %5917 = vmatprep.subr.bf16.mxu1 %v7038_v27  ;;  %v10435_v26 = vld [vmem:[#allocation13_spill] sm:$0xff] }
  0xc4   : > { %v6376_v16 = vunpack.i.h.bf16 %v6374_v63  ;;  %v6375_v39 = vunpack.i.l.bf16 %v6374_v63  ;;  %v6389_v56 = vpop.permute.xlu0 %6388  ;;  %5918 = vmatpush3.bf16.msra.mxu1 %v7038_v27 }
  0xc5   : > { %v6391_v12 = vunpack.i.h.bf16 %v6389_v56  ;;  %v6390_v9 = vunpack.i.l.bf16 %v6389_v56  ;;  %5919 = vmatprep.subr.bf16.mxu1 %v7039_v0 }
  0xc6   : > { %v1326_v15 = vsel %vm1299_vm9, %v1293_v34, %v6375_v39  ;;  %v1327_v6 = vsel %vm1299_vm9, %v1294_v5, %v6376_v16 }
  0xc7   : > { %v1328_v52 = vsel %vm1299_vm9, %v1295_v33, %v6390_v9  ;;  %v1329_v49 = vsel %vm1299_vm9, %v1296_v18, %v6391_v12  ;;  %v6384_v53 = vpop.permute.xlu1 %6383  ;;  %v1345_v4 = vpack.c.bf16 %v1327_v6, %v1326_v15 }
  0xc8   : > { %v1346_v17 = vpack.c.bf16 %v1329_v49, %v1328_v52  ;;  %v6386_v54 = vunpack.i.h.bf16 %v6384_v53  ;;  %v6385_v21 = vunpack.i.l.bf16 %v6384_v53  ;;  %5920 = vmatpush3.bf16.msra.mxu1 %v7039_v0 }
  0xc9   : > { %5910 = vmatmul.mubr.msk.bf16.gmra.mrb[24].mxu0 %vm1357_vm11, %v1345_v4 }
  0xca   : > { %5913 = vmatprep.mubr.msk.bf16.mxu0 %vm1357_vm11, %v1346_v17  ;;  %v1298_v48 = vsel %vm1266_vm8, %v849_v50, %v6386_v54  ;;  %v1297_v24 = vsel %vm1266_vm8, %v911_v19, %v6385_v21  ;;  %v7040_v17 = vld [vmem:[%s10205_s1 + $0x40] sm:$0xff]   ;;  %vm2058_vm8 = vcmask 130048  }
  0xcb   : > { %v6394_v61 = vpop.permute.xlu1 %6393  ;;  %v10405_v19 = vld [vmem:[#allocation2_spill] sm:$0xff]  ;;  %5921 = vmatprep.subr.bf16.mxu1 %v7040_v17 }
  0xcc   : > { %v6396_v35 = vunpack.i.h.bf16 %v6394_v61  ;;  %v6395_v62 = vunpack.i.l.bf16 %v6394_v61  ;;  %5922 = vmatpush3.bf16.msra.mxu1 %v7040_v17 }
  0xce   : > { %v1330_v59 = vsel %vm1299_vm9, %v1297_v24, %v6395_v62  ;;  %v1331_v47 = vsel %vm1299_vm9, %v1298_v48, %v6396_v35  ;;  %vm2091_vm9 = vcmask 261120  }
  0xcf   : > { %v1347_v44 = vpack.c.bf16 %v1331_v47, %v1330_v59 }
  0xd1   : > { %5914 = vmatmul.mubr.msk.bf16.gmra.mrb[28].mxu0 %vm1357_vm11, %v1347_v44  ;;  %vm2162_vm11 = vcmask 392192  }
 0x16c   : > { %v5887_v22 = vpop.f32.mrb[0].mxu0 }
 0x16d   : > { %v1453_v58 = vadd.f32 %v5887_v22, %v7955_v46  ;;  %v1444_v55 = vpop.f32.mrb[1].mxu0 }
 0x16e   : > { %v1445_v45 = vadd.f32 %v1444_v55, %v7955_v46  ;;  %v5888_v51 = vpop.f32.mrb[2].mxu0  ;;  %v10409_v55 = vld [vmem:[#allocation3_spill] sm:$0xff] }
 0x16f   : > { %v1456_v14 = vadd.f32 %v5888_v51, %v7955_v46  ;;  %v1447_v13 = vpop.f32.mrb[3].mxu0  ;;  %v7966_v63 = vmax.f32 %v1453_v58, 0.0 }
 0x170   : > { %v1448_v18 = vadd.f32 %v1447_v13, %v7955_v46  ;;  %v7971_v16 = vmax.f32 %v1445_v45, 0.0 }
 0x171   : > { %10401 = vst [vmem:[#allocation19_spill] sm:$0xff] %v7966_v63  ;;  %v7969_v33 = vmax.f32 %v1456_v14, 0.0  ;;  %v1708_v5 = vrot.slane %v7966_v63, 1 }
 0x172   : > { %10403 = vst [vmem:[#allocation28_spill] sm:$0xff] %v7971_v16  ;;  %v7973_v39 = vmax.f32 %v1448_v18, 0.0  ;;  %v10263_v52 = vrot.slane %v7971_v16, 1 }
 0x173   : > { %10402 = vst [vmem:[#allocation18_spill] sm:$0xff] %v7969_v33  ;;  %v6397_v56 = vpack.i.bf16 %v7969_v33, %v7966_v63  ;;  %v1709_v62 = vrot.slane %v7969_v33, 1 }
 0x174   : > { %10404 = vst [vmem:[#allocation29_spill] sm:$0xff] %v7973_v39  ;;  %v1707_v34 = vrot.slane %v7973_v39, 1  ;;  %v5891_v12 = vpop.f32.mrb[4].mxu0  ;;  %v6402_v9 = vpack.i.bf16 %v7973_v39, %v7971_v16 }
 0x175   : > { %v1469_v15 = vadd.f32 %v5891_v12, %v7955_v46  ;;  %6398 = vrot.lane.b32.xlu1 %v6397_v56, %s7073_s28  ;;  %v1460_v6 = vpop.f32.mrb[5].mxu0  ;;  %v1766_v13 = vsel %vm945_vm1, %v1708_v5, %v1709_v62  ;;  %v10411_v12 = vld [vmem:[#allocation4_spill] sm:$0xff] }
 0x176   : > { %v1461_v49 = vadd.f32 %v1460_v6, %v7955_v46  ;;  %v5892_v53 = vpop.f32.mrb[6].mxu0  ;;  %6403 = vrot.lane.b32.xlu0 %v6402_v9, %s7073_s28  ;;  %v1767_v4 = vsel %vm945_vm1, %v1707_v34, %v1708_v5  ;;  %v1768_v61 = vsel %vm945_vm1, %v10263_v52, %v1707_v34 }
 0x177   : > { %v1463_v25 = vpop.f32.mrb[7].mxu0  ;;  %v1771_v54 = vmul.f32 %v10405_v19, %v1767_v4  ;;  %v7992_v21 = vmax.f32 %v1469_v15, 0.0  ;;  %v1472_v24 = vadd.f32 %v5892_v53, %v7955_v46 }
 0x178   : > { %v7994_v40 = vmax.f32 %v1461_v49, 0.0  ;;  %v1464_v50 = vadd.f32 %v1463_v25, %v7955_v46 }
 0x179   : > { %10406 = vst [vmem:[#allocation30_spill] sm:$0xff] %v7992_v21  ;;  %v6407_v35 = vpack.i.bf16 %v1771_v54, %v1768_v61  ;;  %v1712_v47 = vrot.slane %v7992_v21, 1  ;;  %v8015_v51 = vmax.f32 %v1472_v24, 0.0 }
 0x17a   : > { %10407 = vst [vmem:[#allocation31_spill] sm:$0xff] %v7994_v40  ;;  %v1710_v48 = vrot.slane %v7994_v40, 1  ;;  %v8004_v59 = vmax.f32 %v1464_v50, 0.0 }
 0x17b   : > { %6408 = vrot.lane.b32.xlu0 %v6407_v35, %s7074_s4  ;;  %10410 = vst [vmem:[#allocation33_spill] sm:$0xff] %v8015_v51  ;;  %v1713_v4 = vrot.slane %v8015_v51, 1  ;;  %v6422_v50 = vpack.i.bf16 %v8015_v51, %v7992_v21 }
 0x17c   : > { %10408 = vst [vmem:[#allocation32_spill] sm:$0xff] %v8004_v59  ;;  %v1711_v44 = vrot.slane %v8004_v59, 1  ;;  %v5895_v43 = vpop.f32.mrb[8].mxu0  ;;  %v6412_v31 = vpack.i.bf16 %v8004_v59, %v7994_v40  ;;  %v1765_v27 = vsel %vm945_vm1, %v1709_v62, %v1710_v48 }
 0x17d   : > { %v1485_v22 = vadd.f32 %v5895_v43, %v7955_v46  ;;  %v1476_v58 = vpop.f32.mrb[9].mxu0  ;;  %v1773_v45 = vmul.f32 %v10409_v55, %v1765_v27 }
 0x17e   : > { %v1477_v0 = vadd.f32 %v1476_v58, %v7955_v46  ;;  %v5896_v14 = vpop.f32.mrb[10].mxu0  ;;  %v1763_v18 = vsel %vm945_vm1, %v1711_v44, %v1712_v47  ;;  %v1764_v53 = vsel %vm945_vm1, %v1710_v48, %v1711_v44 }
 0x17f   : > { %v1479_v56 = vpop.f32.mrb[11].mxu0  ;;  %6413 = vrot.lane.b32.xlu0 %v6412_v31, %s7073_s28  ;;  %v6417_v34 = vpack.i.bf16 %v1773_v45, %v1766_v13  ;;  %v1775_v9 = vmul.f32 %v10411_v12, %v1763_v18  ;;  %v8024_v15 = vmax.f32 %v1485_v22, 0.0  ;;  %v1488_v25 = vadd.f32 %v5896_v14, %v7955_v46  ;;  %v10415_v31 = vld [vmem:[#allocation5_spill] sm:$0xff] }
 0x180   : > { %v8026_v6 = vmax.f32 %v1477_v0, 0.0  ;;  %v1480_v49 = vadd.f32 %v1479_v56, %v7955_v46  ;;  %v1762_v0 = vsel %vm945_vm1, %v1712_v47, %v1713_v4  ;;  %v10417_v56 = vld [vmem:[#allocation6_spill] sm:$0xff] }
 0x181   : > { %10412 = vst [vmem:[#allocation34_spill] sm:$0xff] %v8024_v15  ;;  %6418 = vrot.lane.b32.xlu1 %v6417_v34, %s7074_s4  ;;  %v6427_v5 = vpack.i.bf16 %v1775_v9, %v1764_v53  ;;  %v1716_v61 = vrot.slane %v8024_v15, 1  ;;  %v8049_v22 = vmax.f32 %v1488_v25, 0.0 }
 0x182   : > { %10413 = vst [vmem:[#allocation35_spill] sm:$0xff] %v8026_v6  ;;  %v1714_v17 = vrot.slane %v8026_v6, 1  ;;  %v8035_v54 = vmax.f32 %v1480_v49, 0.0 }
 0x183   : > { %6428 = vrot.lane.b32.xlu0 %v6427_v5, %s7074_s4  ;;  %10416 = vst [vmem:[#allocation37_spill] sm:$0xff] %v8049_v22 }
 0x184   : > { %10414 = vst [vmem:[#allocation36_spill] sm:$0xff] %v8035_v54  ;;  %v1715_v35 = vrot.slane %v8035_v54, 1  ;;  %v5899_v62 = vpop.f32.mrb[12].mxu0  ;;  %v6432_v48 = vpack.i.bf16 %v8035_v54, %v8026_v6  ;;  %v1761_v24 = vsel %vm945_vm1, %v1713_v4, %v1714_v17  ;;  %v1717_v4 = vrot.slane %v8049_v22, 1 }
 0x185   : > { %v1501_v44 = vadd.f32 %v5899_v62, %v7955_v46  ;;  %v1492_v43 = vpop.f32.mrb[13].mxu0  ;;  %6423 = vrot.lane.b32.xlu1 %v6422_v50, %s7073_s28  ;;  %v1777_v27 = vmul.f32 %v10415_v31, %v1761_v24  ;;  %v10429_v31 = vld [vmem:[#allocation10_spill] sm:$0xff] }
 0x186   : > { %v1493_v58 = vadd.f32 %v1492_v43, %v7955_v46  ;;  %v5900_v45 = vpop.f32.mrb[14].mxu0  ;;  %v1759_v14 = vsel %vm945_vm1, %v1715_v35, %v1716_v61  ;;  %v1760_v5 = vsel %vm945_vm1, %v1714_v17, %v1715_v35 }
 0x187   : > { %v1495_v13 = vpop.f32.mrb[15].mxu0  ;;  %6433 = vrot.lane.b32.xlu0 %v6432_v48, %s7073_s28  ;;  %v6437_v18 = vpack.i.bf16 %v1777_v27, %v1762_v0  ;;  %v1779_v34 = vmul.f32 %v10417_v56, %v1759_v14  ;;  %v8058_v9 = vmax.f32 %v1501_v44, 0.0  ;;  %v1504_v50 = vadd.f32 %v5900_v45, %v7955_v46  ;;  %v10421_v45 = vld [vmem:[#allocation7_spill] sm:$0xff] }
 0x188   : > { %v8060_v49 = vmax.f32 %v1493_v58, 0.0  ;;  %v1496_v53 = vadd.f32 %v1495_v13, %v7955_v46  ;;  %v6442_v48 = vpack.i.bf16 %v8049_v22, %v8024_v15 }
 0x189   : > { %10418 = vst [vmem:[#allocation38_spill] sm:$0xff] %v8058_v9  ;;  %6438 = vrot.lane.b32.xlu1 %v6437_v18, %s7074_s4  ;;  %v6447_v47 = vpack.i.bf16 %v1779_v34, %v1760_v5  ;;  %v1720_v24 = vrot.slane %v8058_v9, 1  ;;  %v8083_v14 = vmax.f32 %v1504_v50, 0.0  ;;  %v1758_v34 = vsel %vm945_vm1, %v1716_v61, %v1717_v4 }
 0x18a   : > { %10419 = vst [vmem:[#allocation39_spill] sm:$0xff] %v8060_v49  ;;  %v1718_v25 = vrot.slane %v8060_v49, 1  ;;  %v8069_v62 = vmax.f32 %v1496_v53, 0.0 }
 0x18b   : > { %6448 = vrot.lane.b32.xlu0 %v6447_v47, %s7074_s4  ;;  %10422 = vst [vmem:[#allocation41_spill] sm:$0xff] %v8083_v14 }
 0x18c   : > { %10420 = vst [vmem:[#allocation40_spill] sm:$0xff] %v8069_v62  ;;  %v1719_v17 = vrot.slane %v8069_v62, 1  ;;  %v5903_v35 = vpop.f32.mrb[16].mxu0  ;;  %v6452_v44 = vpack.i.bf16 %v8069_v62, %v8060_v49  ;;  %v1757_v43 = vsel %vm945_vm1, %v1717_v4, %v1718_v25  ;;  %v1721_v4 = vrot.slane %v8083_v14, 1 }
 0x18d   : > { %v1517_v27 = vadd.f32 %v5903_v35, %v7955_v46  ;;  %v1508_v58 = vpop.f32.mrb[17].mxu0  ;;  %6443 = vrot.lane.b32.xlu1 %v6442_v48, %s7073_s28  ;;  %v1781_v0 = vmul.f32 %v10421_v45, %v1757_v43  ;;  %v10423_v35 = vld [vmem:[#allocation8_spill] sm:$0xff] }
 0x18e   : > { %v1509_v13 = vadd.f32 %v1508_v58, %v7955_v46  ;;  %v5904_v18 = vpop.f32.mrb[18].mxu0  ;;  %v1755_v53 = vsel %vm945_vm1, %v1719_v17, %v1720_v24  ;;  %v1756_v58 = vsel %vm945_vm1, %v1718_v25, %v1719_v17 }
 0x18f   : > { %v1511_v5 = vpop.f32.mrb[19].mxu0  ;;  %6453 = vrot.lane.b32.xlu0 %v6452_v44, %s7073_s28  ;;  %v6457_v47 = vpack.i.bf16 %v1781_v0, %v1758_v34  ;;  %v1783_v52 = vmul.f32 %v10423_v35, %v1755_v53  ;;  %v8092_v48 = vmax.f32 %v1517_v27, 0.0  ;;  %v1520_v44 = vadd.f32 %v5904_v18, %v7955_v46 }
 0x190   : > { %v8094_v43 = vmax.f32 %v1509_v13, 0.0  ;;  %v1512_v50 = vadd.f32 %v1511_v5, %v7955_v46  ;;  %v6462_v27 = vpack.i.bf16 %v8083_v14, %v8058_v9  ;;  %v10427_v5 = vld [vmem:[#allocation9_spill] sm:$0xff]  ;;  %v1754_v35 = vsel %vm945_vm1, %v1720_v24, %v1721_v4 }
 0x191   : > { %10424 = vst [vmem:[#allocation42_spill] sm:$0xff] %v8092_v48  ;;  %6458 = vrot.lane.b32.xlu1 %v6457_v47, %s7074_s4  ;;  %v6467_v61 = vpack.i.bf16 %v1783_v52, %v1756_v58  ;;  %v1724_v13 = vrot.slane %v8092_v48, 1 }
 0x192   : > { %10425 = vst [vmem:[#allocation43_spill] sm:$0xff] %v8094_v43  ;;  %v1722_v2 = vrot.slane %v8094_v43, 1  ;;  %v8103_v0 = vmax.f32 %v1512_v50, 0.0  ;;  %v8117_v50 = vmax.f32 %v1520_v44, 0.0 }
 0x193   : > { %6468 = vrot.lane.b32.xlu0 %v6467_v61, %s7074_s4 }
 0x194   : > { %10426 = vst [vmem:[#allocation44_spill] sm:$0xff] %v8103_v0  ;;  %v1723_v25 = vrot.slane %v8103_v0, 1  ;;  %v5907_v17 = vpop.f32.mrb[20].mxu0  ;;  %v6472_v52 = vpack.i.bf16 %v8103_v0, %v8094_v43  ;;  %v1753_v34 = vsel %vm945_vm1, %v1721_v4, %v1722_v2  ;;  %10428 = vst [vmem:[#allocation45_spill] sm:$0xff] %v8117_v50  ;;  %v1725_v4 = vrot.slane %v8117_v50, 1 }
 0x195   : > { %v1533_v18 = vadd.f32 %v5907_v17, %v7955_v46  ;;  %v1524_v53 = vpop.f32.mrb[21].mxu0  ;;  %6463 = vrot.lane.b32.xlu1 %v6462_v27, %s7073_s28  ;;  %v1785_v47 = vmul.f32 %v10427_v5, %v1753_v34 }
 0x196   : > { %v1525_v58 = vadd.f32 %v1524_v53, %v7955_v46  ;;  %v5908_v61 = vpop.f32.mrb[22].mxu0  ;;  %v1751_v45 = vsel %vm945_vm1, %v1723_v25, %v1724_v13  ;;  %v1752_v53 = vsel %vm945_vm1, %v1722_v2, %v1723_v25 }
 0x197   : > { %v1527_v56 = vpop.f32.mrb[23].mxu0  ;;  %6473 = vrot.lane.b32.xlu0 %v6472_v52, %s7073_s28  ;;  %v6477_v17 = vpack.i.bf16 %v1785_v47, %v1754_v35  ;;  %v1787_v12 = vmul.f32 %v10429_v31, %v1751_v45  ;;  %v8126_v27 = vmax.f32 %v1533_v18, 0.0  ;;  %v1536_v35 = vadd.f32 %v5908_v61, %v7955_v46  ;;  %v10433_v61 = vld [vmem:[#allocation12_spill] sm:$0xff] }
 0x198   : > { %v8128_v34 = vmax.f32 %v1525_v58, 0.0  ;;  %v1528_v44 = vadd.f32 %v1527_v56, %v7955_v46  ;;  %v6482_v45 = vpack.i.bf16 %v8117_v50, %v8092_v48  ;;  %v1750_v31 = vsel %vm945_vm1, %v1724_v13, %v1725_v4 }
 0x199   : > { %10430 = vst [vmem:[#allocation46_spill] sm:$0xff] %v8126_v27  ;;  %6478 = vrot.lane.b32.xlu1 %v6477_v17, %s7074_s4  ;;  %v6487_v24 = vpack.i.bf16 %v1787_v12, %v1752_v53  ;;  %v1728_v56 = vrot.slane %v8126_v27, 1 }
 0x19a   : > { %10431 = vst [vmem:[#allocation47_spill] sm:$0xff] %v8128_v34  ;;  %v1726_v5 = vrot.slane %v8128_v34, 1  ;;  %v8137_v52 = vmax.f32 %v1528_v44, 0.0  ;;  %v8151_v44 = vmax.f32 %v1536_v35, 0.0 }
 0x19b   : > { %6488 = vrot.lane.b32.xlu0 %v6487_v24, %s7074_s4 }
 0x19c   : > { %10432 = vst [vmem:[#allocation48_spill] sm:$0xff] %v8137_v52  ;;  %v1727_v2 = vrot.slane %v8137_v52, 1  ;;  %v5911_v25 = vpop.f32.mrb[24].mxu0  ;;  %v6492_v12 = vpack.i.bf16 %v8137_v52, %v8128_v34  ;;  %v1749_v18 = vsel %vm945_vm1, %v1725_v4, %v1726_v5  ;;  %10434 = vst [vmem:[#allocation49_spill] sm:$0xff] %v8151_v44  ;;  %v1729_v4 = vrot.slane %v8151_v44, 1 }
 0x19d   : > { %v1549_v47 = vadd.f32 %v5911_v25, %v7955_v46  ;;  %v1540_v58 = vpop.f32.mrb[25].mxu0  ;;  %6483 = vrot.lane.b32.xlu1 %v6482_v45, %s7073_s28  ;;  %v1789_v17 = vmul.f32 %v10433_v61, %v1749_v18 }
 0x19e   : > { %v1541_v53 = vadd.f32 %v1540_v58, %v7955_v46  ;;  %v5912_v24 = vpop.f32.mrb[26].mxu0  ;;  %v1747_v55 = vsel %vm945_vm1, %v1727_v2, %v1728_v56  ;;  %v1748_v58 = vsel %vm945_vm1, %v1726_v5, %v1727_v2 }
 0x19f   : > { %v1543_v19 = vpop.f32.mrb[27].mxu0  ;;  %6493 = vrot.lane.b32.xlu0 %v6492_v12, %s7073_s28  ;;  %v6497_v25 = vpack.i.bf16 %v1789_v17, %v1750_v31  ;;  %v1791_v29 = vmul.f32 %v10435_v26, %v1747_v55  ;;  %v8160_v45 = vmax.f32 %v1549_v47, 0.0  ;;  %v1552_v31 = vadd.f32 %v5912_v24, %v7955_v46  ;;  %v10439_v24 = vld [vmem:[#allocation16_spill] sm:$0xff] }
 0x1a0   : > { %v8162_v18 = vmax.f32 %v1541_v53, 0.0  ;;  %v1544_v35 = vadd.f32 %v1543_v19, %v7955_v46  ;;  %v6502_v55 = vpack.i.bf16 %v8151_v44, %v8126_v27  ;;  %v1746_v26 = vsel %vm945_vm1, %v1728_v56, %v1729_v4 }
 0x1a1   : > { %10436 = vst [vmem:[#allocation50_spill] sm:$0xff] %v8160_v45  ;;  %6498 = vrot.lane.b32.xlu1 %v6497_v25, %s7074_s4  ;;  %v6507_v13 = vpack.i.bf16 %v1791_v29, %v1748_v58  ;;  %v1732_v19 = vrot.slane %v8160_v45, 1 }
 0x1a2   : > { %10437 = vst [vmem:[#allocation51_spill] sm:$0xff] %v8162_v18  ;;  %v1730_v61 = vrot.slane %v8162_v18, 1  ;;  %v8171_v12 = vmax.f32 %v1544_v35, 0.0  ;;  %v8185_v35 = vmax.f32 %v1552_v31, 0.0 }
 0x1a3   : > { %6508 = vrot.lane.b32.xlu0 %v6507_v13, %s7074_s4 }
 0x1a4   : > { %10438 = vst [vmem:[#allocation52_spill] sm:$0xff] %v8171_v12  ;;  %v1731_v5 = vrot.slane %v8171_v12, 1  ;;  %v5915_v2 = vpop.f32.mrb[28].mxu0  ;;  %v6512_v29 = vpack.i.bf16 %v8171_v12, %v8162_v18  ;;  %v1745_v47 = vsel %vm945_vm1, %v1729_v4, %v1730_v61  ;;  %10440 = vst [vmem:[#allocation53_spill] sm:$0xff] %v8185_v35 }
 0x1a5   : > { %v1565_v17 = vadd.f32 %v5915_v2, %v7955_v46  ;;  %v1556_v53 = vpop.f32.mrb[29].mxu0  ;;  %6503 = vrot.lane.b32.xlu1 %v6502_v55, %s7073_s28  ;;  %v1793_v25 = vmul.f32 %v10439_v24, %v1745_v47  ;;  %v10442_v47 = vld [vmem:[#allocation17_spill] sm:$0xff] }
 0x1a6   : > { %v1557_v58 = vadd.f32 %v1556_v53, %v7955_v46  ;;  %v5916_v13 = vpop.f32.mrb[30].mxu0  ;;  %v1743_v23 = vsel %vm945_vm1, %v1731_v5, %v1732_v19  ;;  %v1744_v56 = vsel %vm945_vm1, %v1730_v61, %v1731_v5 }
 0x1a7   : > { %v8192_v37 = vmax.f32 %v1565_v17, 0.0  ;;  %v1568_v2 = vadd.f32 %v5916_v13, %v7955_v46  ;;  %v1559_v7 = vpop.f32.mrb[31].mxu0  ;;  %6513 = vrot.lane.b32.xlu0 %v6512_v29, %s7073_s28  ;;  %v6517_v55 = vpack.i.bf16 %v1793_v25, %v1746_v26  ;;  %v1795_v31 = vmul.f32 %v10442_v47, %v1743_v23 }
 0x1a8   : > { %v8197_v24 = vmax.f32 %v1557_v58, 0.0  ;;  %v1560_v53 = vadd.f32 %v1559_v7, %v7955_v46  ;;  %v1733_v13 = vrot.slane %v8185_v35, 1  ;;  %v6522_v7 = vpack.i.bf16 %v8185_v35, %v8160_v45 }
 0x1a9   : > { %10441 = vst [vmem:[#allocation54_spill] sm:$0xff] %v8192_v37  ;;  %v8202_v4 = vmax.f32 %v1568_v2, 0.0  ;;  %6518 = vrot.lane.b32.xlu1 %v6517_v55, %s7074_s4  ;;  %v6527_v17 = vpack.i.bf16 %v1795_v31, %v1744_v56  ;;  %v1736_v23 = vrot.slane %v8192_v37, 1  ;;  %v10446_v56 = vrot.slane %v7971_v16, 1 }
 0x1aa   : > { %10443 = vst [vmem:[#allocation17_spill] sm:$0xff] %v8197_v24  ;;  %v1734_v12 = vrot.slane %v8197_v24, 1  ;;  %v8207_v29 = vmax.f32 %v1560_v53, 0.0  ;;  %v1742_v58 = vsel %vm945_vm1, %v1732_v19, %v1733_v13 }
 0x1ab   : > { %10444 = vst [vmem:[#allocation55_spill] sm:$0xff] %v8202_v4  ;;  %6528 = vrot.lane.b32.xlu0 %v6527_v17, %s7074_s4  ;;  %v1737_v26 = vrot.slane %v8202_v4, 1  ;;  %v6542_v19 = vpack.i.bf16 %v8202_v4, %v8192_v37 }
 0x1ac   : > { %10445 = vst [vmem:[#allocation56_spill] sm:$0xff] %v8207_v29  ;;  %v1735_v46 = vrot.slane %v8207_v29, 1  ;;  %v6532_v61 = vpack.i.bf16 %v8207_v29, %v8197_v24  ;;  %v1741_v5 = vsel %vm945_vm1, %v1733_v13, %v1734_v12 }
 0x1ad   : > { %6523 = vrot.lane.b32.xlu1 %v6522_v7, %s7073_s28  ;;  %v1797_v25 = vmul.f32 %v7576_v36, %v1741_v5  ;;  %v1769_v17 = vsel %vm945_vm1, %v1737_v26, %v10446_v56  ;;  %v1610_v5 = vrot.slane %v7971_v16, 7  ;;  %v1614_v56 = vrot.slane %v7994_v40, 7 }
 0x1ae   : > { %v1739_v2 = vsel %vm945_vm1, %v1735_v46, %v1736_v23  ;;  %v1740_v53 = vsel %vm945_vm1, %v1734_v12, %v1735_v46  ;;  %v1801_v13 = vmul.f32 %v7628_v10, %v1769_v17  ;;  %v1738_v12 = vsel %vm945_vm1, %v1736_v23, %v1737_v26 }
 0x1af   : > { %6533 = vrot.lane.b32.xlu0 %v6532_v61, %s7073_s28  ;;  %v6537_v55 = vpack.i.bf16 %v1797_v25, %v1742_v58  ;;  %v1799_v31 = vmul.f32 %v7581_v20, %v1739_v2  ;;  %v10277_v61 = vrot.slane %v8202_v4, 7  ;;  %v1611_v58 = vrot.slane %v7973_v39, 7 }
 0x1b0   : > { %v6552_v46 = vpack.i.bf16 %v1801_v13, %v1738_v12  ;;  %v1612_v23 = vrot.slane %v7966_v63, 7  ;;  %v1613_v12 = vrot.slane %v7969_v33, 7 }
 0x1b1   : > { %6538 = vrot.lane.b32.xlu1 %v6537_v55, %s7074_s4  ;;  %v6547_v7 = vpack.i.bf16 %v1799_v31, %v1740_v53  ;;  %v1673_v2 = vsel %vm848_vm0, %v10277_v61, %v1610_v5  ;;  %v1672_v13 = vsel %vm848_vm0, %v1610_v5, %v1611_v58  ;;  %v1615_v61 = vrot.slane %v8004_v59, 7 }
 0x1b2   : > { %v1674_v53 = vmul.f32 %v7744_v42, %v1673_v2  ;;  %v1671_v2 = vsel %vm848_vm0, %v1611_v58, %v1612_v23  ;;  %v1669_v33 = vsel %vm848_vm0, %v1613_v12, %v1614_v56  ;;  %v1616_v58 = vrot.slane %v7992_v21, 7 }
 0x1b3   : > { %6548 = vrot.lane.b32.xlu0 %v6547_v7, %s7074_s4  ;;  %v1617_v21 = vrot.slane %v8015_v51, 7 }
 0x1b5   : > { %6543 = vrot.lane.b32.xlu1 %v6542_v19, %s7073_s28 }
 0x1b9   : > { %6553 = vrot.lane.b32.xlu1 %v6552_v46, %s7074_s4 }
 0x1e7   : > { %v6399_v17 = vpop.permute.xlu1 %6398 }
 0x1e8   : > { %v6404_v25 = vpop.permute.xlu0 %6403  ;;  %v6400_v16 = vunpack.i.l.bf16 %v6399_v17 }
 0x1e9   : > { %v6406_v55 = vunpack.i.h.bf16 %v6404_v25  ;;  %v6405_v31 = vunpack.i.l.bf16 %v6404_v25 }
 0x1eb   : > { %v2059_v46 = vsel %vm2058_vm8, %v1674_v53, %v6405_v31  ;;  %v2060_v25 = vsel %vm2058_vm8, %v1672_v13, %v6406_v55  ;;  %v1670_v55 = vsel %vm848_vm0, %v1612_v23, %v1613_v12  ;;  %v1676_v31 = vmul.f32 %v7753_v57, %v1671_v2 }
 0x1ec   : > { %v1678_v12 = vmul.f32 %v7757_v30, %v1669_v33 }
 0x1ed   : > { %v6409_v26 = vpop.permute.xlu0 %6408 }
 0x1ee   : > { %v6411_v7 = vunpack.i.h.bf16 %v6409_v26  ;;  %v6410_v19 = vunpack.i.l.bf16 %v6409_v26  ;;  %v6401_v26 = vunpack.i.h.bf16 %v6399_v17  ;;  %v1668_v17 = vsel %vm848_vm0, %v1614_v56, %v1615_v61 }
 0x1f0   : > { %v2092_v40 = vsel %vm2091_vm9, %v2059_v46, %v6410_v19  ;;  %v2093_v39 = vsel %vm2091_vm9, %v2060_v25, %v6411_v7  ;;  %v2061_v19 = vsel %vm2058_vm8, %v1676_v31, %v6400_v16  ;;  %v2062_v23 = vsel %vm2058_vm8, %v1670_v55, %v6401_v26 }
 0x1f1   : > { %v6414_v63 = vpop.permute.xlu0 %6413  ;;  %v2124_v5 = vpack.c.bf16 %v2093_v39, %v2092_v40  ;;  %v1618_v40 = vrot.slane %v8026_v6, 7  ;;  %v1619_v16 = vrot.slane %v8035_v54, 7  ;;  %v1667_v55 = vsel %vm848_vm0, %v1615_v61, %v1616_v58 }
 0x1f2   : > { %v6416_v53 = vunpack.i.h.bf16 %v6414_v63  ;;  %v6415_v13 = vunpack.i.l.bf16 %v6414_v63  ;;  %v1620_v61 = vrot.slane %v8024_v15, 7 }
 0x1f3   : > { %v6419_v59 = vpop.permute.xlu1 %6418  ;;  %5923 = vmatprep.mubr.msk.bf16.mxu1 %vm2162_vm11, %v2124_v5 }
 0x1f4   : > { %v6421_v7 = vunpack.i.h.bf16 %v6419_v59  ;;  %v6420_v39 = vunpack.i.l.bf16 %v6419_v59  ;;  %v2064_v56 = vsel %vm2058_vm8, %v1668_v17, %v6416_v53  ;;  %v2063_v59 = vsel %vm2058_vm8, %v1678_v12, %v6415_v13 }
 0x1f5   : > { %v6429_v46 = vpop.permute.xlu0 %6428  ;;  %v1665_v53 = vsel %vm848_vm0, %v1617_v21, %v1618_v40  ;;  %v1666_v13 = vsel %vm848_vm0, %v1616_v58, %v1617_v21  ;;  %v1680_v17 = vmul.f32 %v7773_v41, %v1667_v55  ;;  %v1621_v55 = vrot.slane %v8049_v22, 7 }
 0x1f6   : > { %v2095_v63 = vsel %vm2091_vm9, %v2062_v23, %v6421_v7  ;;  %v2094_v25 = vsel %vm2091_vm9, %v2061_v19, %v6420_v39  ;;  %v6431_v2 = vunpack.i.h.bf16 %v6429_v46  ;;  %v6430_v5 = vunpack.i.l.bf16 %v6429_v46 }
 0x1f7   : > { %v6424_v6 = vpop.permute.xlu1 %6423  ;;  %v2125_v57 = vpack.c.bf16 %v2095_v63, %v2094_v25  ;;  %v1622_v25 = vrot.slane %v8060_v49, 7  ;;  %v1682_v58 = vmul.f32 %v7780_v60, %v1665_v53 }
 0x1f8   : > { %v2096_v26 = vsel %vm2091_vm9, %v2063_v59, %v6430_v5  ;;  %v2097_v33 = vsel %vm2091_vm9, %v2064_v56, %v6431_v2  ;;  %v6426_v31 = vunpack.i.h.bf16 %v6424_v6  ;;  %v6425_v7 = vunpack.i.l.bf16 %v6424_v6 }
 0x1f9   : > { %v6434_v39 = vpop.permute.xlu0 %6433  ;;  %5924 = vmatmul.mubr.msk.bf16.vlgmr.msra.gmra.mrb[0].mxu1 %vm2162_vm11, %v2125_v57  ;;  %v2126_v19 = vpack.c.bf16 %v2097_v33, %v2096_v26  ;;  %v1664_v6 = vsel %vm848_vm0, %v1618_v40, %v1619_v16 }
 0x1fa   : > { %v6436_v23 = vunpack.i.h.bf16 %v6434_v39  ;;  %v6435_v12 = vunpack.i.l.bf16 %v6434_v39  ;;  %v2066_v2 = vsel %vm2058_vm8, %v1666_v13, %v6426_v31  ;;  %v2065_v21 = vsel %vm2058_vm8, %v1680_v17, %v6425_v7 }
 0x1fb   : > { %v6439_v46 = vpop.permute.xlu1 %6438  ;;  %5927 = vmatprep.mubr.msk.bf16.mxu1 %vm2162_vm11, %v2126_v19  ;;  %v1623_v31 = vrot.slane %v8069_v62, 7  ;;  %v1663_v13 = vsel %vm848_vm0, %v1619_v16, %v1620_v61  ;;  %v1624_v16 = vrot.slane %v8058_v9, 7  ;;  %v10459_v9 = vld [vmem:[#allocation6_spill] sm:$0xff] }
 0x1fc   : > { %v6441_v57 = vunpack.i.h.bf16 %v6439_v46  ;;  %v6440_v63 = vunpack.i.l.bf16 %v6439_v46  ;;  %v2068_v40 = vsel %vm2058_vm8, %v1664_v6, %v6436_v23  ;;  %v2067_v39 = vsel %vm2058_vm8, %v1682_v58, %v6435_v12 }
 0x1fd   : > { %v6449_v5 = vpop.permute.xlu0 %6448  ;;  %v1661_v23 = vsel %vm848_vm0, %v1621_v55, %v1622_v25  ;;  %v1662_v12 = vsel %vm848_vm0, %v1620_v61, %v1621_v55  ;;  %v1684_v6 = vmul.f32 %v7795_v38, %v1663_v13  ;;  %v1625_v13 = vrot.slane %v8083_v14, 7 }
 0x1fe   : > { %v2098_v56 = vsel %vm2091_vm9, %v2065_v21, %v6440_v63  ;;  %v2099_v59 = vsel %vm2091_vm9, %v2066_v2, %v6441_v57  ;;  %v6451_v26 = vunpack.i.h.bf16 %v6449_v5  ;;  %v6450_v33 = vunpack.i.l.bf16 %v6449_v5 }
 0x1ff   : > { %v6444_v19 = vpop.permute.xlu1 %6443  ;;  %v2127_v46 = vpack.c.bf16 %v2099_v59, %v2098_v56  ;;  %v1660_v56 = vsel %vm848_vm0, %v1622_v25, %v1623_v31  ;;  %v1686_v55 = vmul.f32 %v7798_v3, %v1661_v23 }
 0x200   : > { %v2100_v7 = vsel %vm2091_vm9, %v2067_v39, %v6450_v33  ;;  %v2101_v53 = vsel %vm2091_vm9, %v2068_v40, %v6451_v26  ;;  %v6446_v17 = vunpack.i.h.bf16 %v6444_v19  ;;  %v6445_v57 = vunpack.i.l.bf16 %v6444_v19 }
 0x201   : > { %v6454_v63 = vpop.permute.xlu0 %6453  ;;  %5928 = vmatmul.mubr.msk.bf16.gmra.mrb[4].mxu1 %vm2162_vm11, %v2127_v46  ;;  %v2128_v2 = vpack.c.bf16 %v2101_v53, %v2100_v7  ;;  %v1626_v33 = vrot.slane %v8094_v43, 7 }
 0x202   : > { %v6456_v21 = vunpack.i.h.bf16 %v6454_v63  ;;  %v6455_v58 = vunpack.i.l.bf16 %v6454_v63  ;;  %v2070_v40 = vsel %vm2058_vm8, %v1662_v12, %v6446_v17  ;;  %v2069_v61 = vsel %vm2058_vm8, %v1684_v6, %v6445_v57 }
 0x203   : > { %v6459_v5 = vpop.permute.xlu1 %6458  ;;  %5931 = vmatprep.mubr.msk.bf16.mxu1 %vm2162_vm11, %v2128_v2  ;;  %v1627_v17 = vrot.slane %v8103_v0, 7  ;;  %v1659_v12 = vsel %vm848_vm0, %v1623_v31, %v1624_v16  ;;  %v1628_v31 = vrot.slane %v8092_v48, 7  ;;  %v10457_v0 = vld [vmem:[#allocation4_spill] sm:$0xff] }
 0x204   : > { %v6461_v59 = vunpack.i.h.bf16 %v6459_v5  ;;  %v6460_v26 = vunpack.i.l.bf16 %v6459_v5  ;;  %v2072_v25 = vsel %vm2058_vm8, %v1660_v56, %v6456_v21  ;;  %v2071_v63 = vsel %vm2058_vm8, %v1686_v55, %v6455_v58 }
 0x205   : > { %v6469_v39 = vpop.permute.xlu0 %6468  ;;  %v1657_v21 = vsel %vm848_vm0, %v1625_v13, %v1626_v33  ;;  %v1658_v58 = vsel %vm848_vm0, %v1624_v16, %v1625_v13  ;;  %v1688_v56 = vmul.f32 %v7825_v8, %v1659_v12  ;;  %v1629_v12 = vrot.slane %v8117_v50, 7 }
 0x206   : > { %v2102_v19 = vsel %vm2091_vm9, %v2069_v61, %v6460_v26  ;;  %v2103_v46 = vsel %vm2091_vm9, %v2070_v40, %v6461_v59  ;;  %v6471_v7 = vunpack.i.h.bf16 %v6469_v39  ;;  %v6470_v53 = vunpack.i.l.bf16 %v6469_v39 }
 0x207   : > { %v6464_v2 = vpop.permute.xlu1 %6463  ;;  %v2129_v5 = vpack.c.bf16 %v2103_v46, %v2102_v19  ;;  %v1656_v19 = vsel %vm848_vm0, %v1626_v33, %v1627_v17  ;;  %v1690_v13 = vmul.f32 %v7828_v11, %v1657_v21 }
 0x208   : > { %v2104_v57 = vsel %vm2091_vm9, %v2071_v63, %v6470_v53  ;;  %v2105_v23 = vsel %vm2091_vm9, %v2072_v25, %v6471_v7  ;;  %v6466_v6 = vunpack.i.h.bf16 %v6464_v2  ;;  %v6465_v59 = vunpack.i.l.bf16 %v6464_v2 }
 0x209   : > { %v6474_v26 = vpop.permute.xlu0 %6473  ;;  %5932 = vmatmul.mubr.msk.bf16.gmra.mrb[8].mxu1 %vm2162_vm11, %v2129_v5  ;;  %v2130_v40 = vpack.c.bf16 %v2105_v23, %v2104_v57  ;;  %v1630_v53 = vrot.slane %v8128_v34, 7  ;;  %v10456_v34 = vld [vmem:[#allocation3_spill] sm:$0xff] }
 0x20a   : > { %v6476_v61 = vunpack.i.h.bf16 %v6474_v26  ;;  %v6475_v55 = vunpack.i.l.bf16 %v6474_v26  ;;  %v2074_v25 = vsel %vm2058_vm8, %v1658_v58, %v6466_v6  ;;  %v2073_v16 = vsel %vm2058_vm8, %v1688_v56, %v6465_v59 }
 0x20b   : > { %v6479_v39 = vpop.permute.xlu1 %6478  ;;  %5935 = vmatprep.mubr.msk.bf16.mxu1 %vm2162_vm11, %v2130_v40  ;;  %v1631_v6 = vrot.slane %v8137_v52, 7  ;;  %v1655_v58 = vsel %vm848_vm0, %v1627_v17, %v1628_v31  ;;  %v1632_v17 = vrot.slane %v8126_v27, 7 }
 0x20c   : > { %v6481_v46 = vunpack.i.h.bf16 %v6479_v39  ;;  %v6480_v7 = vunpack.i.l.bf16 %v6479_v39  ;;  %v2076_v33 = vsel %vm2058_vm8, %v1656_v19, %v6476_v61  ;;  %v2075_v26 = vsel %vm2058_vm8, %v1690_v13, %v6475_v55 }
 0x20d   : > { %v6489_v63 = vpop.permute.xlu0 %6488  ;;  %v1653_v61 = vsel %vm848_vm0, %v1629_v12, %v1630_v53  ;;  %v1654_v55 = vsel %vm848_vm0, %v1628_v31, %v1629_v12  ;;  %v1692_v19 = vmul.f32 %v7849_v32, %v1655_v58  ;;  %v1633_v58 = vrot.slane %v8151_v44, 7 }
 0x20e   : > { %v2106_v2 = vsel %vm2091_vm9, %v2073_v16, %v6480_v7  ;;  %v2107_v5 = vsel %vm2091_vm9, %v2074_v25, %v6481_v46  ;;  %v6491_v57 = vunpack.i.h.bf16 %v6489_v63  ;;  %v6490_v23 = vunpack.i.l.bf16 %v6489_v63 }
 0x20f   : > { %v6484_v40 = vpop.permute.xlu1 %6483  ;;  %v2131_v39 = vpack.c.bf16 %v2107_v5, %v2106_v2  ;;  %v1652_v2 = vsel %vm848_vm0, %v1630_v53, %v1631_v6  ;;  %v1694_v12 = vmul.f32 %v7852_v28, %v1653_v61 }
 0x210   : > { %v2108_v59 = vsel %vm2091_vm9, %v2075_v26, %v6490_v23  ;;  %v2109_v21 = vsel %vm2091_vm9, %v2076_v33, %v6491_v57  ;;  %v6486_v56 = vunpack.i.h.bf16 %v6484_v40  ;;  %v6485_v46 = vunpack.i.l.bf16 %v6484_v40 }
 0x211   : > { %v6494_v7 = vpop.permute.xlu0 %6493  ;;  %5936 = vmatmul.mubr.msk.bf16.gmra.mrb[12].mxu1 %vm2162_vm11, %v2131_v39  ;;  %v2132_v25 = vpack.c.bf16 %v2109_v21, %v2108_v59  ;;  %v1634_v23 = vrot.slane %v8162_v18, 7 }
 0x212   : > { %v6496_v16 = vunpack.i.h.bf16 %v6494_v7  ;;  %v6495_v13 = vunpack.i.l.bf16 %v6494_v7  ;;  %v2078_v33 = vsel %vm2058_vm8, %v1654_v55, %v6486_v56  ;;  %v2077_v31 = vsel %vm2058_vm8, %v1692_v19, %v6485_v46  ;;  %v10447_v56 = vld [vmem:[#allocation52_spill] sm:$0xff] }
 0x213   : > { %v6499_v63 = vpop.permute.xlu1 %6498  ;;  %5939 = vmatprep.mubr.msk.bf16.mxu1 %vm2162_vm11, %v2132_v25  ;;  %v1635_v55 = vrot.slane %v10447_v56, 7  ;;  %v1651_v19 = vsel %vm848_vm0, %v1631_v6, %v1632_v17  ;;  %v1636_v6 = vrot.slane %v8160_v45, 7 }
 0x214   : > { %v6501_v5 = vunpack.i.h.bf16 %v6499_v63  ;;  %v6500_v57 = vunpack.i.l.bf16 %v6499_v63  ;;  %v2080_v53 = vsel %vm2058_vm8, %v1652_v2, %v6496_v16  ;;  %v2079_v7 = vsel %vm2058_vm8, %v1694_v12, %v6495_v13  ;;  %v10448_v2 = vld [vmem:[#allocation26_spill] sm:$0xff] }
 0x215   : > { %v6509_v26 = vpop.permute.xlu0 %6508  ;;  %v1649_v16 = vsel %vm848_vm0, %v1633_v58, %v1634_v23  ;;  %v1650_v13 = vsel %vm848_vm0, %v1632_v17, %v1633_v58  ;;  %v1696_v12 = vmul.f32 %v10448_v2, %v1651_v19  ;;  %v10449_v58 = vld [vmem:[#allocation27_spill] sm:$0xff]  ;;  %v10467_v2 = vld [vmem:[#allocation13_spill] sm:$0xff] }
 0x216   : > { %v2110_v40 = vsel %vm2091_vm9, %v2077_v31, %v6500_v57  ;;  %v2111_v39 = vsel %vm2091_vm9, %v2078_v33, %v6501_v5  ;;  %v6511_v59 = vunpack.i.h.bf16 %v6509_v26  ;;  %v6510_v21 = vunpack.i.l.bf16 %v6509_v26 }
 0x217   : > { %v6504_v25 = vpop.permute.xlu1 %6503  ;;  %v2133_v63 = vpack.c.bf16 %v2111_v39, %v2110_v40 }
 0x218   : > { %v2112_v46 = vsel %vm2091_vm9, %v2079_v7, %v6510_v21  ;;  %v2113_v61 = vsel %vm2091_vm9, %v2080_v53, %v6511_v59  ;;  %v6506_v5 = vunpack.i.h.bf16 %v6504_v25  ;;  %v6505_v57 = vunpack.i.l.bf16 %v6504_v25 }
 0x219   : > { %v6514_v33 = vpop.permute.xlu0 %6513  ;;  %5940 = vmatmul.mubr.msk.bf16.gmra.mrb[16].mxu1 %vm2162_vm11, %v2133_v63  ;;  %v2134_v31 = vpack.c.bf16 %v2113_v61, %v2112_v46  ;;  %v1648_v59 = vsel %vm848_vm0, %v1634_v23, %v1635_v55  ;;  %v1638_v7 = vrot.slane %v8197_v24, 7  ;;  %v1698_v63 = vmul.f32 %v10449_v58, %v1649_v16 }
 0x21a   : > { %v6516_v26 = vunpack.i.h.bf16 %v6514_v33  ;;  %v6515_v40 = vunpack.i.l.bf16 %v6514_v33  ;;  %v2082_v25 = vsel %vm2058_vm8, %v1650_v13, %v6506_v5  ;;  %v2081_v17 = vsel %vm2058_vm8, %v1696_v12, %v6505_v57 }
 0x21b   : > { %v6519_v39 = vpop.permute.xlu1 %6518  ;;  %5943 = vmatprep.mubr.msk.bf16.mxu1 %vm2162_vm11, %v2134_v31  ;;  %v1637_v24 = vrot.slane %v8185_v35, 7  ;;  %v1647_v16 = vsel %vm848_vm0, %v1635_v55, %v1636_v6  ;;  %v1639_v13 = vrot.slane %v8207_v29, 7 }
 0x21c   : > { %v6521_v21 = vunpack.i.h.bf16 %v6519_v39  ;;  %v6520_v53 = vunpack.i.l.bf16 %v6519_v39  ;;  %v2084_v56 = vsel %vm2058_vm8, %v1648_v59, %v6516_v26  ;;  %v2083_v23 = vsel %vm2058_vm8, %v1698_v63, %v6515_v40  ;;  %v10450_v59 = vld [vmem:[#allocation11_spill] sm:$0xff] }
 0x21d   : > { %v6529_v46 = vpop.permute.xlu0 %6528  ;;  %v1645_v40 = vsel %vm848_vm0, %v1637_v24, %v1638_v7  ;;  %v1646_v55 = vsel %vm848_vm0, %v1636_v6, %v1637_v24 }
 0x21e   : > { %v2114_v61 = vsel %vm2091_vm9, %v2081_v17, %v6520_v53  ;;  %v2115_v19 = vsel %vm2091_vm9, %v2082_v25, %v6521_v21  ;;  %v6531_v33 = vunpack.i.h.bf16 %v6529_v46  ;;  %v6530_v31 = vunpack.i.l.bf16 %v6529_v46 }
 0x21f   : > { %v6524_v39 = vpop.permute.xlu1 %6523  ;;  %v2135_v18 = vpack.c.bf16 %v2115_v19, %v2114_v61  ;;  %v1700_v25 = vmul.f32 %v10450_v59, %v1647_v16 }
 0x220   : > { %v2116_v5 = vsel %vm2091_vm9, %v2083_v23, %v6530_v31  ;;  %v2117_v57 = vsel %vm2091_vm9, %v2084_v56, %v6531_v33  ;;  %v6526_v12 = vunpack.i.h.bf16 %v6524_v39  ;;  %v6525_v21 = vunpack.i.l.bf16 %v6524_v39  ;;  %v10451_v23 = vld [vmem:[#allocation15_spill] sm:$0xff] }
 0x221   : > { %v6534_v53 = vpop.permute.xlu0 %6533  ;;  %5944 = vmatmul.mubr.msk.bf16.gmra.mrb[20].mxu1 %vm2162_vm11, %v2135_v18  ;;  %v2136_v26 = vpack.c.bf16 %v2117_v57, %v2116_v5  ;;  %v1640_v56 = vrot.slane %v8192_v37, 7  ;;  %v1644_v31 = vsel %vm848_vm0, %v1638_v7, %v1639_v13  ;;  %v1702_v39 = vmul.f32 %v10451_v23, %v1645_v40 }
 0x222   : > { %v6536_v17 = vunpack.i.h.bf16 %v6534_v53  ;;  %v6535_v63 = vunpack.i.l.bf16 %v6534_v53  ;;  %v2086_v18 = vsel %vm2058_vm8, %v1646_v55, %v6526_v12  ;;  %v2085_v33 = vsel %vm2058_vm8, %v1700_v25, %v6525_v21 }
 0x223   : > { %v6539_v46 = vpop.permute.xlu1 %6538  ;;  %5947 = vmatprep.mubr.msk.bf16.mxu1 %vm2162_vm11, %v2136_v26  ;;  %v1643_v7 = vsel %vm848_vm0, %v1639_v13, %v1640_v56 }
 0x224   : > { %v6541_v61 = vunpack.i.h.bf16 %v6539_v46  ;;  %v6540_v19 = vunpack.i.l.bf16 %v6539_v46  ;;  %v2088_v24 = vsel %vm2058_vm8, %v1644_v31, %v6536_v17  ;;  %v2087_v6 = vsel %vm2058_vm8, %v1702_v39, %v6535_v63 }
 0x225   : > { %v6549_v5 = vpop.permute.xlu0 %6548  ;;  %v10453_v17 = vrot.slane %v8202_v4, 7 }
 0x226   : > { %v2118_v57 = vsel %vm2091_vm9, %v2085_v33, %v6540_v19  ;;  %v2119_v16 = vsel %vm2091_vm9, %v2086_v18, %v6541_v61  ;;  %v6551_v53 = vunpack.i.h.bf16 %v6549_v5  ;;  %v6550_v26 = vunpack.i.l.bf16 %v6549_v5  ;;  %v10452_v19 = vld [vmem:[#allocation14_spill] sm:$0xff] }
 0x227   : > { %v6544_v46 = vpop.permute.xlu1 %6543  ;;  %v2137_v12 = vpack.c.bf16 %v2119_v16, %v2118_v57  ;;  %v1704_v18 = vmul.f32 %v10452_v19, %v1643_v7  ;;  %v1642_v63 = vsel %vm848_vm0, %v1640_v56, %v10453_v17  ;;  %v7042_v56 = vld [vmem:[%s10205_s1 + $0x68] sm:$0xff]   ;;  %v10463_v19 = vld [vmem:[#allocation10_spill] sm:$0xff] }
 0x228   : > { %v2120_v21 = vsel %vm2091_vm9, %v2087_v6, %v6550_v26  ;;  %v2121_v25 = vsel %vm2091_vm9, %v2088_v24, %v6551_v53  ;;  %v6546_v40 = vunpack.i.h.bf16 %v6544_v46  ;;  %v6545_v55 = vunpack.i.l.bf16 %v6544_v46  ;;  %v7041_v26 = vld [vmem:[%s10205_s1 + $0x60] sm:$0xff]   ;;  %v7043_v24 = vld [vmem:[%s10205_s1 + $0x70] sm:$0xff]  }
 0x229   : > { %5948 = vmatmul.mubr.msk.bf16.gmra.mrb[24].mxu1 %vm2162_vm11, %v2137_v12  ;;  %v2138_v61 = vpack.c.bf16 %v2121_v25, %v2120_v21  ;;  %5955 = vmatprep.subr.bf16.mxu0 %v7041_v26  ;;  %v2142_v6 = vsub.s32 1, %v7107_v1  ;;  %v7058_v46 = vld [vmem:[%s10206_s2] sm:$0xff] }
 0x22a   : > { %v2090_v5 = vsel %vm2058_vm8, %v1642_v63, %v6546_v40  ;;  %v2089_v13 = vsel %vm2058_vm8, %v1704_v18, %v6545_v55  ;;  %5956 = vmatpush3.bf16.msra.mxu0 %v7041_v26 }
 0x22b   : > { %v6554_v33 = vpop.permute.xlu1 %6553  ;;  %5951 = vmatprep.mubr.msk.bf16.mxu1 %vm2162_vm11, %v2138_v61  ;;  %5957 = vmatprep.subr.bf16.mxu0 %v7042_v56  ;;  %v8451_v12 = vrot.slane %v7058_v46, %v2142_v6 }
 0x22c   : > { %v6556_v31 = vunpack.i.h.bf16 %v6554_v33  ;;  %v6555_v39 = vunpack.i.l.bf16 %v6554_v33 }
 0x22e   : > { %v2123_v57 = vsel %vm2091_vm9, %v2090_v5, %v6556_v31  ;;  %v2122_v16 = vsel %vm2091_vm9, %v2089_v13, %v6555_v39  ;;  %5958 = vmatpush3.bf16.msra.mxu0 %v7042_v56 }
 0x22f   : > { %v2139_v53 = vpack.c.bf16 %v2123_v57, %v2122_v16  ;;  %5959 = vmatprep.subr.bf16.mxu0 %v7043_v24 }
 0x231   : > { %5952 = vmatmul.mubr.msk.bf16.gmra.mrb[28].mxu1 %vm2162_vm11, %v2139_v53 }
 0x232   : > { %5960 = vmatpush3.bf16.msra.mxu0 %v7043_v24 }
 0x2cc   : > { %v5925_v21 = vpop.f32.mrb[0].mxu1 }
 0x2cd   : > { %v2254_v25 = vadd.f32 %v5925_v21, %v8451_v12  ;;  %v2245_v7 = vpop.f32.mrb[1].mxu1 }
 0x2ce   : > { %v2246_v40 = vadd.f32 %v2245_v7, %v8451_v12  ;;  %v5926_v55 = vpop.f32.mrb[2].mxu1 }
 0x2cf   : > { %v2374_v61 = vmax.f32 %v2254_v25, 0.0  ;;  %v2257_v18 = vadd.f32 %v5926_v55, %v8451_v12  ;;  %v2248_v33 = vpop.f32.mrb[3].mxu1 }
 0x2d0   : > { %v8456_v17 = vmax.f32 %v2246_v40, 0.0  ;;  %v2249_v63 = vadd.f32 %v2248_v33, %v8451_v12 }
 0x2d1   : > { %v2375_v31 = vmax.f32 %v2257_v18, 0.0  ;;  %v2413_v39 = vrot.slane %v2374_v61, 7  ;;  %v2509_v13 = vrot.slane %v2374_v61, 1 }
 0x2d2   : > { %v2373_v5 = vmax.f32 %v2249_v63, 0.0  ;;  %v10294_v26 = vrot.slane %v8456_v17, 1 }
 0x2d3   : > { %v2414_v57 = vrot.slane %v2375_v31, 7  ;;  %v2510_v16 = vrot.slane %v2375_v31, 1  ;;  %v6557_v53 = vpack.i.bf16 %v2375_v31, %v2374_v61 }
 0x2d4   : > { %v2412_v56 = vrot.slane %v2373_v5, 7  ;;  %v2508_v24 = vrot.slane %v2373_v5, 1  ;;  %v5929_v6 = vpop.f32.mrb[4].mxu1  ;;  %v6562_v46 = vpack.i.bf16 %v2373_v5, %v8456_v17 }
 0x2d5   : > { %v2270_v25 = vadd.f32 %v5929_v6, %v8451_v12  ;;  %6558 = vrot.lane.b32.xlu1 %v6557_v53, %s7073_s28  ;;  %v2261_v7 = vpop.f32.mrb[5].mxu1  ;;  %v2567_v40 = vsel %vm945_vm1, %v2509_v13, %v2510_v16  ;;  %v8468_v55 = vsel %vm848_vm0, %v2413_v39, %v2414_v57 }
 0x2d6   : > { %v8472_v61 = vsel %vm848_vm0, %v2412_v56, %v2413_v39  ;;  %v2262_v18 = vadd.f32 %v2261_v7, %v8451_v12  ;;  %v5930_v33 = vpop.f32.mrb[6].mxu1  ;;  %6563 = vrot.lane.b32.xlu0 %v6562_v46, %s7073_s28  ;;  %v2568_v63 = vsel %vm945_vm1, %v2508_v24, %v2509_v13  ;;  %v2569_v31 = vsel %vm945_vm1, %v10294_v26, %v2508_v24  ;;  %v10454_v39 = vld [vmem:[#allocation2_spill] sm:$0xff] }
 0x2d7   : > { %v8482_v5 = vmax.f32 %v2270_v25, 0.0  ;;  %v2273_v53 = vadd.f32 %v5930_v33, %v8451_v12  ;;  %v2264_v6 = vpop.f32.mrb[7].mxu1  ;;  %v2572_v21 = vmul.f32 %v10454_v39, %v2568_v63  ;;  %v10455_v46 = vrot.slane %v8456_v17, 7 }
 0x2d8   : > { %v2376_v29 = vmax.f32 %v2262_v18, 0.0  ;;  %v2265_v7 = vadd.f32 %v2264_v6, %v8451_v12 }
 0x2d9   : > { %v8491_v13 = vsel %vm848_vm0, %v10455_v46, %v2412_v56  ;;  %v2379_v4 = vmax.f32 %v2273_v53, 0.0  ;;  %v6567_v37 = vpack.i.bf16 %v2572_v21, %v2569_v31  ;;  %v2417_v26 = vrot.slane %v8482_v5, 7 }
 0x2da   : > { %v2415_v35 = vrot.slane %v2376_v29, 7  ;;  %v2511_v24 = vrot.slane %v2376_v29, 1  ;;  %v2377_v25 = vmax.f32 %v2265_v7, 0.0  ;;  %v2513_v33 = vrot.slane %v8482_v5, 1 }
 0x2db   : > { %v2514_v45 = vrot.slane %v2379_v4, 1  ;;  %6568 = vrot.lane.b32.xlu0 %v6567_v37, %s7074_s4  ;;  %v6582_v18 = vpack.i.bf16 %v2379_v4, %v8482_v5  ;;  %v2418_v31 = vrot.slane %v2379_v4, 7 }
 0x2dc   : > { %v8499_v63 = vsel %vm848_vm0, %v2414_v57, %v2415_v35  ;;  %v2416_v56 = vrot.slane %v2377_v25, 7  ;;  %v2512_v6 = vrot.slane %v2377_v25, 1  ;;  %v5933_v53 = vpop.f32.mrb[8].mxu1  ;;  %v6572_v21 = vpack.i.bf16 %v2377_v25, %v2376_v29 }
 0x2dd   : > { %v2286_v7 = vadd.f32 %v5933_v53, %v8451_v12  ;;  %v2277_v46 = vpop.f32.mrb[9].mxu1  ;;  %v2566_v52 = vsel %vm945_vm1, %v2510_v16, %v2511_v24  ;;  %v2563_v37 = vsel %vm945_vm1, %v2513_v33, %v2514_v45 }
 0x2de   : > { %v8508_v5 = vsel %vm848_vm0, %v2416_v56, %v2417_v26  ;;  %v2278_v57 = vadd.f32 %v2277_v46, %v8451_v12  ;;  %v5934_v44 = vpop.f32.mrb[10].mxu1  ;;  %v2574_v27 = vmul.f32 %v10456_v34, %v2566_v52  ;;  %v2564_v4 = vsel %vm945_vm1, %v2512_v6, %v2513_v33  ;;  %v10461_v34 = vld [vmem:[#allocation8_spill] sm:$0xff] }
 0x2df   : > { %v8514_v29 = vmax.f32 %v2286_v7, 0.0  ;;  %v2289_v25 = vadd.f32 %v5934_v44, %v8451_v12  ;;  %v2280_v16 = vpop.f32.mrb[11].mxu1  ;;  %6573 = vrot.lane.b32.xlu0 %v6572_v21, %s7073_s28  ;;  %v2565_v53 = vsel %vm945_vm1, %v2511_v24, %v2512_v6  ;;  %v2576_v50 = vmul.f32 %v10457_v0, %v2564_v4 }
 0x2e0   : > { %v2380_v43 = vmax.f32 %v2278_v57, 0.0  ;;  %v2281_v46 = vadd.f32 %v2280_v16, %v8451_v12  ;;  %v6577_v48 = vpack.i.bf16 %v2574_v27, %v2567_v40  ;;  %v8524_v52 = vsel %vm848_vm0, %v2415_v35, %v2416_v56 }
 0x2e1   : > { %v2383_v33 = vmax.f32 %v2289_v25, 0.0  ;;  %v6587_v7 = vpack.i.bf16 %v2576_v50, %v2565_v53  ;;  %v8529_v24 = vsel %vm848_vm0, %v2417_v26, %v2418_v31  ;;  %v2421_v6 = vrot.slane %v8514_v29, 7 }
 0x2e2   : > { %v2419_v62 = vrot.slane %v2380_v43, 7  ;;  %v2515_v44 = vrot.slane %v2380_v43, 1  ;;  %v2381_v14 = vmax.f32 %v2281_v46, 0.0  ;;  %6578 = vrot.lane.b32.xlu1 %v6577_v48, %s7074_s4  ;;  %v2517_v21 = vrot.slane %v8514_v29, 1 }
 0x2e3   : > { %v2518_v27 = vrot.slane %v2383_v33, 1  ;;  %6588 = vrot.lane.b32.xlu0 %v6587_v7, %s7074_s4  ;;  %v6602_v35 = vpack.i.bf16 %v2383_v33, %v8514_v29  ;;  %v2422_v4 = vrot.slane %v2383_v33, 7 }
 0x2e4   : > { %v8537_v50 = vsel %vm848_vm0, %v2418_v31, %v2419_v62  ;;  %v2420_v40 = vrot.slane %v2381_v14, 7  ;;  %v2516_v56 = vrot.slane %v2381_v14, 1  ;;  %v5937_v48 = vpop.f32.mrb[12].mxu1  ;;  %v6592_v57 = vpack.i.bf16 %v2381_v14, %v2380_v43  ;;  %v10458_v14 = vld [vmem:[#allocation5_spill] sm:$0xff] }
 0x2e5   : > { %v2302_v26 = vadd.f32 %v5937_v48, %v8451_v12  ;;  %v2293_v25 = vpop.f32.mrb[13].mxu1  ;;  %v2562_v16 = vsel %vm945_vm1, %v2514_v45, %v2515_v44  ;;  %v2559_v53 = vsel %vm945_vm1, %v2517_v21, %v2518_v27 }
 0x2e6   : > { %v8546_v29 = vsel %vm848_vm0, %v2420_v40, %v2421_v6  ;;  %v2294_v31 = vadd.f32 %v2293_v25, %v8451_v12  ;;  %6583 = vrot.lane.b32.xlu1 %v6582_v18, %s7073_s28  ;;  %v5938_v46 = vpop.f32.mrb[14].mxu1  ;;  %v2578_v43 = vmul.f32 %v10458_v14, %v2562_v16  ;;  %v2560_v33 = vsel %vm945_vm1, %v2516_v56, %v2517_v21 }
 0x2e7   : > { %v8553_v7 = vmax.f32 %v2302_v26, 0.0  ;;  %v2305_v45 = vadd.f32 %v5938_v46, %v8451_v12  ;;  %v2296_v48 = vpop.f32.mrb[15].mxu1  ;;  %6593 = vrot.lane.b32.xlu0 %v6592_v57, %s7073_s28  ;;  %v2561_v49 = vsel %vm945_vm1, %v2515_v44, %v2516_v56  ;;  %v2580_v25 = vmul.f32 %v10459_v9, %v2560_v33 }
 0x2e8   : > { %v2384_v54 = vmax.f32 %v2294_v31, 0.0  ;;  %v2297_v18 = vadd.f32 %v2296_v48, %v8451_v12  ;;  %v6597_v0 = vpack.i.bf16 %v2578_v43, %v2563_v37  ;;  %v8563_v16 = vsel %vm848_vm0, %v2419_v62, %v2420_v40 }
 0x2e9   : > { %v2387_v21 = vmax.f32 %v2305_v45, 0.0  ;;  %v6607_v26 = vpack.i.bf16 %v2580_v25, %v2561_v49  ;;  %v8568_v44 = vsel %vm848_vm0, %v2421_v6, %v2422_v4  ;;  %v2425_v56 = vrot.slane %v8553_v7, 7 }
 0x2ea   : > { %v2423_v14 = vrot.slane %v2384_v54, 7  ;;  %v2519_v46 = vrot.slane %v2384_v54, 1  ;;  %v2385_v22 = vmax.f32 %v2297_v18, 0.0  ;;  %6598 = vrot.lane.b32.xlu1 %v6597_v0, %s7074_s4  ;;  %v2521_v57 = vrot.slane %v8553_v7, 1 }
 0x2eb   : > { %v2522_v37 = vrot.slane %v2387_v21, 1  ;;  %6608 = vrot.lane.b32.xlu0 %v6607_v26, %s7074_s4  ;;  %v6622_v62 = vpack.i.bf16 %v2387_v21, %v8553_v7  ;;  %v2426_v33 = vrot.slane %v2387_v21, 7 }
 0x2ec   : > { %v8576_v49 = vsel %vm848_vm0, %v2422_v4, %v2423_v14  ;;  %v2424_v40 = vrot.slane %v2385_v22, 7  ;;  %v2520_v31 = vrot.slane %v2385_v22, 1  ;;  %v5941_v0 = vpop.f32.mrb[16].mxu1  ;;  %v6612_v43 = vpack.i.bf16 %v2385_v22, %v2384_v54  ;;  %v10460_v54 = vld [vmem:[#allocation7_spill] sm:$0xff] }
 0x2ed   : > { %v2318_v6 = vadd.f32 %v5941_v0, %v8451_v12  ;;  %v2309_v45 = vpop.f32.mrb[17].mxu1  ;;  %v2558_v48 = vsel %vm945_vm1, %v2518_v27, %v2519_v46  ;;  %v2555_v25 = vsel %vm945_vm1, %v2521_v57, %v2522_v37 }
 0x2ee   : > { %v8585_v7 = vsel %vm848_vm0, %v2424_v40, %v2425_v56  ;;  %v2310_v4 = vadd.f32 %v2309_v45, %v8451_v12  ;;  %6603 = vrot.lane.b32.xlu1 %v6602_v35, %s7073_s28  ;;  %v5942_v18 = vpop.f32.mrb[18].mxu1  ;;  %v2582_v22 = vmul.f32 %v10460_v54, %v2558_v48  ;;  %v2556_v21 = vsel %vm945_vm1, %v2520_v31, %v2521_v57 }
 0x2ef   : > { %v8592_v26 = vmax.f32 %v2318_v6, 0.0  ;;  %v2321_v27 = vadd.f32 %v5942_v18, %v8451_v12  ;;  %v2312_v0 = vpop.f32.mrb[19].mxu1  ;;  %6613 = vrot.lane.b32.xlu0 %v6612_v43, %s7073_s28  ;;  %v2557_v9 = vsel %vm945_vm1, %v2519_v46, %v2520_v31  ;;  %v2584_v45 = vmul.f32 %v10461_v34, %v2556_v21 }
 0x2f0   : > { %v2388_v15 = vmax.f32 %v2310_v4, 0.0  ;;  %v2313_v35 = vadd.f32 %v2312_v0, %v8451_v12  ;;  %v6617_v39 = vpack.i.bf16 %v2582_v22, %v2559_v53  ;;  %v8602_v48 = vsel %vm848_vm0, %v2423_v14, %v2424_v40 }
 0x2f1   : > { %v2391_v57 = vmax.f32 %v2321_v27, 0.0  ;;  %v6627_v6 = vpack.i.bf16 %v2584_v45, %v2557_v9  ;;  %v8607_v46 = vsel %vm848_vm0, %v2425_v56, %v2426_v33  ;;  %v2429_v31 = vrot.slane %v8592_v26, 7 }
 0x2f2   : > { %v2427_v54 = vrot.slane %v2388_v15, 7  ;;  %v2523_v18 = vrot.slane %v2388_v15, 1  ;;  %v2389_v51 = vmax.f32 %v2313_v35, 0.0  ;;  %6618 = vrot.lane.b32.xlu1 %v6617_v39, %s7074_s4  ;;  %v2525_v43 = vrot.slane %v8592_v26, 1 }
 0x2f3   : > { %v2526_v53 = vrot.slane %v2391_v57, 1  ;;  %6628 = vrot.lane.b32.xlu0 %v6627_v6, %s7074_s4  ;;  %v6642_v14 = vpack.i.bf16 %v2391_v57, %v8592_v26  ;;  %v2430_v21 = vrot.slane %v2391_v57, 7 }
 0x2f4   : > { %v8615_v9 = vsel %vm848_vm0, %v2426_v33, %v2427_v54  ;;  %v2428_v40 = vrot.slane %v2389_v51, 7  ;;  %v2524_v4 = vrot.slane %v2389_v51, 1  ;;  %v5945_v39 = vpop.f32.mrb[20].mxu1  ;;  %v6632_v22 = vpack.i.bf16 %v2389_v51, %v2388_v15  ;;  %v10462_v51 = vld [vmem:[#allocation9_spill] sm:$0xff] }
 0x2f5   : > { %v2334_v56 = vadd.f32 %v5945_v39, %v8451_v12  ;;  %v2325_v27 = vpop.f32.mrb[21].mxu1  ;;  %v2554_v0 = vsel %vm945_vm1, %v2522_v37, %v2523_v18  ;;  %v2551_v45 = vsel %vm945_vm1, %v2525_v43, %v2526_v53 }
 0x2f6   : > { %v8624_v26 = vsel %vm848_vm0, %v2428_v40, %v2429_v31  ;;  %v2326_v33 = vadd.f32 %v2325_v27, %v8451_v12  ;;  %6623 = vrot.lane.b32.xlu1 %v6622_v62, %s7073_s28  ;;  %v5946_v35 = vpop.f32.mrb[22].mxu1  ;;  %v2586_v15 = vmul.f32 %v10462_v51, %v2554_v0  ;;  %v2552_v57 = vsel %vm945_vm1, %v2524_v4, %v2525_v43 }
 0x2f7   : > { %v8631_v6 = vmax.f32 %v2334_v56, 0.0  ;;  %v2337_v37 = vadd.f32 %v5946_v35, %v8451_v12  ;;  %v2328_v39 = vpop.f32.mrb[23].mxu1  ;;  %6633 = vrot.lane.b32.xlu0 %v6632_v22, %s7073_s28  ;;  %v2553_v34 = vsel %vm945_vm1, %v2523_v18, %v2524_v4  ;;  %v2588_v27 = vmul.f32 %v10463_v19, %v2552_v57 }
 0x2f8   : > { %v2392_v23 = vmax.f32 %v2326_v33, 0.0  ;;  %v2329_v62 = vadd.f32 %v2328_v39, %v8451_v12  ;;  %v6637_v59 = vpack.i.bf16 %v2586_v15, %v2555_v25  ;;  %v8641_v0 = vsel %vm848_vm0, %v2427_v54, %v2428_v40 }
 0x2f9   : > { %v2395_v43 = vmax.f32 %v2337_v37, 0.0  ;;  %v6647_v56 = vpack.i.bf16 %v2588_v27, %v2553_v34  ;;  %v8646_v18 = vsel %vm848_vm0, %v2429_v31, %v2430_v21  ;;  %v2433_v4 = vrot.slane %v8631_v6, 7 }
 0x2fa   : > { %v2431_v51 = vrot.slane %v2392_v23, 7  ;;  %v2527_v35 = vrot.slane %v2392_v23, 1  ;;  %v2393_v58 = vmax.f32 %v2329_v62, 0.0  ;;  %6638 = vrot.lane.b32.xlu1 %v6637_v59, %s7074_s4  ;;  %10464 = vst [vmem:[#allocation57_spill] sm:$0xff] %v8646_v18  ;;  %v2529_v22 = vrot.slane %v8631_v6, 1 }
 0x2fb   : > { %v2530_v25 = vrot.slane %v2395_v43, 1  ;;  %6648 = vrot.lane.b32.xlu0 %v6647_v56, %s7074_s4  ;;  %v6662_v54 = vpack.i.bf16 %v2395_v43, %v8631_v6  ;;  %v2434_v57 = vrot.slane %v2395_v43, 7 }
 0x2fc   : > { %v8654_v34 = vsel %vm848_vm0, %v2430_v21, %v2431_v51  ;;  %v2432_v40 = vrot.slane %v2393_v58, 7  ;;  %v2528_v33 = vrot.slane %v2393_v58, 1  ;;  %v5949_v59 = vpop.f32.mrb[24].mxu1  ;;  %v6652_v15 = vpack.i.bf16 %v2393_v58, %v2392_v23  ;;  %v10466_v58 = vld [vmem:[#allocation12_spill] sm:$0xff] }
 0x2fd   : > { %v2350_v31 = vadd.f32 %v5949_v59, %v8451_v12  ;;  %v2341_v37 = vpop.f32.mrb[25].mxu1  ;;  %v2550_v39 = vsel %vm945_vm1, %v2526_v53, %v2527_v35  ;;  %v2547_v27 = vsel %vm945_vm1, %v2529_v22, %v2530_v25 }
 0x2fe   : > { %v8663_v6 = vsel %vm848_vm0, %v2432_v40, %v2433_v4  ;;  %v2342_v21 = vadd.f32 %v2341_v37, %v8451_v12  ;;  %6643 = vrot.lane.b32.xlu1 %v6642_v14, %s7073_s28  ;;  %v5950_v62 = vpop.f32.mrb[26].mxu1  ;;  %v2590_v23 = vmul.f32 %v10466_v58, %v2550_v39  ;;  %v2548_v43 = vsel %vm945_vm1, %v2528_v33, %v2529_v22 }
 0x2ff   : > { %10465 = vst [vmem:[#allocation58_spill] sm:$0xff] %v8663_v6  ;;  %v8670_v56 = vmax.f32 %v2350_v31, 0.0  ;;  %v2353_v53 = vadd.f32 %v5950_v62, %v8451_v12  ;;  %v2344_v59 = vpop.f32.mrb[27].mxu1  ;;  %6653 = vrot.lane.b32.xlu0 %v6652_v15, %s7073_s28  ;;  %v2549_v19 = vsel %vm945_vm1, %v2527_v35, %v2528_v33  ;;  %v2592_v37 = vmul.f32 %v10467_v2, %v2548_v43 }
 0x300   : > { %v2396_v6 = vmax.f32 %v2342_v21, 0.0  ;;  %v2345_v14 = vadd.f32 %v2344_v59, %v8451_v12  ;;  %v6657_v18 = vpack.i.bf16 %v2590_v23, %v2551_v45  ;;  %v8680_v39 = vsel %vm848_vm0, %v2431_v51, %v2432_v40 }
 0x301   : > { %10468 = vst [vmem:[#allocation59_spill] sm:$0xff] %v8680_v39  ;;  %v2399_v22 = vmax.f32 %v2353_v53, 0.0  ;;  %v6667_v31 = vpack.i.bf16 %v2592_v37, %v2549_v19  ;;  %v8685_v35 = vsel %vm848_vm0, %v2433_v4, %v2434_v57  ;;  %v2437_v33 = vrot.slane %v8670_v56, 7 }
 0x302   : > { %v2435_v58 = vrot.slane %v2396_v6, 7  ;;  %v2531_v62 = vrot.slane %v2396_v6, 1  ;;  %v2397_v28 = vmax.f32 %v2345_v14, 0.0  ;;  %6658 = vrot.lane.b32.xlu1 %v6657_v18, %s7074_s4  ;;  %10469 = vst [vmem:[#allocation60_spill] sm:$0xff] %v8685_v35  ;;  %v2533_v15 = vrot.slane %v8670_v56, 1 }
 0x303   : > { %v2534_v45 = vrot.slane %v2399_v22, 1  ;;  %6668 = vrot.lane.b32.xlu0 %v6667_v31, %s7074_s4  ;;  %v6682_v51 = vpack.i.bf16 %v2399_v22, %v8670_v56  ;;  %v2438_v43 = vrot.slane %v2399_v22, 7 }
 0x304   : > { %v8693_v19 = vsel %vm848_vm0, %v2434_v57, %v2435_v58  ;;  %v2436_v40 = vrot.slane %v2397_v28, 7  ;;  %v2532_v21 = vrot.slane %v2397_v28, 1  ;;  %v5953_v18 = vpop.f32.mrb[28].mxu1  ;;  %v6672_v23 = vpack.i.bf16 %v2397_v28, %v2396_v6  ;;  %v10472_v28 = vld [vmem:[#allocation16_spill] sm:$0xff] }
 0x305   : > { %10470 = vst [vmem:[#allocation61_spill] sm:$0xff] %v8693_v19  ;;  %v2366_v4 = vadd.f32 %v5953_v18, %v8451_v12  ;;  %v2357_v53 = vpop.f32.mrb[29].mxu1  ;;  %v2546_v59 = vsel %vm945_vm1, %v2530_v25, %v2531_v62  ;;  %v2543_v37 = vsel %vm945_vm1, %v2533_v15, %v2534_v45 }
 0x306   : > { %v8702_v56 = vsel %vm848_vm0, %v2436_v40, %v2437_v33  ;;  %v2358_v57 = vadd.f32 %v2357_v53, %v8451_v12  ;;  %6663 = vrot.lane.b32.xlu1 %v6662_v54, %s7073_s28  ;;  %v5954_v14 = vpop.f32.mrb[30].mxu1  ;;  %v2594_v6 = vmul.f32 %v10472_v28, %v2546_v59  ;;  %v2544_v22 = vsel %vm945_vm1, %v2532_v21, %v2533_v15 }
 0x307   : > { %10471 = vst [vmem:[#allocation62_spill] sm:$0xff] %v8702_v56  ;;  %v2402_v31 = vmax.f32 %v2366_v4, 0.0  ;;  %v2369_v25 = vadd.f32 %v5954_v14, %v8451_v12  ;;  %v2360_v18 = vpop.f32.mrb[31].mxu1  ;;  %6673 = vrot.lane.b32.xlu0 %v6672_v23, %s7073_s28  ;;  %v2545_v2 = vsel %vm945_vm1, %v2531_v62, %v2532_v21  ;;  %v2596_v56 = vmul.f32 %v10442_v47, %v2544_v22 }
 0x308   : > { %v2400_v53 = vmax.f32 %v2358_v57, 0.0  ;;  %v2361_v54 = vadd.f32 %v2360_v18, %v8451_v12  ;;  %v6677_v35 = vpack.i.bf16 %v2594_v6, %v2547_v27  ;;  %v8717_v59 = vsel %vm848_vm0, %v2435_v58, %v2436_v40 }
 0x309   : > { %v2441_v15 = vrot.slane %v2402_v31, 7  ;;  %v2403_v4 = vmax.f32 %v2369_v25, 0.0  ;;  %v6687_v28 = vpack.i.bf16 %v2596_v56, %v2545_v2  ;;  %v8722_v62 = vsel %vm848_vm0, %v2437_v33, %v2438_v43 }
 0x30a   : > { %v2439_v14 = vrot.slane %v2400_v53, 7  ;;  %v2535_v19 = vrot.slane %v2400_v53, 1  ;;  %v2401_v39 = vmax.f32 %v2361_v54, 0.0  ;;  %6678 = vrot.lane.b32.xlu1 %v6677_v35, %s7074_s4  ;;  %v2537_v21 = vrot.slane %v2402_v31, 1 }
 0x30b   : > { %v2442_v23 = vrot.slane %v2403_v4, 7  ;;  %v2538_v12 = vrot.slane %v2403_v4, 1  ;;  %6688 = vrot.lane.b32.xlu0 %v6687_v28, %s7074_s4  ;;  %v6702_v27 = vpack.i.bf16 %v2403_v4, %v2402_v31  ;;  %v10473_v57 = vrot.slane %v8456_v17, 7 }
 0x30c   : > { %v8727_v58 = vsel %vm848_vm0, %v2438_v43, %v2439_v14  ;;  %v2440_v2 = vrot.slane %v2401_v39, 7  ;;  %v2536_v40 = vrot.slane %v2401_v39, 1  ;;  %v6692_v56 = vpack.i.bf16 %v2401_v39, %v2400_v53 }
 0x30d   : > { %v2474_v35 = vsel %vm848_vm0, %v2442_v23, %v10473_v57  ;;  %v2542_v33 = vsel %vm945_vm1, %v2534_v45, %v2535_v19  ;;  %v2539_v6 = vsel %vm945_vm1, %v2537_v21, %v2538_v12  ;;  %v10474_v28 = vrot.slane %v8456_v17, 1 }
 0x30e   : > { %v8743_v22 = vsel %vm848_vm0, %v2440_v2, %v2441_v15  ;;  %6683 = vrot.lane.b32.xlu1 %v6682_v51, %s7073_s28  ;;  %v2598_v39 = vmul.f32 %v7576_v36, %v2542_v33  ;;  %v2540_v31 = vsel %vm945_vm1, %v2536_v40, %v2537_v21  ;;  %v2541_v45 = vsel %vm945_vm1, %v2535_v19, %v2536_v40 }
 0x30f   : > { %v2570_v43 = vsel %vm945_vm1, %v2538_v12, %v10474_v28  ;;  %6693 = vrot.lane.b32.xlu0 %v6692_v56, %s7073_s28  ;;  %v2600_v17 = vmul.f32 %v7581_v20, %v2540_v31  ;;  %v8756_v18 = vsel %vm848_vm0, %v2439_v14, %v2440_v2  ;;  %v8760_v51 = vsel %vm848_vm0, %v2441_v15, %v2442_v23 }
 0x310   : > { %v2602_v25 = vmul.f32 %v7628_v10, %v2570_v43  ;;  %v6697_v53 = vpack.i.bf16 %v2598_v39, %v2543_v37  ;;  %v2475_v14 = vmul.f32 %v7744_v42, %v2474_v35  ;;  %v10475_v35 = vld [vmem:[#allocation20_spill] sm:$0xff] }
 0x311   : > { %v6707_v54 = vpack.i.bf16 %v2600_v17, %v2541_v45  ;;  %v2477_v45 = vmul.f32 %v10475_v35, %v8472_v61 }
 0x312   : > { %v6712_v4 = vpack.i.bf16 %v2602_v25, %v2539_v6  ;;  %6698 = vrot.lane.b32.xlu1 %v6697_v53, %s7074_s4  ;;  %v2479_v25 = vmul.f32 %v7757_v30, %v8499_v63 }
 0x313   : > { %6708 = vrot.lane.b32.xlu0 %v6707_v54, %s7074_s4 }
 0x316   : > { %6703 = vrot.lane.b32.xlu1 %v6702_v27, %s7073_s28 }
 0x31a   : > { %6713 = vrot.lane.b32.xlu1 %v6712_v4, %s7074_s4 }
 0x347   : > { %v6559_v15 = vpop.permute.xlu1 %6558 }
 0x348   : > { %v6564_v19 = vpop.permute.xlu0 %6563  ;;  %v6561_v28 = vunpack.i.h.bf16 %v6559_v15  ;;  %v6560_v43 = vunpack.i.l.bf16 %v6559_v15 }
 0x349   : > { %v6566_v21 = vunpack.i.h.bf16 %v6564_v19  ;;  %v6565_v12 = vunpack.i.l.bf16 %v6564_v19 }
 0x34a   : > { %v2861_v4 = vsel %vm2058_vm8, %v2477_v45, %v6560_v43  ;;  %v2862_v19 = vsel %vm2058_vm8, %v8468_v55, %v6561_v28  ;;  %v2483_v43 = vmul.f32 %v7780_v60, %v8537_v50 }
 0x34b   : > { %v2859_v23 = vsel %vm2058_vm8, %v2475_v14, %v6565_v12  ;;  %v2860_v56 = vsel %vm2058_vm8, %v8491_v13, %v6566_v21 }
 0x34d   : > { %v6569_v37 = vpop.permute.xlu0 %6568 }
 0x34e   : > { %v6571_v2 = vunpack.i.h.bf16 %v6569_v37  ;;  %v6570_v40 = vunpack.i.l.bf16 %v6569_v37 }
 0x350   : > { %v2891_v57 = vsel %vm2091_vm9, %v2859_v23, %v6570_v40  ;;  %v2892_v27 = vsel %vm2091_vm9, %v2860_v56, %v6571_v2 }
 0x351   : > { %v2923_v33 = vpack.c.bf16 %v2892_v27, %v2891_v57  ;;  %v6574_v6 = vpop.permute.xlu0 %6573 }
 0x352   : > { %v6576_v39 = vunpack.i.h.bf16 %v6574_v6  ;;  %v6575_v31 = vunpack.i.l.bf16 %v6574_v6  ;;  %v2481_v6 = vmul.f32 %v7773_v41, %v8508_v5 }
 0x353   : > { %5961 = vmatprep.mubr.msk.bf16.mxu0 %vm2162_vm11, %v2923_v33 }
 0x354   : > { %v6579_v17 = vpop.permute.xlu1 %6578  ;;  %v2864_v14 = vsel %vm2058_vm8, %v8524_v52, %v6576_v39  ;;  %v2863_v37 = vsel %vm2058_vm8, %v2479_v25, %v6575_v31 }
 0x355   : > { %v6581_v13 = vunpack.i.h.bf16 %v6579_v17  ;;  %v6580_v53 = vunpack.i.l.bf16 %v6579_v17  ;;  %v6589_v54 = vpop.permute.xlu0 %6588 }
 0x356   : > { %v6591_v21 = vunpack.i.h.bf16 %v6589_v54  ;;  %v6590_v12 = vunpack.i.l.bf16 %v6589_v54 }
 0x357   : > { %v2894_v61 = vsel %vm2091_vm9, %v2862_v19, %v6581_v13  ;;  %v2893_v2 = vsel %vm2091_vm9, %v2861_v4, %v6580_v53 }
 0x358   : > { %v2924_v63 = vpack.c.bf16 %v2894_v61, %v2893_v2  ;;  %v2895_v40 = vsel %vm2091_vm9, %v2863_v37, %v6590_v12  ;;  %v2896_v15 = vsel %vm2091_vm9, %v2864_v14, %v6591_v21  ;;  %v6584_v23 = vpop.permute.xlu1 %6583 }
 0x359   : > { %v2925_v56 = vpack.c.bf16 %v2896_v15, %v2895_v40  ;;  %v6594_v57 = vpop.permute.xlu0 %6593  ;;  %v6586_v55 = vunpack.i.h.bf16 %v6584_v23  ;;  %v6585_v27 = vunpack.i.l.bf16 %v6584_v23  ;;  %v2485_v40 = vmul.f32 %v7795_v38, %v8546_v29 }
 0x35a   : > { %5962 = vmatmul.mubr.msk.bf16.vlgmr.msra.gmra.mrb[32].mxu0 %vm2162_vm11, %v2924_v63  ;;  %v6596_v33 = vunpack.i.h.bf16 %v6594_v57  ;;  %v6595_v52 = vunpack.i.l.bf16 %v6594_v57  ;;  %v2487_v23 = vmul.f32 %v7798_v3, %v8576_v49 }
 0x35b   : > { %5965 = vmatprep.mubr.msk.bf16.mxu0 %vm2162_vm11, %v2925_v56  ;;  %v2866_v17 = vsel %vm2058_vm8, %v8529_v24, %v6586_v55  ;;  %v2865_v25 = vsel %vm2058_vm8, %v2481_v6, %v6585_v27 }
 0x35c   : > { %v6599_v28 = vpop.permute.xlu1 %6598  ;;  %v2868_v54 = vsel %vm2058_vm8, %v8563_v16, %v6596_v33  ;;  %v2867_v4 = vsel %vm2058_vm8, %v2483_v43, %v6595_v52 }
 0x35d   : > { %v6601_v39 = vunpack.i.h.bf16 %v6599_v28  ;;  %v6600_v31 = vunpack.i.l.bf16 %v6599_v28  ;;  %v6609_v45 = vpop.permute.xlu0 %6608 }
 0x35e   : > { %v6611_v13 = vunpack.i.h.bf16 %v6609_v45  ;;  %v6610_v53 = vunpack.i.l.bf16 %v6609_v45 }
 0x35f   : > { %v2897_v5 = vsel %vm2091_vm9, %v2865_v25, %v6600_v31  ;;  %v2898_v19 = vsel %vm2091_vm9, %v2866_v17, %v6601_v39 }
 0x360   : > { %v2926_v50 = vpack.c.bf16 %v2898_v19, %v2897_v5  ;;  %v2899_v21 = vsel %vm2091_vm9, %v2867_v4, %v6610_v53  ;;  %v2900_v12 = vsel %vm2091_vm9, %v2868_v54, %v6611_v13  ;;  %v6604_v14 = vpop.permute.xlu1 %6603  ;;  %v2489_v4 = vmul.f32 %v7825_v8, %v8585_v7  ;;  %v10531_v8 = vld [vmem:[#allocation16_spill] sm:$0xff] }
 0x361   : > { %v2927_v24 = vpack.c.bf16 %v2900_v12, %v2899_v21  ;;  %v6614_v37 = vpop.permute.xlu0 %6613  ;;  %v6606_v61 = vunpack.i.h.bf16 %v6604_v14  ;;  %v6605_v2 = vunpack.i.l.bf16 %v6604_v14  ;;  %v2491_v19 = vmul.f32 %v7828_v11, %v8615_v9 }
 0x362   : > { %5966 = vmatmul.mubr.msk.bf16.gmra.mrb[36].mxu0 %vm2162_vm11, %v2926_v50  ;;  %v6616_v63 = vunpack.i.h.bf16 %v6614_v37  ;;  %v6615_v16 = vunpack.i.l.bf16 %v6614_v37 }
 0x363   : > { %5969 = vmatprep.mubr.msk.bf16.mxu0 %vm2162_vm11, %v2927_v24  ;;  %v2870_v27 = vsel %vm2058_vm8, %v8568_v44, %v6606_v61  ;;  %v2869_v33 = vsel %vm2058_vm8, %v2485_v40, %v6605_v2 }
 0x364   : > { %v6619_v15 = vpop.permute.xlu1 %6618  ;;  %v2872_v28 = vsel %vm2058_vm8, %v8602_v48, %v6616_v63  ;;  %v2871_v43 = vsel %vm2058_vm8, %v2487_v23, %v6615_v16 }
 0x365   : > { %v6621_v56 = vunpack.i.h.bf16 %v6619_v15  ;;  %v6620_v57 = vunpack.i.l.bf16 %v6619_v15  ;;  %v6629_v55 = vpop.permute.xlu0 %6628 }
 0x366   : > { %v6631_v52 = vunpack.i.h.bf16 %v6629_v55  ;;  %v6630_v6 = vunpack.i.l.bf16 %v6629_v55 }
 0x367   : > { %v2901_v29 = vsel %vm2091_vm9, %v2869_v33, %v6620_v57  ;;  %v2902_v39 = vsel %vm2091_vm9, %v2870_v27, %v6621_v56  ;;  %v2493_v33 = vmul.f32 %v7849_v32, %v8624_v26 }
 0x368   : > { %v2928_v49 = vpack.c.bf16 %v2902_v39, %v2901_v29  ;;  %v2903_v31 = vsel %vm2091_vm9, %v2871_v43, %v6630_v6  ;;  %v2904_v45 = vsel %vm2091_vm9, %v2872_v28, %v6631_v52  ;;  %v6624_v17 = vpop.permute.xlu1 %6623  ;;  %v10476_v6 = vld [vmem:[#allocation25_spill] sm:$0xff] }
 0x369   : > { %v2929_v44 = vpack.c.bf16 %v2904_v45, %v2903_v31  ;;  %v6634_v25 = vpop.permute.xlu0 %6633  ;;  %v6626_v13 = vunpack.i.h.bf16 %v6624_v17  ;;  %v6625_v53 = vunpack.i.l.bf16 %v6624_v17  ;;  %v2495_v28 = vmul.f32 %v10476_v6, %v8654_v34 }
 0x36a   : > { %5970 = vmatmul.mubr.msk.bf16.gmra.mrb[40].mxu0 %vm2162_vm11, %v2928_v49  ;;  %v6636_v54 = vunpack.i.h.bf16 %v6634_v25  ;;  %v6635_v48 = vunpack.i.l.bf16 %v6634_v25  ;;  %v10477_v49 = vld [vmem:[#allocation57_spill] sm:$0xff]  ;;  %v10478_v25 = vld [vmem:[#allocation59_spill] sm:$0xff] }
 0x36b   : > { %5973 = vmatprep.mubr.msk.bf16.mxu0 %vm2162_vm11, %v2929_v44  ;;  %v2874_v14 = vsel %vm2058_vm8, %v8607_v46, %v6626_v13  ;;  %v2873_v24 = vsel %vm2058_vm8, %v2489_v4, %v6625_v53 }
 0x36c   : > { %v6639_v5 = vpop.permute.xlu1 %6638  ;;  %v2876_v2 = vsel %vm2058_vm8, %v8641_v0, %v6636_v54  ;;  %v2875_v63 = vsel %vm2058_vm8, %v2491_v19, %v6635_v48 }
 0x36d   : > { %v6641_v50 = vunpack.i.h.bf16 %v6639_v5  ;;  %v6640_v21 = vunpack.i.l.bf16 %v6639_v5  ;;  %v6649_v12 = vpop.permute.xlu0 %6648 }
 0x36e   : > { %v6651_v37 = vunpack.i.h.bf16 %v6649_v12  ;;  %v6650_v61 = vunpack.i.l.bf16 %v6649_v12 }
 0x36f   : > { %v2905_v7 = vsel %vm2091_vm9, %v2873_v24, %v6640_v21  ;;  %v2906_v16 = vsel %vm2091_vm9, %v2874_v14, %v6641_v50 }
 0x370   : > { %v2930_v9 = vpack.c.bf16 %v2906_v16, %v2905_v7  ;;  %v2907_v40 = vsel %vm2091_vm9, %v2875_v63, %v6650_v61  ;;  %v2908_v15 = vsel %vm2091_vm9, %v2876_v2, %v6651_v37  ;;  %v6644_v23 = vpop.permute.xlu1 %6643  ;;  %v10479_v37 = vld [vmem:[#allocation58_spill] sm:$0xff]  ;;  %v10481_v7 = vld [vmem:[#allocation61_spill] sm:$0xff]  ;;  %v10482_v16 = vld [vmem:[#allocation27_spill] sm:$0xff] }
 0x371   : > { %v2931_v46 = vpack.c.bf16 %v2908_v15, %v2907_v40  ;;  %v6654_v56 = vpop.permute.xlu0 %6653  ;;  %v6646_v57 = vunpack.i.h.bf16 %v6644_v23  ;;  %v6645_v55 = vunpack.i.l.bf16 %v6644_v23  ;;  %v10480_v61 = vld [vmem:[#allocation26_spill] sm:$0xff] }
 0x372   : > { %5974 = vmatmul.mubr.msk.bf16.gmra.mrb[44].mxu0 %vm2162_vm11, %v2930_v9  ;;  %v6656_v27 = vunpack.i.h.bf16 %v6654_v56  ;;  %v6655_v0 = vunpack.i.l.bf16 %v6654_v56  ;;  %v2497_v2 = vmul.f32 %v10480_v61, %v10479_v37  ;;  %v2499_v9 = vmul.f32 %v10482_v16, %v10481_v7  ;;  %v10525_v61 = vld [vmem:[#allocation12_spill] sm:$0xff] }
 0x373   : > { %5977 = vmatprep.mubr.msk.bf16.mxu0 %vm2162_vm11, %v2931_v46  ;;  %v2878_v31 = vsel %vm2058_vm8, %v10477_v49, %v6646_v57  ;;  %v2877_v45 = vsel %vm2058_vm8, %v2493_v33, %v6645_v55  ;;  %v10483_v46 = vld [vmem:[#allocation60_spill] sm:$0xff] }
 0x374   : > { %v6659_v52 = vpop.permute.xlu1 %6658  ;;  %v2880_v13 = vsel %vm2058_vm8, %v10478_v25, %v6656_v27  ;;  %v2879_v53 = vsel %vm2058_vm8, %v2495_v28, %v6655_v0 }
 0x375   : > { %v6661_v43 = vunpack.i.h.bf16 %v6659_v52  ;;  %v6660_v29 = vunpack.i.l.bf16 %v6659_v52  ;;  %v6669_v39 = vpop.permute.xlu0 %6668 }
 0x376   : > { %v6671_v17 = vunpack.i.h.bf16 %v6669_v39  ;;  %v6670_v44 = vunpack.i.l.bf16 %v6669_v39 }
 0x377   : > { %v2909_v26 = vsel %vm2091_vm9, %v2877_v45, %v6660_v29  ;;  %v2910_v54 = vsel %vm2091_vm9, %v2878_v31, %v6661_v43 }
 0x378   : > { %v2932_v34 = vpack.c.bf16 %v2910_v54, %v2909_v26  ;;  %v2911_v48 = vsel %vm2091_vm9, %v2879_v53, %v6670_v44  ;;  %v2912_v4 = vsel %vm2091_vm9, %v2880_v13, %v6671_v17  ;;  %v6664_v5 = vpop.permute.xlu1 %6663  ;;  %v10484_v13 = vld [vmem:[#allocation62_spill] sm:$0xff]  ;;  %v10485_v53 = vld [vmem:[#allocation11_spill] sm:$0xff] }
 0x379   : > { %v2933_v19 = vpack.c.bf16 %v2912_v4, %v2911_v48  ;;  %v6674_v50 = vpop.permute.xlu0 %6673  ;;  %v6666_v21 = vunpack.i.h.bf16 %v6664_v5  ;;  %v6665_v12 = vunpack.i.l.bf16 %v6664_v5  ;;  %v2501_v26 = vmul.f32 %v10485_v53, %v10484_v13 }
 0x37a   : > { %5978 = vmatmul.mubr.msk.bf16.gmra.mrb[48].mxu0 %vm2162_vm11, %v2932_v34  ;;  %v6676_v14 = vunpack.i.h.bf16 %v6674_v50  ;;  %v6675_v24 = vunpack.i.l.bf16 %v6674_v50  ;;  %v10486_v34 = vld [vmem:[#allocation15_spill] sm:$0xff] }
 0x37b   : > { %5981 = vmatprep.mubr.msk.bf16.mxu0 %vm2162_vm11, %v2933_v19  ;;  %v2882_v56 = vsel %vm2058_vm8, %v10483_v46, %v6666_v21  ;;  %v2881_v57 = vsel %vm2058_vm8, %v2497_v2, %v6665_v12  ;;  %v2503_v48 = vmul.f32 %v10486_v34, %v8727_v58 }
 0x37c   : > { %v6679_v63 = vpop.permute.xlu1 %6678  ;;  %v2884_v0 = vsel %vm2058_vm8, %v8717_v59, %v6676_v14  ;;  %v2883_v33 = vsel %vm2058_vm8, %v2499_v9, %v6675_v24 }
 0x37d   : > { %v6681_v40 = vunpack.i.h.bf16 %v6679_v63  ;;  %v6680_v15 = vunpack.i.l.bf16 %v6679_v63  ;;  %v6689_v23 = vpop.permute.xlu0 %6688 }
 0x37e   : > { %v6691_v55 = vunpack.i.h.bf16 %v6689_v23  ;;  %v6690_v27 = vunpack.i.l.bf16 %v6689_v23 }
 0x37f   : > { %v2913_v52 = vsel %vm2091_vm9, %v2881_v57, %v6680_v15  ;;  %v2914_v28 = vsel %vm2091_vm9, %v2882_v56, %v6681_v40 }
 0x380   : > { %v2934_v43 = vpack.c.bf16 %v2914_v28, %v2913_v52  ;;  %v2915_v29 = vsel %vm2091_vm9, %v2883_v33, %v6690_v27  ;;  %v2916_v39 = vsel %vm2091_vm9, %v2884_v0, %v6691_v55  ;;  %v6684_v49 = vpop.permute.xlu1 %6683 }
 0x381   : > { %v2935_v31 = vpack.c.bf16 %v2916_v39, %v2915_v29  ;;  %v6694_v45 = vpop.permute.xlu0 %6693  ;;  %v6686_v17 = vunpack.i.h.bf16 %v6684_v49  ;;  %v6685_v44 = vunpack.i.l.bf16 %v6684_v49  ;;  %v7047_v29 = vld [vmem:[%s10205_s1 + $0xa0] sm:$0xff]   ;;  %v10488_v39 = vmov 0.0  }
 0x382   : > { %5982 = vmatmul.mubr.msk.bf16.gmra.mrb[52].mxu0 %vm2162_vm11, %v2934_v43  ;;  %v6696_v25 = vunpack.i.h.bf16 %v6694_v45  ;;  %v6695_v59 = vunpack.i.l.bf16 %v6694_v45  ;;  %v7044_v43 = vld [vmem:[%s10205_s1 + $0xf0] sm:$0xff]   ;;  %v2941_v49 = vsub.s32 2, %v7107_v1 }
 0x383   : > { %5985 = vmatprep.mubr.msk.bf16.mxu0 %vm2162_vm11, %v2935_v31  ;;  %v2886_v50 = vsel %vm2058_vm8, %v8722_v62, %v6686_v17  ;;  %v2885_v21 = vsel %vm2058_vm8, %v2501_v26, %v6685_v44  ;;  %5993 = vmatprep.subr.bf16.mxu1 %v7044_v43  ;;  %v7059_v31 = vld [vmem:[%s10206_s2] sm:$0xff]  ;;  %v10489_v26 = vld [vmem:[#allocation19_spill] sm:$0xff] }
 0x384   : > { %v6699_v54 = vpop.permute.xlu1 %6698  ;;  %v2888_v24 = vsel %vm2058_vm8, %v8756_v18, %v6696_v25  ;;  %v2887_v37 = vsel %vm2058_vm8, %v2503_v48, %v6695_v59  ;;  %v10487_v18 = vld [vmem:[#allocation14_spill] sm:$0xff]  ;;  %5994 = vmatpush3.bf16.msra.mxu1 %v7044_v43  ;;  %v8910_v45 = vrot.slane %v7059_v31, %v2941_v49  ;;  %v10494_v31 = vld [vmem:[#allocation31_spill] sm:$0xff] }
 0x385   : > { %v6701_v4 = vunpack.i.h.bf16 %v6699_v54  ;;  %v6700_v5 = vunpack.i.l.bf16 %v6699_v54  ;;  %v6709_v19 = vpop.permute.xlu0 %6708  ;;  %v2505_v46 = vmul.f32 %v10487_v18, %v8743_v22  ;;  %v7045_v22 = vld [vmem:[%s10205_s1 + $0x90] sm:$0xff]   ;;  %v10519_v18 = vld [vmem:[#allocation9_spill] sm:$0xff] }
 0x386   : > { %v6711_v12 = vunpack.i.h.bf16 %v6709_v19  ;;  %v6710_v14 = vunpack.i.l.bf16 %v6709_v19  ;;  %6027 = vmatprep.subr.bf16.mxu0 %v7045_v22 }
 0x387   : > { %v2917_v2 = vsel %vm2091_vm9, %v2885_v21, %v6700_v5  ;;  %v2918_v63 = vsel %vm2091_vm9, %v2886_v50, %v6701_v4  ;;  %6028 = vmatpush3.bf16.msra.mxu0 %v7045_v22  ;;  %v10490_v5 = vld [vmem:[#allocation28_spill] sm:$0xff] }
 0x388   : > { %v2936_v58 = vpack.c.bf16 %v2918_v63, %v2917_v2  ;;  %v2919_v7 = vsel %vm2091_vm9, %v2887_v37, %v6710_v14  ;;  %v2920_v9 = vsel %vm2091_vm9, %v2888_v24, %v6711_v12  ;;  %v6704_v40 = vpop.permute.xlu1 %6703  ;;  %v10491_v12 = vld [vmem:[#allocation18_spill] sm:$0xff]  ;;  %v10492_v37 = vld [vmem:[#allocation29_spill] sm:$0xff] }
 0x389   : > { %v2937_v62 = vpack.c.bf16 %v2920_v9, %v2919_v7  ;;  %v6706_v15 = vunpack.i.h.bf16 %v6704_v40  ;;  %v6705_v23 = vunpack.i.l.bf16 %v6704_v40 }
 0x38a   : > { %5986 = vmatmul.mubr.msk.bf16.gmra.mrb[56].mxu0 %vm2162_vm11, %v2936_v58 }
 0x38b   : > { %5989 = vmatprep.mubr.msk.bf16.mxu0 %vm2162_vm11, %v2937_v62  ;;  %v2890_v27 = vsel %vm2058_vm8, %v8760_v51, %v6706_v15  ;;  %v2889_v0 = vsel %vm2058_vm8, %v2505_v46, %v6705_v23  ;;  %v7046_v51 = vld [vmem:[%s10205_s1 + $0x98] sm:$0xff]  }
 0x38c   : > { %v6714_v56 = vpop.permute.xlu1 %6713  ;;  %6029 = vmatprep.subr.bf16.mxu0 %v7046_v51 }
 0x38d   : > { %v6716_v57 = vunpack.i.h.bf16 %v6714_v56  ;;  %v6715_v55 = vunpack.i.l.bf16 %v6714_v56  ;;  %6030 = vmatpush3.bf16.msra.mxu0 %v7046_v51 }
 0x38e   : > { %6031 = vmatprep.subr.bf16.mxu0 %v7047_v29 }
 0x38f   : > { %v2922_v33 = vsel %vm2091_vm9, %v2890_v27, %v6716_v57  ;;  %v2921_v52 = vsel %vm2091_vm9, %v2889_v0, %v6715_v55 }
 0x390   : > { %v2938_v28 = vpack.c.bf16 %v2922_v33, %v2921_v52 }
 0x391   : > { %6032 = vmatpush3.bf16.msra.mxu0 %v7047_v29 }
 0x392   : > { %5990 = vmatmul.mubr.msk.bf16.gmra.mrb[60].mxu0 %vm2162_vm11, %v2938_v28  ;;  %6109 = vmatprep.subr.bf16.mxu0 %v10488_v39  ;;  %v10493_v28 = vld [vmem:[#allocation30_spill] sm:$0xff] }
 0x42d   : > { %v5963_v17 = vpop.f32.mrb[32].mxu0 }
 0x42e   : > { %v3052_v44 = vadd.f32 %v5963_v17, %v8910_v45  ;;  %v3043_v25 = vpop.f32.mrb[33].mxu0 }
 0x42f   : > { %v3044_v59 = vadd.f32 %v3043_v25, %v8910_v45  ;;  %v5964_v13 = vpop.f32.mrb[34].mxu0 }
 0x430   : > { %v3172_v54 = vadd.f32 %v3052_v44, %v10489_v26  ;;  %v3055_v48 = vadd.f32 %v5964_v13, %v8910_v45  ;;  %v3046_v4 = vpop.f32.mrb[35].mxu0  ;;  %v10495_v26 = vld [vmem:[#allocation33_spill] sm:$0xff] }
 0x431   : > { %v3170_v19 = vadd.f32 %v3044_v59, %v10490_v5  ;;  %v3047_v50 = vadd.f32 %v3046_v4, %v8910_v45 }
 0x432   : > { %v3204_v21 = vmax.f32 %v3172_v54, 0.0  ;;  %v3173_v14 = vadd.f32 %v3055_v48, %v10491_v12  ;;  %v10496_v48 = vld [vmem:[#allocation2_spill] sm:$0xff] }
 0x433   : > { %v8919_v24 = vmax.f32 %v3170_v19, 0.0  ;;  %v3171_v2 = vadd.f32 %v3047_v50, %v10492_v37  ;;  %v10497_v50 = vld [vmem:[#allocation32_spill] sm:$0xff] }
 0x434   : > { %v8922_v63 = vmax.f32 %v3173_v14, 0.0  ;;  %v3481_v58 = vrot.slane %v3204_v21, 7  ;;  %v3577_v7 = vrot.slane %v3204_v21, 1 }
 0x435   : > { %v10316_v9 = vrot.slane %v8919_v24, 1  ;;  %v8925_v40 = vmax.f32 %v3171_v2, 0.0  ;;  %v5967_v62 = vpop.f32.mrb[36].mxu0 }
 0x436   : > { %v3238_v15 = vpack.c.bf16 %v8922_v63, %v3204_v21  ;;  %v10314_v23 = vrot.slane %v8922_v63, 7  ;;  %v3578_v46 = vrot.slane %v8922_v63, 1  ;;  %v3068_v56 = vadd.f32 %v5967_v62, %v8910_v45  ;;  %v3059_v57 = vpop.f32.mrb[37].mxu0 }
 0x437   : > { %v10315_v55 = vrot.slane %v8925_v40, 7  ;;  %v3576_v27 = vrot.slane %v8925_v40, 1  ;;  %v3060_v0 = vadd.f32 %v3059_v57, %v8910_v45  ;;  %v5968_v33 = vpop.f32.mrb[38].mxu0  ;;  %v6717_v52 = vpack.i.bf16 %v8922_v63, %v3204_v21 }
 0x438   : > { %v3176_v43 = vadd.f32 %v3068_v56, %v10493_v28  ;;  %v3071_v22 = vadd.f32 %v5968_v33, %v8910_v45  ;;  %v3062_v51 = vpop.f32.mrb[39].mxu0  ;;  %v6722_v29 = vpack.i.bf16 %v8925_v40, %v8919_v24  ;;  %v3237_v49 = vpack.c.bf16 %v8925_v40, %v8919_v24 }
 0x439   : > { %v3174_v17 = vadd.f32 %v3060_v0, %v10494_v31  ;;  %6718 = vrot.lane.b32.xlu1 %v6717_v52, %s7073_s28  ;;  %v3063_v44 = vadd.f32 %v3062_v51, %v8910_v45  ;;  %v3636_v25 = vsel %vm945_vm1, %v3576_v27, %v3577_v7  ;;  %v3637_v59 = vsel %vm945_vm1, %v10316_v9, %v3576_v27 }
 0x43a   : > { %v8950_v13 = vmax.f32 %v3176_v43, 0.0  ;;  %v3177_v54 = vadd.f32 %v3071_v22, %v10495_v26  ;;  %6723 = vrot.lane.b32.xlu0 %v6722_v29, %s7073_s28  ;;  %5995 = vmatprep.mubr.msk.bf16.mxu1 %vm2058_vm8, %v3237_v49  ;;  %v3640_v4 = vmul.f32 %v10496_v48, %v3636_v25  ;;  %v3635_v5 = vsel %vm945_vm1, %v3577_v7, %v3578_v46  ;;  %v10498_v22 = vld [vmem:[#allocation34_spill] sm:$0xff]  ;;  %v10500_v26 = vld [vmem:[#allocation3_spill] sm:$0xff] }
 0x43b   : > { %v8958_v19 = vmax.f32 %v3174_v17, 0.0  ;;  %v3175_v21 = vadd.f32 %v3063_v44, %v10497_v50  ;;  %5996 = vmatmul.mubr.msk.bf16.vlgmr.msra.gmra.mrb[32].mxu1 %vm2058_vm8, %v3238_v15  ;;  %v8966_v12 = vsel %vm848_vm0, %v3481_v58, %v10314_v23  ;;  %v8972_v14 = vsel %vm848_vm0, %v10315_v55, %v3481_v58  ;;  %v10499_v44 = vld [vmem:[#allocation35_spill] sm:$0xff] }
 0x43c   : > { %v8974_v37 = vmax.f32 %v3177_v54, 0.0  ;;  %v6727_v2 = vpack.i.bf16 %v3640_v4, %v3637_v59  ;;  %v3581_v56 = vrot.slane %v8950_v13, 1 }
 0x43d   : > { %v3579_v7 = vrot.slane %v8958_v19, 1  ;;  %v8977_v62 = vmax.f32 %v3175_v21, 0.0  ;;  %v5971_v15 = vpop.f32.mrb[40].mxu0  ;;  %v10501_v21 = vld [vmem:[#allocation37_spill] sm:$0xff] }
 0x43e   : > { %v3084_v57 = vadd.f32 %v5971_v15, %v8910_v45  ;;  %v3075_v27 = vpop.f32.mrb[41].mxu0  ;;  %6728 = vrot.lane.b32.xlu0 %v6727_v2, %s7074_s4  ;;  %v3240_v0 = vpack.c.bf16 %v8974_v37, %v8950_v13  ;;  %v3582_v58 = vrot.slane %v8974_v37, 1  ;;  %v10502_v15 = vld [vmem:[#allocation4_spill] sm:$0xff] }
 0x43f   : > { %v3580_v33 = vrot.slane %v8977_v62, 1  ;;  %v3076_v52 = vadd.f32 %v3075_v27, %v8910_v45  ;;  %v5972_v28 = vpop.f32.mrb[42].mxu0  ;;  %v3239_v43 = vpack.c.bf16 %v8977_v62, %v8958_v19  ;;  %v6732_v31 = vpack.i.bf16 %v8977_v62, %v8958_v19 }
 0x440   : > { %v3180_v51 = vadd.f32 %v3084_v57, %v10498_v22  ;;  %v3087_v29 = vadd.f32 %v5972_v28, %v8910_v45  ;;  %v3078_v49 = vpop.f32.mrb[43].mxu0  ;;  %v3634_v17 = vsel %vm945_vm1, %v3578_v46, %v3579_v7  ;;  %v6742_v22 = vpack.i.bf16 %v8974_v37, %v8950_v13 }
 0x441   : > { %v3178_v25 = vadd.f32 %v3076_v52, %v10499_v44  ;;  %v3079_v59 = vadd.f32 %v3078_v49, %v8910_v45  ;;  %5999 = vmatprep.mubr.msk.bf16.mxu1 %vm2058_vm8, %v3239_v43  ;;  %v3642_v54 = vmul.f32 %v10500_v26, %v3634_v17  ;;  %v3632_v4 = vsel %vm945_vm1, %v3580_v33, %v3581_v56  ;;  %v10503_v52 = vld [vmem:[#allocation36_spill] sm:$0xff] }
 0x442   : > { %v9001_v50 = vmax.f32 %v3180_v51, 0.0  ;;  %v3181_v2 = vadd.f32 %v3087_v29, %v10501_v21  ;;  %6733 = vrot.lane.b32.xlu0 %v6732_v31, %s7073_s28  ;;  %v3633_v46 = vsel %vm945_vm1, %v3579_v7, %v3580_v33  ;;  %v3644_v57 = vmul.f32 %v10502_v15, %v3632_v4  ;;  %v10504_v21 = vld [vmem:[#allocation38_spill] sm:$0xff]  ;;  %v10513_v15 = vld [vmem:[#allocation7_spill] sm:$0xff] }
 0x443   : > { %v9008_v27 = vmax.f32 %v3178_v25, 0.0  ;;  %v3179_v28 = vadd.f32 %v3079_v59, %v10503_v52  ;;  %6000 = vmatmul.mubr.msk.bf16.gmra.mrb[36].mxu1 %vm2058_vm8, %v3240_v0  ;;  %v6737_v43 = vpack.i.bf16 %v3642_v54, %v3635_v5  ;;  %v3631_v33 = vsel %vm945_vm1, %v3581_v56, %v3582_v58 }
 0x444   : > { %v9014_v51 = vmax.f32 %v3181_v2, 0.0  ;;  %v6747_v29 = vpack.i.bf16 %v3644_v57, %v3633_v46  ;;  %v3585_v44 = vrot.slane %v9001_v50, 1 }
 0x445   : > { %v3583_v49 = vrot.slane %v9008_v27, 1  ;;  %v9017_v31 = vmax.f32 %v3179_v28, 0.0  ;;  %6738 = vrot.lane.b32.xlu1 %v6737_v43, %s7074_s4  ;;  %v5975_v7 = vpop.f32.mrb[44].mxu0  ;;  %v10505_v28 = vld [vmem:[#allocation39_spill] sm:$0xff] }
 0x446   : > { %v3100_v17 = vadd.f32 %v5975_v7, %v8910_v45  ;;  %v3091_v0 = vpop.f32.mrb[45].mxu0  ;;  %6748 = vrot.lane.b32.xlu0 %v6747_v29, %s7074_s4  ;;  %v3242_v5 = vpack.c.bf16 %v9014_v51, %v9001_v50  ;;  %v10506_v7 = vld [vmem:[#allocation5_spill] sm:$0xff] }
 0x447   : > { %v3584_v25 = vrot.slane %v9017_v31, 1  ;;  %v3092_v59 = vadd.f32 %v3091_v0, %v8910_v45  ;;  %v5976_v54 = vpop.f32.mrb[46].mxu0  ;;  %v3241_v4 = vpack.c.bf16 %v9017_v31, %v9008_v27  ;;  %v6752_v57 = vpack.i.bf16 %v9017_v31, %v9008_v27 }
 0x448   : > { %v3184_v56 = vadd.f32 %v3100_v17, %v10504_v21  ;;  %v3103_v2 = vadd.f32 %v5976_v54, %v8910_v45  ;;  %v3094_v46 = vpop.f32.mrb[47].mxu0  ;;  %v3630_v52 = vsel %vm945_vm1, %v3582_v58, %v3583_v49  ;;  %v10507_v54 = vld [vmem:[#allocation41_spill] sm:$0xff] }
 0x449   : > { %v3182_v43 = vadd.f32 %v3092_v59, %v10505_v28  ;;  %v3095_v29 = vadd.f32 %v3094_v46, %v8910_v45  ;;  %6743 = vrot.lane.b32.xlu1 %v6742_v22, %s7073_s28  ;;  %6003 = vmatprep.mubr.msk.bf16.mxu1 %vm2058_vm8, %v3241_v4  ;;  %v3646_v0 = vmul.f32 %v10506_v7, %v3630_v52  ;;  %v10508_v46 = vld [vmem:[#allocation40_spill] sm:$0xff]  ;;  %v10509_v52 = vld [vmem:[#allocation6_spill] sm:$0xff] }
 0x44a   : > { %v9042_v17 = vmax.f32 %v3184_v56, 0.0  ;;  %v3185_v21 = vadd.f32 %v3103_v2, %v10507_v54  ;;  %6753 = vrot.lane.b32.xlu0 %v6752_v57, %s7073_s28  ;;  %v3628_v23 = vsel %vm945_vm1, %v3584_v25, %v3585_v44  ;;  %v3629_v58 = vsel %vm945_vm1, %v3583_v49, %v3584_v25 }
 0x44b   : > { %v9050_v59 = vmax.f32 %v3182_v43, 0.0  ;;  %v3183_v22 = vadd.f32 %v3095_v29, %v10508_v46  ;;  %6004 = vmatmul.mubr.msk.bf16.gmra.mrb[40].mxu1 %vm2058_vm8, %v3242_v5  ;;  %v6757_v4 = vpack.i.bf16 %v3646_v0, %v3631_v33  ;;  %v3648_v56 = vmul.f32 %v10509_v52, %v3628_v23 }
 0x44c   : > { %v9055_v28 = vmax.f32 %v3185_v21, 0.0  ;;  %v6762_v2 = vpack.i.bf16 %v9014_v51, %v9001_v50  ;;  %v3586_v57 = vrot.slane %v9014_v51, 1  ;;  %v3589_v0 = vrot.slane %v9042_v17, 1 }
 0x44d   : > { %v3587_v54 = vrot.slane %v9050_v59, 1  ;;  %v9061_v55 = vmax.f32 %v3183_v22, 0.0  ;;  %6758 = vrot.lane.b32.xlu1 %v6757_v4, %s7074_s4  ;;  %v5979_v49 = vpop.f32.mrb[48].mxu0  ;;  %v6767_v25 = vpack.i.bf16 %v3648_v56, %v3629_v58  ;;  %v10510_v4 = vld [vmem:[#allocation42_spill] sm:$0xff] }
 0x44e   : > { %v3116_v23 = vadd.f32 %v5979_v49, %v8910_v45  ;;  %v3107_v43 = vpop.f32.mrb[49].mxu0  ;;  %v3244_v29 = vpack.c.bf16 %v9055_v28, %v9042_v17 }
 0x44f   : > { %v3588_v21 = vrot.slane %v9061_v55, 1  ;;  %v3108_v46 = vadd.f32 %v3107_v43, %v8910_v45  ;;  %6768 = vrot.lane.b32.xlu0 %v6767_v25, %s7074_s4  ;;  %v5980_v22 = vpop.f32.mrb[50].mxu0  ;;  %v3243_v58 = vpack.c.bf16 %v9061_v55, %v9050_v59  ;;  %v6772_v5 = vpack.i.bf16 %v9061_v55, %v9050_v59  ;;  %v10511_v43 = vld [vmem:[#allocation43_spill] sm:$0xff] }
 0x450   : > { %v3188_v56 = vadd.f32 %v3116_v23, %v10510_v4  ;;  %v3119_v49 = vadd.f32 %v5980_v22, %v8910_v45  ;;  %v3110_v33 = vpop.f32.mrb[51].mxu0  ;;  %v3626_v9 = vsel %vm945_vm1, %v3586_v57, %v3587_v54  ;;  %v3627_v23 = vsel %vm945_vm1, %v3585_v44, %v3586_v57  ;;  %v10512_v4 = vld [vmem:[#allocation45_spill] sm:$0xff] }
 0x451   : > { %v3186_v52 = vadd.f32 %v3108_v46, %v10511_v43  ;;  %v3111_v25 = vadd.f32 %v3110_v33, %v8910_v45  ;;  %6763 = vrot.lane.b32.xlu1 %v6762_v2, %s7073_s28  ;;  %6007 = vmatprep.mubr.msk.bf16.mxu1 %vm2058_vm8, %v3243_v58  ;;  %v3650_v26 = vmul.f32 %v10513_v15, %v3626_v9  ;;  %v10514_v46 = vld [vmem:[#allocation44_spill] sm:$0xff]  ;;  %v10517_v9 = vld [vmem:[#allocation47_spill] sm:$0xff] }
 0x452   : > { %v9088_v22 = vmax.f32 %v3188_v56, 0.0  ;;  %v3189_v7 = vadd.f32 %v3119_v49, %v10512_v4  ;;  %v3624_v39 = vsel %vm945_vm1, %v3588_v21, %v3589_v0  ;;  %v3625_v44 = vsel %vm945_vm1, %v3587_v54, %v3588_v21  ;;  %v10515_v2 = vld [vmem:[#allocation8_spill] sm:$0xff] }
 0x453   : > { %v9094_v48 = vmax.f32 %v3186_v52, 0.0  ;;  %v3187_v33 = vadd.f32 %v3111_v25, %v10514_v46  ;;  %6773 = vrot.lane.b32.xlu0 %v6772_v5, %s7073_s28  ;;  %6008 = vmatmul.mubr.msk.bf16.gmra.mrb[44].mxu1 %vm2058_vm8, %v3244_v29  ;;  %v3652_v57 = vmul.f32 %v10515_v2, %v3624_v39  ;;  %v6777_v49 = vpack.i.bf16 %v3650_v26, %v3627_v23 }
 0x454   : > { %v9104_v56 = vmax.f32 %v3189_v7, 0.0  ;;  %v3590_v52 = vrot.slane %v9055_v28, 1  ;;  %v6782_v26 = vpack.i.bf16 %v9055_v28, %v9042_v17  ;;  %v3593_v7 = vrot.slane %v9088_v22, 1 }
 0x455   : > { %v3591_v43 = vrot.slane %v9094_v48, 1  ;;  %v9108_v25 = vmax.f32 %v3187_v33, 0.0  ;;  %v5983_v5 = vpop.f32.mrb[52].mxu0  ;;  %v6787_v29 = vpack.i.bf16 %v3652_v57, %v3625_v44  ;;  %6778 = vrot.lane.b32.xlu1 %v6777_v49, %s7074_s4  ;;  %v10516_v57 = vld [vmem:[#allocation46_spill] sm:$0xff] }
 0x456   : > { %v3132_v39 = vadd.f32 %v5983_v5, %v8910_v45  ;;  %v3123_v21 = vpop.f32.mrb[53].mxu0  ;;  %v3246_v58 = vpack.c.bf16 %v9104_v56, %v9088_v22 }
 0x457   : > { %v3592_v23 = vrot.slane %v9108_v25, 1  ;;  %v3124_v46 = vadd.f32 %v3123_v21, %v8910_v45  ;;  %6788 = vrot.lane.b32.xlu0 %v6787_v29, %s7074_s4  ;;  %v5984_v33 = vpop.f32.mrb[54].mxu0  ;;  %v3245_v44 = vpack.c.bf16 %v9108_v25, %v9094_v48  ;;  %v6792_v54 = vpack.i.bf16 %v9108_v25, %v9094_v48 }
 0x458   : > { %v3192_v49 = vadd.f32 %v3132_v39, %v10516_v57  ;;  %v3135_v5 = vadd.f32 %v5984_v33, %v8910_v45  ;;  %v3126_v4 = vpop.f32.mrb[55].mxu0  ;;  %v3622_v29 = vsel %vm945_vm1, %v3590_v52, %v3591_v43  ;;  %v3623_v39 = vsel %vm945_vm1, %v3589_v0, %v3590_v52  ;;  %v10518_v57 = vld [vmem:[#allocation49_spill] sm:$0xff]  ;;  %v10521_v52 = vld [vmem:[#allocation10_spill] sm:$0xff] }
 0x459   : > { %v3190_v2 = vadd.f32 %v3124_v46, %v10517_v9  ;;  %v3127_v21 = vadd.f32 %v3126_v4, %v8910_v45  ;;  %6011 = vmatprep.mubr.msk.bf16.mxu1 %vm2058_vm8, %v3245_v44  ;;  %6783 = vrot.lane.b32.xlu1 %v6782_v26, %s7073_s28  ;;  %v3654_v34 = vmul.f32 %v10519_v18, %v3622_v29  ;;  %v10520_v46 = vld [vmem:[#allocation48_spill] sm:$0xff]  ;;  %v10522_v18 = vld [vmem:[#allocation50_spill] sm:$0xff] }
 0x45a   : > { %v9135_v33 = vmax.f32 %v3192_v49, 0.0  ;;  %v3193_v15 = vadd.f32 %v3135_v5, %v10518_v57  ;;  %v3620_v9 = vsel %vm945_vm1, %v3592_v23, %v3593_v7  ;;  %v3621_v0 = vsel %vm945_vm1, %v3591_v43, %v3592_v23 }
 0x45b   : > { %v9142_v4 = vmax.f32 %v3190_v2, 0.0  ;;  %v3191_v44 = vadd.f32 %v3127_v21, %v10520_v46  ;;  %6793 = vrot.lane.b32.xlu0 %v6792_v54, %s7073_s28  ;;  %6012 = vmatmul.mubr.msk.bf16.gmra.mrb[48].mxu1 %vm2058_vm8, %v3246_v58  ;;  %v3656_v49 = vmul.f32 %v10521_v52, %v3620_v9  ;;  %v6797_v57 = vpack.i.bf16 %v3654_v34, %v3623_v39  ;;  %v10523_v52 = vld [vmem:[#allocation51_spill] sm:$0xff] }
 0x45c   : > { %v9152_v29 = vmax.f32 %v3193_v15, 0.0  ;;  %v3594_v2 = vrot.slane %v9104_v56, 1  ;;  %v6802_v34 = vpack.i.bf16 %v9104_v56, %v9088_v22  ;;  %v3597_v15 = vrot.slane %v9135_v33, 1 }
 0x45d   : > { %v3595_v21 = vrot.slane %v9142_v4, 1  ;;  %v9156_v46 = vmax.f32 %v3191_v44, 0.0  ;;  %v5987_v54 = vpop.f32.mrb[56].mxu0  ;;  %v6807_v58 = vpack.i.bf16 %v3656_v49, %v3621_v0  ;;  %6798 = vrot.lane.b32.xlu1 %v6797_v57, %s7074_s4 }
 0x45e   : > { %v3148_v23 = vadd.f32 %v5987_v54, %v8910_v45  ;;  %v3139_v9 = vpop.f32.mrb[57].mxu0  ;;  %v3248_v5 = vpack.c.bf16 %v9152_v29, %v9135_v33 }
 0x45f   : > { %v3596_v39 = vrot.slane %v9156_v46, 1  ;;  %v3140_v44 = vadd.f32 %v3139_v9, %v8910_v45  ;;  %6808 = vrot.lane.b32.xlu0 %v6807_v58, %s7074_s4  ;;  %v5988_v0 = vpop.f32.mrb[58].mxu0  ;;  %v3247_v49 = vpack.c.bf16 %v9156_v46, %v9142_v4  ;;  %v6812_v26 = vpack.i.bf16 %v9156_v46, %v9142_v4 }
 0x460   : > { %v3196_v57 = vadd.f32 %v3148_v23, %v10522_v18  ;;  %v3151_v54 = vadd.f32 %v5988_v0, %v8910_v45  ;;  %v3142_v43 = vpop.f32.mrb[59].mxu0  ;;  %v3618_v58 = vsel %vm945_vm1, %v3594_v2, %v3595_v21  ;;  %v3619_v18 = vsel %vm945_vm1, %v3593_v7, %v3594_v2  ;;  %v10524_v0 = vld [vmem:[#allocation53_spill] sm:$0xff] }
 0x461   : > { %v3194_v53 = vadd.f32 %v3140_v44, %v10523_v52  ;;  %v3143_v9 = vadd.f32 %v3142_v43, %v8910_v45  ;;  %6015 = vmatprep.mubr.msk.bf16.mxu1 %vm2058_vm8, %v3247_v49  ;;  %6803 = vrot.lane.b32.xlu1 %v6802_v34, %s7073_s28  ;;  %v3658_v6 = vmul.f32 %v10525_v61, %v3618_v58  ;;  %v10526_v44 = vld [vmem:[#allocation52_spill] sm:$0xff]  ;;  %v10527_v2 = vld [vmem:[#allocation13_spill] sm:$0xff]  ;;  %v10528_v61 = vld [vmem:[#allocation54_spill] sm:$0xff] }
 0x462   : > { %v9183_v23 = vmax.f32 %v3196_v57, 0.0  ;;  %v3197_v16 = vadd.f32 %v3151_v54, %v10524_v0  ;;  %v3616_v52 = vsel %vm945_vm1, %v3596_v39, %v3597_v15  ;;  %v3617_v7 = vsel %vm945_vm1, %v3595_v21, %v3596_v39 }
 0x463   : > { %v9190_v43 = vmax.f32 %v3194_v53, 0.0  ;;  %v3195_v49 = vadd.f32 %v3143_v9, %v10526_v44  ;;  %6813 = vrot.lane.b32.xlu0 %v6812_v26, %s7073_s28  ;;  %6016 = vmatmul.mubr.msk.bf16.gmra.mrb[52].mxu1 %vm2058_vm8, %v3248_v5  ;;  %v3660_v57 = vmul.f32 %v10527_v2, %v3616_v52  ;;  %v6817_v0 = vpack.i.bf16 %v3658_v6, %v3619_v18  ;;  %v10529_v2 = vld [vmem:[#allocation17_spill] sm:$0xff] }
 0x464   : > { %v9200_v58 = vmax.f32 %v3197_v16, 0.0  ;;  %v3598_v53 = vrot.slane %v9152_v29, 1  ;;  %v6822_v6 = vpack.i.bf16 %v9152_v29, %v9135_v33  ;;  %v3601_v16 = vrot.slane %v9183_v23, 1 }
 0x465   : > { %v3599_v9 = vrot.slane %v9190_v43, 1  ;;  %v9204_v44 = vmax.f32 %v3195_v49, 0.0  ;;  %v5991_v26 = vpop.f32.mrb[60].mxu0  ;;  %v6827_v5 = vpack.i.bf16 %v3660_v57, %v3617_v7  ;;  %6818 = vrot.lane.b32.xlu1 %v6817_v0, %s7074_s4 }
 0x466   : > { %v3164_v39 = vadd.f32 %v5991_v26, %v8910_v45  ;;  %v3155_v52 = vpop.f32.mrb[61].mxu0  ;;  %v3250_v54 = vpack.c.bf16 %v9200_v58, %v9183_v23 }
 0x467   : > { %v3600_v18 = vrot.slane %v9204_v44, 1  ;;  %v3156_v49 = vadd.f32 %v3155_v52, %v8910_v45  ;;  %6828 = vrot.lane.b32.xlu0 %v6827_v5, %s7074_s4  ;;  %v5992_v7 = vpop.f32.mrb[62].mxu0  ;;  %v3249_v57 = vpack.c.bf16 %v9204_v44, %v9190_v43  ;;  %v6832_v34 = vpack.i.bf16 %v9204_v44, %v9190_v43 }
 0x468   : > { %v3200_v0 = vadd.f32 %v3164_v39, %v10528_v61  ;;  %v3167_v26 = vadd.f32 %v5992_v7, %v8910_v45  ;;  %v3158_v21 = vpop.f32.mrb[63].mxu0  ;;  %v3614_v5 = vsel %vm945_vm1, %v3598_v53, %v3599_v9  ;;  %v3615_v61 = vsel %vm945_vm1, %v3597_v15, %v3598_v53  ;;  %v10530_v7 = vld [vmem:[#allocation55_spill] sm:$0xff] }
 0x469   : > { %v3198_v32 = vadd.f32 %v3156_v49, %v10529_v2  ;;  %v3159_v52 = vadd.f32 %v3158_v21, %v8910_v45  ;;  %6019 = vmatprep.mubr.msk.bf16.mxu1 %vm2058_vm8, %v3249_v57  ;;  %6823 = vrot.lane.b32.xlu1 %v6822_v6, %s7073_s28  ;;  %v3662_v3 = vmul.f32 %v10531_v8, %v3614_v5  ;;  %v10532_v21 = vld [vmem:[#allocation56_spill] sm:$0xff]  ;;  %v3602_v57 = vrot.slane %v9200_v58, 1 }
 0x46a   : > { %v9231_v39 = vmax.f32 %v3200_v0, 0.0  ;;  %v3201_v11 = vadd.f32 %v3167_v26, %v10530_v7  ;;  %v3612_v2 = vsel %vm945_vm1, %v3600_v18, %v3601_v16  ;;  %v3613_v15 = vsel %vm945_vm1, %v3599_v9, %v3600_v18 }
 0x46b   : > { %v9238_v45 = vmax.f32 %v3198_v32, 0.0  ;;  %v3199_v49 = vadd.f32 %v3159_v52, %v10532_v21  ;;  %6833 = vrot.lane.b32.xlu0 %v6832_v34, %s7073_s28  ;;  %6020 = vmatmul.mubr.msk.bf16.gmra.mrb[56].mxu1 %vm2058_vm8, %v3250_v54  ;;  %v3664_v53 = vmul.f32 %v10442_v47, %v3612_v2  ;;  %v6837_v26 = vpack.i.bf16 %v3662_v3, %v3615_v61 }
 0x46c   : > { %v9248_v0 = vmax.f32 %v3201_v11, 0.0  ;;  %v3605_v32 = vrot.slane %v9231_v39, 1  ;;  %v6842_v18 = vpack.i.bf16 %v9200_v58, %v9183_v23  ;;  %v3496_v3 = vrot.slane %v9108_v25, 7 }
 0x46d   : > { %v3603_v52 = vrot.slane %v9238_v45, 1  ;;  %v9252_v5 = vmax.f32 %v3199_v49, 0.0  ;;  %v6847_v34 = vpack.i.bf16 %v3664_v53, %v3613_v15  ;;  %6838 = vrot.lane.b32.xlu1 %v6837_v26, %s7074_s4  ;;  %v3611_v49 = vsel %vm945_vm1, %v3601_v16, %v3602_v57 }
 0x46e   : > { %v3606_v9 = vrot.slane %v9248_v0, 1  ;;  %v3252_v11 = vpack.c.bf16 %v9248_v0, %v9231_v39  ;;  %v6862_v15 = vpack.i.bf16 %v9248_v0, %v9231_v39  ;;  %v10533_v6 = vrot.slane %v8919_v24, 1 }
 0x46f   : > { %v3604_v61 = vrot.slane %v9252_v5, 1  ;;  %6848 = vrot.lane.b32.xlu0 %v6847_v34, %s7074_s4  ;;  %v3251_v7 = vpack.c.bf16 %v9252_v5, %v9238_v45  ;;  %v6852_v2 = vpack.i.bf16 %v9252_v5, %v9238_v45  ;;  %v3610_v21 = vsel %vm945_vm1, %v3602_v57, %v3603_v52 }
 0x470   : > { %v3607_v25 = vsel %vm945_vm1, %v3605_v32, %v3606_v9  ;;  %v3666_v53 = vmul.f32 %v7576_v36, %v3610_v21  ;;  %v3638_v16 = vsel %vm945_vm1, %v3606_v9, %v10533_v6  ;;  %v10535_v21 = vrot.slane %v8919_v24, 7 }
 0x471   : > { %6023 = vmatprep.mubr.msk.bf16.mxu1 %vm2058_vm8, %v3251_v7  ;;  %v3608_v26 = vsel %vm945_vm1, %v3604_v61, %v3605_v32  ;;  %v3609_v34 = vsel %vm945_vm1, %v3603_v52, %v3604_v61  ;;  %6843 = vrot.lane.b32.xlu1 %v6842_v18, %s7073_s28  ;;  %v3670_v54 = vmul.f32 %v7628_v10, %v3638_v16  ;;  %v10534_v7 = vrot.slane %v8925_v40, 7 }
 0x472   : > { %v3668_v57 = vmul.f32 %v7581_v20, %v3608_v26  ;;  %v10536_v52 = vmov %v10535_v21  ;;  %v10537_v61 = vrot.slane %v9248_v0, 7  ;;  %v3501_v9 = vrot.slane %v9135_v33, 7 }
 0x473   : > { %v3541_v32 = vsel %vm848_vm0, %v10535_v21, %v10534_v7  ;;  %v3499_v18 = vrot.slane %v9142_v4, 7  ;;  %6853 = vrot.lane.b32.xlu0 %v6852_v2, %s7073_s28  ;;  %6024 = vmatmul.mubr.msk.bf16.gmra.mrb[60].mxu1 %vm2058_vm8, %v3252_v11  ;;  %v6857_v40 = vpack.i.bf16 %v3666_v53, %v3611_v49  ;;  %v10538_v26 = vrot.slane %v8977_v62, 7 }
 0x474   : > { %v3542_v6 = vsel %vm848_vm0, %v10537_v61, %v10536_v52  ;;  %v10539_v16 = vrot.slane %v8958_v19, 7  ;;  %v6867_v7 = vpack.i.bf16 %v3668_v57, %v3609_v34  ;;  %v6872_v21 = vpack.i.bf16 %v3670_v54, %v3607_v25 }
 0x475   : > { %v10541_v33 = vrot.slane %v8922_v63, 7  ;;  %v10542_v11 = vrot.slane %v8974_v37, 7  ;;  %v10543_v2 = vrot.slane %v8950_v13, 7  ;;  %v3502_v53 = vrot.slane %v9152_v29, 7  ;;  %6858 = vrot.lane.b32.xlu1 %v6857_v40, %s7074_s4 }
 0x476   : > { %v9311_v24 = vsel %vm848_vm0, %v10539_v16, %v10538_v26  ;;  %v10540_v52 = vmov %v10539_v16  ;;  %v10545_v54 = vmov %v10538_v26  ;;  %v10546_v19 = vrot.slane %v9017_v31, 7 }
 0x477   : > { %v3538_v4 = vsel %vm848_vm0, %v10541_v33, %v10540_v52  ;;  %v9325_v49 = vsel %vm848_vm0, %v10543_v2, %v10542_v11  ;;  %v10544_v34 = vmov %v10543_v2  ;;  %v10547_v25 = vrot.slane %v9008_v27, 7  ;;  %6868 = vrot.lane.b32.xlu0 %v6867_v7, %s7074_s4 }
 0x478   : > { %v9334_v63 = vsel %vm848_vm0, %v10545_v54, %v10544_v34  ;;  %v10549_v29 = vmov %v10542_v11  ;;  %v3500_v62 = vrot.slane %v9156_v46, 7  ;;  %v3503_v26 = vrot.slane %v9190_v43, 7 }
 0x479   : > { %v9342_v57 = vsel %vm848_vm0, %v10547_v25, %v10546_v19  ;;  %v10548_v61 = vmov %v10547_v25  ;;  %v10550_v16 = vrot.slane %v9014_v51, 7  ;;  %v10551_v52 = vrot.slane %v9001_v50, 7  ;;  %6863 = vrot.lane.b32.xlu1 %v6862_v15, %s7073_s28 }
 0x47a   : > { %v9350_v13 = vsel %vm848_vm0, %v10549_v29, %v10548_v61  ;;  %v10553_v27 = vmov %v10546_v19  ;;  %v3504_v46 = vrot.slane %v9204_v44, 7  ;;  %v10554_v43 = vrot.slane %v9061_v55, 7 }
 0x47b   : > { %v9361_v33 = vsel %vm848_vm0, %v10551_v52, %v10550_v16  ;;  %v10552_v37 = vmov %v10551_v52  ;;  %v10555_v40 = vrot.slane %v9050_v59, 7  ;;  %v10557_v31 = vmov %v10550_v16 }
 0x47c   : > { %v9369_v11 = vsel %vm848_vm0, %v10553_v27, %v10552_v37  ;;  %v10558_v44 = vrot.slane %v9055_v28, 7  ;;  %v10559_v7 = vrot.slane %v9042_v17, 7  ;;  %v3506_v19 = vrot.slane %v9200_v58, 7 }
 0x47d   : > { %v9379_v2 = vsel %vm848_vm0, %v10555_v40, %v10554_v43  ;;  %v10556_v50 = vmov %v10555_v40  ;;  %v10561_v59 = vmov %v10554_v43  ;;  %v10562_v61 = vrot.slane %v9094_v48, 7  ;;  %6873 = vrot.lane.b32.xlu1 %v6872_v21, %s7074_s4 }
 0x47e   : > { %v9387_v34 = vsel %vm848_vm0, %v10557_v31, %v10556_v50  ;;  %v9395_v54 = vsel %vm848_vm0, %v10559_v7, %v10558_v44  ;;  %v10560_v25 = vmov %v10559_v7  ;;  %v10564_v52 = vmov %v10558_v44 }
 0x47f   : > { %v9404_v51 = vsel %vm848_vm0, %v10561_v59, %v10560_v25  ;;  %v9410_v29 = vsel %vm848_vm0, %v10562_v61, %v3496_v3  ;;  %v10563_v16 = vmov %v10562_v61  ;;  %v3507_v55 = vrot.slane %v9238_v45, 7 }
 0x480   : > { %v9418_v58 = vsel %vm848_vm0, %v10564_v52, %v10563_v16  ;;  %v3508_v17 = vrot.slane %v9252_v5, 7  ;;  %v10565_v37 = vrot.slane %v9104_v56, 7  ;;  %v10566_v27 = vrot.slane %v9088_v22, 7 }
 0x481   : > { %v3505_v40 = vrot.slane %v9183_v23, 7  ;;  %v9440_v45 = vsel %vm848_vm0, %v3499_v18, %v3500_v62  ;;  %v9450_v22 = vsel %vm848_vm0, %v3501_v9, %v3502_v53  ;;  %v9455_v23 = vsel %vm848_vm0, %v3500_v62, %v3501_v9 }
 0x482   : > { %v9428_v43 = vsel %vm848_vm0, %v10566_v27, %v10565_v37  ;;  %v10567_v48 = vmov %v10566_v27  ;;  %v10568_v5 = vmov %v10565_v37  ;;  %v9459_v15 = vsel %vm848_vm0, %v3503_v26, %v3504_v46 }
 0x483   : > { %v9434_v28 = vsel %vm848_vm0, %v3496_v3, %v10567_v48  ;;  %v9446_v50 = vsel %vm848_vm0, %v10568_v5, %v3499_v18  ;;  %v3509_v3 = vrot.slane %v9231_v39, 7  ;;  %v9463_v56 = vsel %vm848_vm0, %v3502_v53, %v3503_v26 }
 0x484   : > { %v9467_v18 = vsel %vm848_vm0, %v3505_v40, %v3506_v19  ;;  %v9471_v31 = vsel %vm848_vm0, %v3504_v46, %v3505_v40  ;;  %v9475_v39 = vsel %vm848_vm0, %v3507_v55, %v3508_v17  ;;  %v9479_v9 = vsel %vm848_vm0, %v3506_v19, %v3507_v55 }
 0x485   : > { %v10569_v62 = vrot.slane %v9248_v0, 7  ;;  %v9490_v26 = vsel %vm848_vm0, %v3508_v17, %v3509_v3  ;;  %v3543_v25 = vmul.f32 %v7744_v42, %v3542_v6  ;;  %v3545_v6 = vmul.f32 %v10475_v35, %v8972_v14 }
 0x487   : > { %v9485_v53 = vsel %vm848_vm0, %v3509_v3, %v10569_v62  ;;  %v3547_v62 = vmul.f32 %v7757_v30, %v3538_v4 }
 0x4ab   : > { %v6719_v16 = vpop.permute.xlu1 %6718 }
 0x4ac   : > { %v6724_v46 = vpop.permute.xlu0 %6723  ;;  %v6721_v27 = vunpack.i.h.bf16 %v6719_v16  ;;  %v6720_v48 = vunpack.i.l.bf16 %v6719_v16 }
 0x4ad   : > { %v6726_v44 = vunpack.i.h.bf16 %v6724_v46  ;;  %v6725_v7 = vunpack.i.l.bf16 %v6724_v46 }
 0x4af   : > { %v3927_v0 = vsel %vm2058_vm8, %v3543_v25, %v6725_v7  ;;  %v3928_v52 = vsel %vm2058_vm8, %v3541_v32, %v6726_v44  ;;  %v3929_v7 = vsel %vm2058_vm8, %v3545_v6, %v6720_v48  ;;  %v3930_v25 = vsel %vm2058_vm8, %v8966_v12, %v6721_v27 }
 0x4b0   : > { %v6729_v59 = vpop.permute.xlu0 %6728 }
 0x4b1   : > { %v6731_v19 = vunpack.i.h.bf16 %v6729_v59  ;;  %v6730_v61 = vunpack.i.l.bf16 %v6729_v59 }
 0x4b3   : > { %v3959_v55 = vsel %vm2091_vm9, %v3927_v0, %v6730_v61  ;;  %v3960_v21 = vsel %vm2091_vm9, %v3928_v52, %v6731_v19 }
 0x4b4   : > { %v3991_v37 = vpack.c.bf16 %v3960_v21, %v3959_v55  ;;  %v6734_v17 = vpop.permute.xlu0 %6733 }
 0x4b5   : > { %v6736_v40 = vunpack.i.h.bf16 %v6734_v17  ;;  %v6735_v5 = vunpack.i.l.bf16 %v6734_v17 }
 0x4b6   : > { %6033 = vmatprep.mubr.msk.bf16.mxu0 %vm2162_vm11, %v3991_v37 }
 0x4b7   : > { %v6739_v3 = vpop.permute.xlu1 %6738  ;;  %v3932_v61 = vsel %vm2058_vm8, %v9311_v24, %v6736_v40  ;;  %v3931_v16 = vsel %vm2058_vm8, %v3547_v62, %v6735_v5  ;;  %v3549_v24 = vmul.f32 %v7773_v41, %v9334_v63 }
 0x4b8   : > { %v6741_v46 = vunpack.i.h.bf16 %v6739_v3  ;;  %v6740_v32 = vunpack.i.l.bf16 %v6739_v3  ;;  %v6749_v44 = vpop.permute.xlu0 %6748 }
 0x4b9   : > { %v6751_v59 = vunpack.i.h.bf16 %v6749_v44  ;;  %v6750_v19 = vunpack.i.l.bf16 %v6749_v44 }
 0x4ba   : > { %v3962_v14 = vsel %vm2091_vm9, %v3930_v25, %v6741_v46  ;;  %v3961_v0 = vsel %vm2091_vm9, %v3929_v7, %v6740_v32  ;;  %v3551_v32 = vmul.f32 %v7780_v60, %v9350_v13 }
 0x4bb   : > { %v3992_v4 = vpack.c.bf16 %v3962_v14, %v3961_v0  ;;  %v3963_v52 = vsel %vm2091_vm9, %v3931_v16, %v6750_v19  ;;  %v3964_v55 = vsel %vm2091_vm9, %v3932_v61, %v6751_v59  ;;  %v6744_v21 = vpop.permute.xlu1 %6743 }
 0x4bc   : > { %v3993_v37 = vpack.c.bf16 %v3964_v55, %v3963_v52  ;;  %v6754_v17 = vpop.permute.xlu0 %6753  ;;  %v6746_v12 = vunpack.i.h.bf16 %v6744_v21  ;;  %v6745_v27 = vunpack.i.l.bf16 %v6744_v21 }
 0x4bd   : > { %6034 = vmatmul.mubr.msk.bf16.vlgmr.msra.gmra.mrb[64].mxu0 %vm2162_vm11, %v3992_v4  ;;  %v6756_v48 = vunpack.i.h.bf16 %v6754_v17  ;;  %v6755_v40 = vunpack.i.l.bf16 %v6754_v17 }
 0x4be   : > { %6037 = vmatprep.mubr.msk.bf16.mxu0 %vm2162_vm11, %v3993_v37  ;;  %v3934_v62 = vsel %vm2058_vm8, %v9325_v49, %v6746_v12  ;;  %v3933_v46 = vsel %vm2058_vm8, %v3549_v24, %v6745_v27  ;;  %v10570_v12 = vld [vmem:[#allocation21_spill] sm:$0xff] }
 0x4bf   : > { %v6759_v5 = vpop.permute.xlu1 %6758  ;;  %v3936_v19 = vsel %vm2058_vm8, %v9342_v57, %v6756_v48  ;;  %v3935_v61 = vsel %vm2058_vm8, %v3551_v32, %v6755_v40  ;;  %v3553_v57 = vmul.f32 %v7795_v38, %v9369_v11  ;;  %v3555_v27 = vmul.f32 %v10570_v12, %v9387_v34 }
 0x4c0   : > { %v6761_v6 = vunpack.i.h.bf16 %v6759_v5  ;;  %v6760_v3 = vunpack.i.l.bf16 %v6759_v5 }
 0x4c1   : > { %v6769_v44 = vpop.permute.xlu0 %6768 }
 0x4c2   : > { %v3965_v7 = vsel %vm2091_vm9, %v3933_v46, %v6760_v3  ;;  %v3966_v25 = vsel %vm2091_vm9, %v3934_v62, %v6761_v6  ;;  %v6771_v59 = vunpack.i.h.bf16 %v6769_v44  ;;  %v6770_v63 = vunpack.i.l.bf16 %v6769_v44 }
 0x4c3   : > { %v3994_v16 = vpack.c.bf16 %v3966_v25, %v3965_v7  ;;  %v6764_v14 = vpop.permute.xlu1 %6763 }
 0x4c4   : > { %v3967_v49 = vsel %vm2091_vm9, %v3935_v61, %v6770_v63  ;;  %v3968_v0 = vsel %vm2091_vm9, %v3936_v19, %v6771_v59  ;;  %v6766_v52 = vunpack.i.h.bf16 %v6764_v14  ;;  %v6765_v55 = vunpack.i.l.bf16 %v6764_v14  ;;  %v10571_v14 = vld [vmem:[#allocation22_spill] sm:$0xff] }
 0x4c5   : > { %v3995_v4 = vpack.c.bf16 %v3968_v0, %v3967_v49  ;;  %v6774_v13 = vpop.permute.xlu0 %6773  ;;  %6038 = vmatmul.mubr.msk.bf16.gmra.mrb[68].mxu0 %vm2162_vm11, %v3994_v16  ;;  %v3557_v49 = vmul.f32 %v10571_v14, %v9404_v51 }
 0x4c6   : > { %v6776_v21 = vunpack.i.h.bf16 %v6774_v13  ;;  %v6775_v37 = vunpack.i.l.bf16 %v6774_v13  ;;  %v3938_v5 = vsel %vm2058_vm8, %v9361_v33, %v6766_v52  ;;  %v3937_v6 = vsel %vm2058_vm8, %v3553_v57, %v6765_v55 }
 0x4c7   : > { %6041 = vmatprep.mubr.msk.bf16.mxu0 %vm2162_vm11, %v3995_v4  ;;  %v6779_v17 = vpop.permute.xlu1 %6778  ;;  %v10572_v4 = vld [vmem:[#allocation23_spill] sm:$0xff] }
 0x4c8   : > { %v6781_v24 = vunpack.i.h.bf16 %v6779_v17  ;;  %v6780_v48 = vunpack.i.l.bf16 %v6779_v17  ;;  %v3940_v46 = vsel %vm2058_vm8, %v9379_v2, %v6776_v21  ;;  %v3939_v32 = vsel %vm2058_vm8, %v3555_v27, %v6775_v37 }
 0x4c9   : > { %v6789_v40 = vpop.permute.xlu0 %6788  ;;  %v3559_v13 = vmul.f32 %v10572_v4, %v9418_v58 }
 0x4ca   : > { %v6791_v3 = vunpack.i.h.bf16 %v6789_v40  ;;  %v6790_v62 = vunpack.i.l.bf16 %v6789_v40  ;;  %v3969_v11 = vsel %vm2091_vm9, %v3937_v6, %v6780_v48  ;;  %v3970_v44 = vsel %vm2091_vm9, %v3938_v5, %v6781_v24 }
 0x4cb   : > { %v3996_v34 = vpack.c.bf16 %v3970_v44, %v3969_v11  ;;  %v6784_v59 = vpop.permute.xlu1 %6783  ;;  %v10573_v44 = vld [vmem:[#allocation24_spill] sm:$0xff] }
 0x4cc   : > { %v3971_v7 = vsel %vm2091_vm9, %v3939_v32, %v6790_v62  ;;  %v3972_v25 = vsel %vm2091_vm9, %v3940_v46, %v6791_v3  ;;  %v6786_v19 = vunpack.i.h.bf16 %v6784_v59  ;;  %v6785_v61 = vunpack.i.l.bf16 %v6784_v59 }
 0x4cd   : > { %v3997_v33 = vpack.c.bf16 %v3972_v25, %v3971_v7  ;;  %v6794_v63 = vpop.permute.xlu0 %6793  ;;  %6042 = vmatmul.mubr.msk.bf16.gmra.mrb[72].mxu0 %vm2162_vm11, %v3996_v34  ;;  %v3561_v34 = vmul.f32 %v10573_v44, %v9434_v28  ;;  %v10574_v25 = vld [vmem:[#allocation25_spill] sm:$0xff] }
 0x4ce   : > { %v6796_v16 = vunpack.i.h.bf16 %v6794_v63  ;;  %v6795_v2 = vunpack.i.l.bf16 %v6794_v63  ;;  %v3942_v37 = vsel %vm2058_vm8, %v9395_v54, %v6786_v19  ;;  %v3941_v57 = vsel %vm2058_vm8, %v3557_v49, %v6785_v61 }
 0x4cf   : > { %6045 = vmatprep.mubr.msk.bf16.mxu0 %vm2162_vm11, %v3997_v33  ;;  %v6799_v0 = vpop.permute.xlu1 %6798  ;;  %v3563_v59 = vmul.f32 %v10574_v25, %v9446_v50 }
 0x4d0   : > { %v6801_v52 = vunpack.i.h.bf16 %v6799_v0  ;;  %v6800_v55 = vunpack.i.l.bf16 %v6799_v0  ;;  %v3944_v24 = vsel %vm2058_vm8, %v9410_v29, %v6796_v16  ;;  %v3943_v48 = vsel %vm2058_vm8, %v3559_v13, %v6795_v2 }
 0x4d1   : > { %v6809_v21 = vpop.permute.xlu0 %6808 }
 0x4d2   : > { %v6811_v17 = vunpack.i.h.bf16 %v6809_v21  ;;  %v6810_v27 = vunpack.i.l.bf16 %v6809_v21  ;;  %v3973_v51 = vsel %vm2091_vm9, %v3941_v57, %v6800_v55  ;;  %v3974_v40 = vsel %vm2091_vm9, %v3942_v37, %v6801_v52 }
 0x4d3   : > { %v3998_v58 = vpack.c.bf16 %v3974_v40, %v3973_v51  ;;  %v6804_v3 = vpop.permute.xlu1 %6803 }
 0x4d4   : > { %v3975_v5 = vsel %vm2091_vm9, %v3943_v48, %v6810_v27  ;;  %v3976_v6 = vsel %vm2091_vm9, %v3944_v24, %v6811_v17  ;;  %v6806_v46 = vunpack.i.h.bf16 %v6804_v3  ;;  %v6805_v32 = vunpack.i.l.bf16 %v6804_v3  ;;  %v10575_v48 = vld [vmem:[#allocation26_spill] sm:$0xff] }
 0x4d5   : > { %v3999_v54 = vpack.c.bf16 %v3976_v6, %v3975_v5  ;;  %v6814_v62 = vpop.permute.xlu0 %6813  ;;  %6046 = vmatmul.mubr.msk.bf16.gmra.mrb[76].mxu0 %vm2162_vm11, %v3998_v58  ;;  %v3565_v51 = vmul.f32 %v10575_v48, %v9455_v23  ;;  %v10576_v58 = vld [vmem:[#allocation27_spill] sm:$0xff] }
 0x4d6   : > { %v6816_v11 = vunpack.i.h.bf16 %v6814_v62  ;;  %v6815_v29 = vunpack.i.l.bf16 %v6814_v62  ;;  %v3946_v61 = vsel %vm2058_vm8, %v9428_v43, %v6806_v46  ;;  %v3945_v16 = vsel %vm2058_vm8, %v3561_v34, %v6805_v32 }
 0x4d7   : > { %6049 = vmatprep.mubr.msk.bf16.mxu0 %vm2162_vm11, %v3999_v54  ;;  %v6819_v7 = vpop.permute.xlu1 %6818  ;;  %v3567_v5 = vmul.f32 %v10576_v58, %v9463_v56 }
 0x4d8   : > { %v6821_v33 = vunpack.i.h.bf16 %v6819_v7  ;;  %v6820_v63 = vunpack.i.l.bf16 %v6819_v7  ;;  %v3948_v0 = vsel %vm2058_vm8, %v9440_v45, %v6816_v11  ;;  %v3947_v13 = vsel %vm2058_vm8, %v3563_v59, %v6815_v29 }
 0x4d9   : > { %v6829_v19 = vpop.permute.xlu0 %6828 }
 0x4da   : > { %v6831_v2 = vunpack.i.h.bf16 %v6829_v19  ;;  %v6830_v49 = vunpack.i.l.bf16 %v6829_v19  ;;  %v3977_v28 = vsel %vm2091_vm9, %v3945_v16, %v6820_v63  ;;  %v3978_v52 = vsel %vm2091_vm9, %v3946_v61, %v6821_v33 }
 0x4db   : > { %v4000_v50 = vpack.c.bf16 %v3978_v52, %v3977_v28  ;;  %v6824_v37 = vpop.permute.xlu1 %6823  ;;  %v10578_v28 = vld [vmem:[#allocation15_spill] sm:$0xff] }
 0x4dc   : > { %v3979_v55 = vsel %vm2091_vm9, %v3947_v13, %v6830_v49  ;;  %v3980_v21 = vsel %vm2091_vm9, %v3948_v0, %v6831_v2  ;;  %v6826_v17 = vunpack.i.h.bf16 %v6824_v37  ;;  %v6825_v27 = vunpack.i.l.bf16 %v6824_v37  ;;  %v10577_v49 = vld [vmem:[#allocation11_spill] sm:$0xff] }
 0x4dd   : > { %v4001_v43 = vpack.c.bf16 %v3980_v21, %v3979_v55  ;;  %v6834_v57 = vpop.permute.xlu0 %6833  ;;  %6050 = vmatmul.mubr.msk.bf16.gmra.mrb[80].mxu0 %vm2162_vm11, %v4000_v50  ;;  %v3569_v0 = vmul.f32 %v10577_v49, %v9471_v31  ;;  %v3571_v52 = vmul.f32 %v10578_v28, %v9479_v9 }
 0x4de   : > { %v6836_v24 = vunpack.i.h.bf16 %v6834_v57  ;;  %v6835_v45 = vunpack.i.l.bf16 %v6834_v57  ;;  %v3950_v62 = vsel %vm2058_vm8, %v9450_v22, %v6826_v17  ;;  %v3949_v46 = vsel %vm2058_vm8, %v3565_v51, %v6825_v27 }
 0x4df   : > { %6053 = vmatprep.mubr.msk.bf16.mxu0 %vm2162_vm11, %v4001_v43  ;;  %v6839_v40 = vpop.permute.xlu1 %6838 }
 0x4e0   : > { %v6841_v6 = vunpack.i.h.bf16 %v6839_v40  ;;  %v6840_v3 = vunpack.i.l.bf16 %v6839_v40  ;;  %v3952_v29 = vsel %vm2058_vm8, %v9459_v15, %v6836_v24  ;;  %v3951_v34 = vsel %vm2058_vm8, %v3567_v5, %v6835_v45 }
 0x4e1   : > { %v6849_v54 = vpop.permute.xlu0 %6848 }
 0x4e2   : > { %v6851_v32 = vunpack.i.h.bf16 %v6849_v54  ;;  %v6850_v11 = vunpack.i.l.bf16 %v6849_v54  ;;  %v3981_v23 = vsel %vm2091_vm9, %v3949_v46, %v6840_v3  ;;  %v3982_v7 = vsel %vm2091_vm9, %v3950_v62, %v6841_v6 }
 0x4e3   : > { %v4002_v56 = vpack.c.bf16 %v3982_v7, %v3981_v23  ;;  %v6844_v63 = vpop.permute.xlu1 %6843 }
 0x4e4   : > { %v3983_v59 = vsel %vm2091_vm9, %v3951_v34, %v6850_v11  ;;  %v3984_v33 = vsel %vm2091_vm9, %v3952_v29, %v6851_v32  ;;  %v6846_v61 = vunpack.i.h.bf16 %v6844_v63  ;;  %v6845_v16 = vunpack.i.l.bf16 %v6844_v63 }
 0x4e5   : > { %v4003_v22 = vpack.c.bf16 %v3984_v33, %v3983_v59  ;;  %v6854_v19 = vpop.permute.xlu0 %6853  ;;  %6054 = vmatmul.mubr.msk.bf16.gmra.mrb[84].mxu0 %vm2162_vm11, %v4002_v56  ;;  %v7048_v56 = vld [vmem:[%s10205_s1 + $0xc0] sm:$0xff]   ;;  %v7051_v59 = vld [vmem:[%s10205_s1 + $0xd8] sm:$0xff]   ;;  %v4009_v63 = vsub.s32 3, %v7107_v1 }
 0x4e6   : > { %v6856_v2 = vunpack.i.h.bf16 %v6854_v19  ;;  %v6855_v15 = vunpack.i.l.bf16 %v6854_v19  ;;  %v3954_v37 = vsel %vm2058_vm8, %v9467_v18, %v6846_v61  ;;  %v3953_v43 = vsel %vm2058_vm8, %v3569_v0, %v6845_v16  ;;  %6065 = vmatprep.subr.bf16.mxu1 %v7048_v56  ;;  %v7052_v33 = vld [vmem:[%s10205_s1 + $0xe0] sm:$0xff]  }
 0x4e7   : > { %6057 = vmatprep.mubr.msk.bf16.mxu0 %vm2162_vm11, %v4003_v22  ;;  %v6859_v13 = vpop.permute.xlu1 %6858  ;;  %6066 = vmatpush3.bf16.msra.mxu1 %v7048_v56  ;;  %v7060_v22 = vld [vmem:[%s10206_s2] sm:$0xff] }
 0x4e8   : > { %v6861_v50 = vunpack.i.h.bf16 %v6859_v13  ;;  %v6860_v55 = vunpack.i.l.bf16 %v6859_v13  ;;  %v3956_v27 = vsel %vm2058_vm8, %v9475_v39, %v6856_v2  ;;  %v3955_v24 = vsel %vm2058_vm8, %v3571_v52, %v6855_v15  ;;  %v10579_v39 = vld [vmem:[#allocation14_spill] sm:$0xff] }
 0x4e9   : > { %v6869_v21 = vpop.permute.xlu0 %6868  ;;  %v3573_v54 = vmul.f32 %v10579_v39, %v9490_v26  ;;  %v7049_v26 = vld [vmem:[%s10205_s1 + $0xc8] sm:$0xff]   ;;  %v9636_v19 = vrot.slane %v7060_v22, %v4009_v63 }
 0x4ea   : > { %v6871_v57 = vunpack.i.h.bf16 %v6869_v21  ;;  %v6870_v17 = vunpack.i.l.bf16 %v6869_v21  ;;  %v3985_v31 = vsel %vm2091_vm9, %v3953_v43, %v6860_v55  ;;  %v3986_v45 = vsel %vm2091_vm9, %v3954_v37, %v6861_v50  ;;  %6067 = vmatprep.subr.bf16.mxu1 %v7049_v26  ;;  %v7053_v43 = vld [vmem:[%s10205_s1 + $0xe8] sm:$0xff]  }
 0x4eb   : > { %v4004_v9 = vpack.c.bf16 %v3986_v45, %v3985_v31  ;;  %v6864_v5 = vpop.permute.xlu1 %6863  ;;  %6068 = vmatpush3.bf16.msra.mxu1 %v7049_v26 }
 0x4ec   : > { %v3987_v51 = vsel %vm2091_vm9, %v3955_v24, %v6870_v17  ;;  %v3988_v40 = vsel %vm2091_vm9, %v3956_v27, %v6871_v57  ;;  %v6866_v6 = vunpack.i.h.bf16 %v6864_v5  ;;  %v6865_v3 = vunpack.i.l.bf16 %v6864_v5 }
 0x4ed   : > { %v4005_v18 = vpack.c.bf16 %v3988_v40, %v3987_v51  ;;  %6058 = vmatmul.mubr.msk.bf16.gmra.mrb[88].mxu0 %vm2162_vm11, %v4004_v9 }
 0x4ee   : > { %v3958_v11 = vsel %vm2058_vm8, %v9485_v53, %v6866_v6  ;;  %v3957_v29 = vsel %vm2058_vm8, %v3573_v54, %v6865_v3  ;;  %v7050_v53 = vld [vmem:[%s10205_s1 + $0xd0] sm:$0xff]  }
 0x4ef   : > { %6061 = vmatprep.mubr.msk.bf16.mxu0 %vm2162_vm11, %v4005_v18  ;;  %v6874_v62 = vpop.permute.xlu1 %6873  ;;  %6069 = vmatprep.subr.bf16.mxu1 %v7050_v53 }
 0x4f0   : > { %v6876_v46 = vunpack.i.h.bf16 %v6874_v62  ;;  %v6875_v32 = vunpack.i.l.bf16 %v6874_v62  ;;  %6070 = vmatpush3.bf16.msra.mxu1 %v7050_v53  ;;  %v10580_v53 = vld [vmem:[#allocation2_spill] sm:$0xff] }
 0x4f1   : > { %6071 = vmatprep.subr.bf16.mxu1 %v7051_v59 }
 0x4f2   : > { %v3990_v34 = vsel %vm2091_vm9, %v3958_v11, %v6876_v46  ;;  %v3989_v23 = vsel %vm2091_vm9, %v3957_v29, %v6875_v32 }
 0x4f3   : > { %v4006_v7 = vpack.c.bf16 %v3990_v34, %v3989_v23 }
 0x4f4   : > { %6072 = vmatpush3.bf16.msra.mxu1 %v7051_v59 }
 0x4f5   : > { %6062 = vmatmul.mubr.msk.bf16.gmra.mrb[92].mxu0 %vm2162_vm11, %v4006_v7  ;;  %6073 = vmatprep.subr.bf16.mxu1 %v7052_v33 }
 0x4f8   : > { %6074 = vmatpush3.bf16.msra.mxu1 %v7052_v33 }
 0x4f9   : > { %6075 = vmatprep.subr.bf16.mxu1 %v7053_v43 }
 0x4fc   : > { %6076 = vmatpush3.bf16.msra.mxu1 %v7053_v43 }
 0x590   : > { %v6035_v61 = vpop.f32.mrb[64].mxu0 }
 0x591   : > { %v4120_v16 = vadd.f32 %v6035_v61, %v9636_v19  ;;  %v4111_v2 = vpop.f32.mrb[65].mxu0 }
 0x592   : > { %v4112_v15 = vadd.f32 %v4111_v2, %v9636_v19  ;;  %v6036_v0 = vpop.f32.mrb[66].mxu0 }
 0x593   : > { %v4240_v13 = vmax.f32 %v4120_v16, 0.0  ;;  %v4123_v52 = vadd.f32 %v6036_v0, %v9636_v19  ;;  %v4114_v50 = vpop.f32.mrb[67].mxu0 }
 0x594   : > { %v9641_v55 = vmax.f32 %v4112_v15, 0.0  ;;  %v4115_v21 = vadd.f32 %v4114_v50, %v9636_v19 }
 0x595   : > { %v4241_v37 = vmax.f32 %v4123_v52, 0.0  ;;  %v4285_v57 = vrot.slane %v4240_v13, 7  ;;  %v4381_v27 = vrot.slane %v4240_v13, 1 }
 0x596   : > { %v4239_v17 = vmax.f32 %v4115_v21, 0.0  ;;  %v10325_v9 = vrot.slane %v9641_v55, 1  ;;  %v10326_v6 = vrot.slane %v9641_v55, 7 }
 0x597   : > { %v6877_v24 = vpack.i.bf16 %v4241_v37, %v4240_v13  ;;  %v4286_v31 = vrot.slane %v4241_v37, 7  ;;  %v4382_v45 = vrot.slane %v4241_v37, 1 }
 0x598   : > { %v4284_v51 = vrot.slane %v4239_v17, 7  ;;  %v4380_v40 = vrot.slane %v4239_v17, 1  ;;  %v6882_v5 = vpack.i.bf16 %v4239_v17, %v9641_v55  ;;  %v6039_v18 = vpop.f32.mrb[68].mxu0 }
 0x599   : > { %v4136_v3 = vadd.f32 %v6039_v18, %v9636_v19  ;;  %6878 = vrot.lane.b32.xlu1 %v6877_v24, %s7074_s4  ;;  %v4127_v54 = vpop.f32.mrb[69].mxu0  ;;  %v4439_v62 = vsel %vm945_vm1, %v4381_v27, %v4382_v45  ;;  %v9656_v46 = vsel %vm848_vm0, %v4285_v57, %v4286_v31 }
 0x59a   : > { %v9660_v32 = vsel %vm848_vm0, %v4284_v51, %v4285_v57  ;;  %v4440_v11 = vsel %vm945_vm1, %v4380_v40, %v4381_v27  ;;  %v4128_v29 = vadd.f32 %v4127_v54, %v9636_v19  ;;  %v6040_v34 = vpop.f32.mrb[70].mxu0  ;;  %6883 = vrot.lane.b32.xlu0 %v6882_v5, %s7074_s4  ;;  %v4441_v23 = vsel %vm945_vm1, %v10325_v9, %v4380_v40  ;;  %v10581_v40 = vld [vmem:[#allocation3_spill] sm:$0xff] }
 0x59b   : > { %v4244_v7 = vmax.f32 %v4136_v3, 0.0  ;;  %v4139_v56 = vadd.f32 %v6040_v34, %v9636_v19  ;;  %v4130_v26 = vpop.f32.mrb[71].mxu0  ;;  %v4444_v59 = vmul.f32 %v10580_v53, %v4440_v11  ;;  %v9677_v22 = vsel %vm848_vm0, %v10326_v6, %v4284_v51 }
 0x59c   : > { %v4242_v33 = vmax.f32 %v4128_v29, 0.0  ;;  %v4131_v63 = vadd.f32 %v4130_v26, %v9636_v19 }
 0x59d   : > { %v4245_v61 = vmax.f32 %v4139_v56, 0.0  ;;  %v6887_v16 = vpack.i.bf16 %v4444_v59, %v4441_v23  ;;  %v4289_v2 = vrot.slane %v4244_v7, 7  ;;  %v4385_v52 = vrot.slane %v4244_v7, 1 }
 0x59e   : > { %v4287_v15 = vrot.slane %v4242_v33, 7  ;;  %v4383_v0 = vrot.slane %v4242_v33, 1  ;;  %v4243_v13 = vmax.f32 %v4131_v63, 0.0 }
 0x59f   : > { %v6902_v50 = vpack.i.bf16 %v4245_v61, %v4244_v7  ;;  %v4290_v21 = vrot.slane %v4245_v61, 7  ;;  %v4386_v37 = vrot.slane %v4245_v61, 1  ;;  %6888 = vrot.lane.b32.xlu0 %v6887_v16, %s7075_s15  ;;  %v10582_v7 = vld [vmem:[#allocation4_spill] sm:$0xff] }
 0x5a0   : > { %v9682_v43 = vsel %vm848_vm0, %v4286_v31, %v4287_v15  ;;  %v4438_v57 = vsel %vm945_vm1, %v4382_v45, %v4383_v0  ;;  %v4288_v17 = vrot.slane %v4243_v13, 7  ;;  %v4384_v27 = vrot.slane %v4243_v13, 1  ;;  %v6043_v51 = vpop.f32.mrb[72].mxu0 }
 0x5a1   : > { %v6892_v24 = vpack.i.bf16 %v4243_v13, %v4242_v33  ;;  %v4446_v5 = vmul.f32 %v10581_v40, %v4438_v57  ;;  %v4435_v18 = vsel %vm945_vm1, %v4385_v52, %v4386_v37  ;;  %v4152_v54 = vadd.f32 %v6043_v51, %v9636_v19  ;;  %v4143_v11 = vpop.f32.mrb[73].mxu0 }
 0x5a2   : > { %v9691_v3 = vsel %vm848_vm0, %v4288_v17, %v4289_v2  ;;  %v4436_v31 = vsel %vm945_vm1, %v4384_v27, %v4385_v52  ;;  %v4437_v45 = vsel %vm945_vm1, %v4383_v0, %v4384_v27  ;;  %v4144_v29 = vadd.f32 %v4143_v11, %v9636_v19  ;;  %v6044_v34 = vpop.f32.mrb[74].mxu0 }
 0x5a3   : > { %6893 = vrot.lane.b32.xlu0 %v6892_v24, %s7074_s4  ;;  %v6897_v23 = vpack.i.bf16 %v4446_v5, %v4439_v62  ;;  %v4448_v56 = vmul.f32 %v10582_v7, %v4436_v31  ;;  %v9703_v26 = vsel %vm848_vm0, %v4287_v15, %v4288_v17  ;;  %v9705_v53 = vmax.f32 %v4152_v54, 0.0  ;;  %v4146_v33 = vpop.f32.mrb[75].mxu0 }
 0x5a4   : > { %v4155_v59 = vadd.f32 %v6044_v34, %v9636_v19  ;;  %v9710_v63 = vsel %vm848_vm0, %v4289_v2, %v4290_v21  ;;  %v4246_v61 = vmax.f32 %v4144_v29, 0.0  ;;  %v4147_v16 = vadd.f32 %v4146_v33, %v9636_v19  ;;  %v10583_v34 = vld [vmem:[#allocation5_spill] sm:$0xff] }
 0x5a5   : > { %6898 = vrot.lane.b32.xlu1 %v6897_v23, %s7075_s15  ;;  %v6907_v62 = vpack.i.bf16 %v4448_v56, %v4437_v45  ;;  %v4293_v13 = vrot.slane %v9705_v53, 7  ;;  %v4389_v17 = vrot.slane %v9705_v53, 1 }
 0x5a6   : > { %v4249_v0 = vmax.f32 %v4155_v59, 0.0  ;;  %v4291_v15 = vrot.slane %v4246_v61, 7  ;;  %v4387_v52 = vrot.slane %v4246_v61, 1  ;;  %v4247_v57 = vmax.f32 %v4147_v16, 0.0 }
 0x5a7   : > { %6908 = vrot.lane.b32.xlu0 %v6907_v62, %s7075_s15  ;;  %v10584_v62 = vld [vmem:[#allocation6_spill] sm:$0xff] }
 0x5a8   : > { %v6922_v27 = vpack.i.bf16 %v4249_v0, %v9705_v53  ;;  %v4294_v2 = vrot.slane %v4249_v0, 7  ;;  %v4390_v24 = vrot.slane %v4249_v0, 1  ;;  %v9720_v51 = vsel %vm848_vm0, %v4290_v21, %v4291_v15  ;;  %v6047_v54 = vpop.f32.mrb[76].mxu0 }
 0x5a9   : > { %v4434_v40 = vsel %vm945_vm1, %v4386_v37, %v4387_v52  ;;  %v4292_v5 = vrot.slane %v4247_v57, 7  ;;  %v4388_v31 = vrot.slane %v4247_v57, 1  ;;  %6903 = vrot.lane.b32.xlu1 %v6902_v50, %s7074_s4  ;;  %v6912_v11 = vpack.i.bf16 %v4247_v57, %v4246_v61  ;;  %v4159_v29 = vpop.f32.mrb[77].mxu0 }
 0x5aa   : > { %v4168_v45 = vadd.f32 %v6047_v54, %v9636_v19  ;;  %v4450_v23 = vmul.f32 %v10583_v34, %v4434_v40  ;;  %v4431_v7 = vsel %vm945_vm1, %v4389_v17, %v4390_v24  ;;  %v4160_v56 = vadd.f32 %v4159_v29, %v9636_v19  ;;  %v6048_v53 = vpop.f32.mrb[78].mxu0 }
 0x5ab   : > { %v9731_v21 = vsel %vm848_vm0, %v4292_v5, %v4293_v13  ;;  %v4432_v37 = vsel %vm945_vm1, %v4388_v31, %v4389_v17  ;;  %v4433_v50 = vsel %vm945_vm1, %v4387_v52, %v4388_v31  ;;  %v4171_v33 = vadd.f32 %v6048_v53, %v9636_v19  ;;  %v4162_v61 = vpop.f32.mrb[79].mxu0  ;;  %6913 = vrot.lane.b32.xlu0 %v6912_v11, %s7074_s4 }
 0x5ac   : > { %v9738_v59 = vmax.f32 %v4168_v45, 0.0  ;;  %v6917_v16 = vpack.i.bf16 %v4450_v23, %v4435_v18  ;;  %v4452_v0 = vmul.f32 %v10584_v62, %v4432_v37  ;;  %v4250_v57 = vmax.f32 %v4160_v56, 0.0 }
 0x5ad   : > { %v4163_v40 = vadd.f32 %v4162_v61, %v9636_v19  ;;  %v9746_v17 = vsel %vm848_vm0, %v4291_v15, %v4292_v5  ;;  %v4253_v52 = vmax.f32 %v4171_v33, 0.0  ;;  %v9752_v18 = vsel %vm848_vm0, %v4293_v13, %v4294_v2 }
 0x5ae   : > { %v4297_v54 = vrot.slane %v9738_v59, 7  ;;  %6918 = vrot.lane.b32.xlu1 %v6917_v16, %s7075_s15  ;;  %v6927_v31 = vpack.i.bf16 %v4452_v0, %v4433_v50  ;;  %v4295_v45 = vrot.slane %v4250_v57, 7  ;;  %v4391_v29 = vrot.slane %v4250_v57, 1 }
 0x5af   : > { %v4251_v34 = vmax.f32 %v4163_v40, 0.0  ;;  %v4393_v11 = vrot.slane %v9738_v59, 1  ;;  %v6942_v23 = vpack.i.bf16 %v4253_v52, %v9738_v59  ;;  %v4298_v37 = vrot.slane %v4253_v52, 7  ;;  %v10585_v59 = vld [vmem:[#allocation7_spill] sm:$0xff] }
 0x5b0   : > { %v4394_v15 = vrot.slane %v4253_v52, 1  ;;  %6928 = vrot.lane.b32.xlu0 %v6927_v31, %s7075_s15  ;;  %v9759_v5 = vsel %vm848_vm0, %v4294_v2, %v4295_v45  ;;  %v4430_v56 = vsel %vm945_vm1, %v4390_v24, %v4391_v29  ;;  %v6051_v33 = vpop.f32.mrb[80].mxu0 }
 0x5b1   : > { %v4296_v53 = vrot.slane %v4251_v34, 7  ;;  %v4392_v50 = vrot.slane %v4251_v34, 1  ;;  %v6932_v13 = vpack.i.bf16 %v4251_v34, %v4250_v57  ;;  %v4184_v61 = vadd.f32 %v6051_v33, %v9636_v19  ;;  %v4175_v16 = vpop.f32.mrb[81].mxu0  ;;  %v10586_v33 = vld [vmem:[#allocation8_spill] sm:$0xff] }
 0x5b2   : > { %6923 = vrot.lane.b32.xlu1 %v6922_v27, %s7074_s4  ;;  %v4454_v62 = vmul.f32 %v10585_v59, %v4430_v56  ;;  %v4427_v0 = vsel %vm945_vm1, %v4393_v11, %v4394_v15  ;;  %v4176_v40 = vadd.f32 %v4175_v16, %v9636_v19  ;;  %v6052_v57 = vpop.f32.mrb[82].mxu0 }
 0x5b3   : > { %v9770_v2 = vsel %vm848_vm0, %v4296_v53, %v4297_v54  ;;  %v4428_v24 = vsel %vm945_vm1, %v4392_v50, %v4393_v11  ;;  %v4429_v52 = vsel %vm945_vm1, %v4391_v29, %v4392_v50  ;;  %v9777_v31 = vmax.f32 %v4184_v61, 0.0  ;;  %v4178_v34 = vpop.f32.mrb[83].mxu0 }
 0x5b4   : > { %v4187_v27 = vadd.f32 %v6052_v57, %v9636_v19  ;;  %6933 = vrot.lane.b32.xlu0 %v6932_v13, %s7074_s4  ;;  %v6937_v56 = vpack.i.bf16 %v4454_v62, %v4431_v7  ;;  %v4456_v59 = vmul.f32 %v10586_v33, %v4428_v24  ;;  %v4254_v9 = vmax.f32 %v4176_v40, 0.0 }
 0x5b5   : > { %v4179_v6 = vadd.f32 %v4178_v34, %v9636_v19  ;;  %v9785_v11 = vsel %vm848_vm0, %v4295_v45, %v4296_v53  ;;  %v4301_v16 = vrot.slane %v9777_v31, 7  ;;  %v9791_v7 = vsel %vm848_vm0, %v4297_v54, %v4298_v37 }
 0x5b6   : > { %v4257_v29 = vmax.f32 %v4187_v27, 0.0  ;;  %6938 = vrot.lane.b32.xlu1 %v6937_v56, %s7075_s15  ;;  %v6947_v50 = vpack.i.bf16 %v4456_v59, %v4429_v52  ;;  %v4299_v61 = vrot.slane %v4254_v9, 7  ;;  %v4395_v57 = vrot.slane %v4254_v9, 1 }
 0x5b7   : > { %v4255_v39 = vmax.f32 %v4179_v6, 0.0  ;;  %v4397_v13 = vrot.slane %v9777_v31, 1 }
 0x5b8   : > { %v6962_v62 = vpack.i.bf16 %v4257_v29, %v9777_v31  ;;  %v4302_v24 = vrot.slane %v4257_v29, 7  ;;  %v4398_v45 = vrot.slane %v4257_v29, 1  ;;  %6948 = vrot.lane.b32.xlu0 %v6947_v50, %s7075_s15  ;;  %v9798_v53 = vsel %vm848_vm0, %v4298_v37, %v4299_v61  ;;  %v6055_v27 = vpop.f32.mrb[84].mxu0  ;;  %v10587_v31 = vld [vmem:[#allocation9_spill] sm:$0xff] }
 0x5b9   : > { %v4426_v40 = vsel %vm945_vm1, %v4394_v15, %v4395_v57  ;;  %v4300_v6 = vrot.slane %v4255_v39, 7  ;;  %v4396_v52 = vrot.slane %v4255_v39, 1  ;;  %v6952_v54 = vpack.i.bf16 %v4255_v39, %v4254_v9  ;;  %v4191_v56 = vpop.f32.mrb[85].mxu0 }
 0x5ba   : > { %v4200_v34 = vadd.f32 %v6055_v27, %v9636_v19  ;;  %6943 = vrot.lane.b32.xlu1 %v6942_v23, %s7074_s4  ;;  %v4458_v33 = vmul.f32 %v10587_v31, %v4426_v40  ;;  %v4423_v59 = vsel %vm945_vm1, %v4397_v13, %v4398_v45  ;;  %v4192_v29 = vadd.f32 %v4191_v56, %v9636_v19  ;;  %v6056_v39 = vpop.f32.mrb[86].mxu0  ;;  %v10588_v31 = vld [vmem:[#allocation10_spill] sm:$0xff] }
 0x5bb   : > { %v9809_v37 = vsel %vm848_vm0, %v4300_v6, %v4301_v16  ;;  %v4424_v15 = vsel %vm945_vm1, %v4396_v52, %v4397_v13  ;;  %v4425_v9 = vsel %vm945_vm1, %v4395_v57, %v4396_v52  ;;  %v4203_v23 = vadd.f32 %v6056_v39, %v9636_v19  ;;  %v4194_v40 = vpop.f32.mrb[87].mxu0 }
 0x5bc   : > { %v9816_v50 = vmax.f32 %v4200_v34, 0.0  ;;  %6953 = vrot.lane.b32.xlu0 %v6952_v54, %s7074_s4  ;;  %v6957_v27 = vpack.i.bf16 %v4458_v33, %v4427_v0  ;;  %v4460_v28 = vmul.f32 %v10588_v31, %v4424_v15  ;;  %v4258_v49 = vmax.f32 %v4192_v29, 0.0 }
 0x5bd   : > { %v4195_v58 = vadd.f32 %v4194_v40, %v9636_v19  ;;  %v9824_v13 = vsel %vm848_vm0, %v4299_v61, %v4300_v6  ;;  %v4261_v57 = vmax.f32 %v4203_v23, 0.0  ;;  %v9830_v0 = vsel %vm848_vm0, %v4301_v16, %v4302_v24 }
 0x5be   : > { %v4305_v56 = vrot.slane %v9816_v50, 7  ;;  %6958 = vrot.lane.b32.xlu1 %v6957_v27, %s7075_s15  ;;  %v6967_v52 = vpack.i.bf16 %v4460_v28, %v4425_v9  ;;  %v4303_v34 = vrot.slane %v4258_v49, 7  ;;  %v4399_v39 = vrot.slane %v4258_v49, 1  ;;  %10589 = vst [vmem:[#allocation20_spill] sm:$0xff] %v9830_v0 }
 0x5bf   : > { %v4259_v48 = vmax.f32 %v4195_v58, 0.0  ;;  %v4401_v54 = vrot.slane %v9816_v50, 1  ;;  %v6982_v33 = vpack.i.bf16 %v4261_v57, %v9816_v50  ;;  %v4306_v15 = vrot.slane %v4261_v57, 7  ;;  %v10591_v50 = vld [vmem:[#allocation12_spill] sm:$0xff] }
 0x5c0   : > { %v4402_v61 = vrot.slane %v4261_v57, 1  ;;  %6968 = vrot.lane.b32.xlu0 %v6967_v52, %s7075_s15  ;;  %v9837_v6 = vsel %vm848_vm0, %v4302_v24, %v4303_v34  ;;  %v4422_v28 = vsel %vm945_vm1, %v4398_v45, %v4399_v39  ;;  %v6059_v9 = vpop.f32.mrb[88].mxu0 }
 0x5c1   : > { %10590 = vst [vmem:[#allocation57_spill] sm:$0xff] %v9837_v6  ;;  %v4304_v58 = vrot.slane %v4259_v48, 7  ;;  %v4400_v29 = vrot.slane %v4259_v48, 1  ;;  %v6972_v16 = vpack.i.bf16 %v4259_v48, %v4258_v49  ;;  %v4216_v23 = vadd.f32 %v6059_v9, %v9636_v19  ;;  %v4207_v40 = vpop.f32.mrb[89].mxu0 }
 0x5c2   : > { %6963 = vrot.lane.b32.xlu1 %v6962_v62, %s7074_s4  ;;  %v4462_v27 = vmul.f32 %v10591_v50, %v4422_v28  ;;  %v4419_v31 = vsel %vm945_vm1, %v4401_v54, %v4402_v61  ;;  %v4208_v57 = vadd.f32 %v4207_v40, %v9636_v19  ;;  %v6060_v48 = vpop.f32.mrb[90].mxu0  ;;  %v10593_v50 = vld [vmem:[#allocation13_spill] sm:$0xff] }
 0x5c3   : > { %v9848_v24 = vsel %vm848_vm0, %v4304_v58, %v4305_v56  ;;  %v4420_v45 = vsel %vm945_vm1, %v4400_v29, %v4401_v54  ;;  %v4421_v49 = vsel %vm945_vm1, %v4399_v39, %v4400_v29  ;;  %v9855_v52 = vmax.f32 %v4216_v23, 0.0  ;;  %v4210_v28 = vpop.f32.mrb[91].mxu0 }
 0x5c4   : > { %10592 = vst [vmem:[#allocation59_spill] sm:$0xff] %v9848_v24  ;;  %v4219_v62 = vadd.f32 %v6060_v48, %v9636_v19  ;;  %6973 = vrot.lane.b32.xlu0 %v6972_v16, %s7074_s4  ;;  %v6977_v9 = vpack.i.bf16 %v4462_v27, %v4423_v59  ;;  %v4464_v25 = vmul.f32 %v10593_v50, %v4420_v45  ;;  %v4262_v24 = vmax.f32 %v4208_v57, 0.0 }
 0x5c5   : > { %v4211_v6 = vadd.f32 %v4210_v28, %v9636_v19  ;;  %v9863_v54 = vsel %vm848_vm0, %v4303_v34, %v4304_v58  ;;  %v4309_v40 = vrot.slane %v9855_v52, 7  ;;  %v9869_v59 = vsel %vm848_vm0, %v4305_v56, %v4306_v15 }
 0x5c6   : > { %v4265_v39 = vmax.f32 %v4219_v62, 0.0  ;;  %6978 = vrot.lane.b32.xlu1 %v6977_v9, %s7075_s15  ;;  %v6987_v29 = vpack.i.bf16 %v4464_v25, %v4421_v49  ;;  %v4307_v23 = vrot.slane %v4262_v24, 7  ;;  %v4403_v48 = vrot.slane %v4262_v24, 1 }
 0x5c7   : > { %v4263_v0 = vmax.f32 %v4211_v6, 0.0  ;;  %v4405_v16 = vrot.slane %v9855_v52, 1 }
 0x5c8   : > { %v7002_v27 = vpack.i.bf16 %v4265_v39, %v9855_v52  ;;  %v4310_v45 = vrot.slane %v4265_v39, 7  ;;  %v4406_v34 = vrot.slane %v4265_v39, 1  ;;  %6988 = vrot.lane.b32.xlu0 %v6987_v29, %s7075_s15  ;;  %v9876_v58 = vsel %vm848_vm0, %v4306_v15, %v4307_v23  ;;  %v6063_v49 = vpop.f32.mrb[92].mxu0 }
 0x5c9   : > { %10594 = vst [vmem:[#allocation58_spill] sm:$0xff] %v9876_v58  ;;  %v4418_v25 = vsel %vm945_vm1, %v4402_v61, %v4403_v48  ;;  %v4308_v6 = vrot.slane %v4263_v0, 7  ;;  %v4404_v57 = vrot.slane %v4263_v0, 1  ;;  %v6992_v56 = vpack.i.bf16 %v4263_v0, %v4262_v24  ;;  %v4223_v28 = vpop.f32.mrb[93].mxu0 }
 0x5ca   : > { %v4232_v62 = vadd.f32 %v6063_v49, %v9636_v19  ;;  %6983 = vrot.lane.b32.xlu1 %v6982_v33, %s7074_s4  ;;  %v4466_v52 = vmul.f32 %v10531_v8, %v4418_v25  ;;  %v4415_v9 = vsel %vm945_vm1, %v4405_v16, %v4406_v34  ;;  %v4224_v50 = vadd.f32 %v4223_v28, %v9636_v19  ;;  %v6064_v0 = vpop.f32.mrb[94].mxu0 }
 0x5cb   : > { %v9887_v15 = vsel %vm848_vm0, %v4308_v6, %v4309_v40  ;;  %v4416_v61 = vsel %vm945_vm1, %v4404_v57, %v4405_v16  ;;  %v4417_v24 = vsel %vm945_vm1, %v4403_v48, %v4404_v57  ;;  %v4235_v33 = vadd.f32 %v6064_v0, %v9636_v19  ;;  %v4226_v8 = vpop.f32.mrb[95].mxu0 }
 0x5cc   : > { %10595 = vst [vmem:[#allocation61_spill] sm:$0xff] %v9887_v15  ;;  %v4268_v39 = vmax.f32 %v4232_v62, 0.0  ;;  %6993 = vrot.lane.b32.xlu0 %v6992_v56, %s7074_s4  ;;  %v6997_v29 = vpack.i.bf16 %v4466_v52, %v4419_v31  ;;  %v4468_v25 = vmul.f32 %v10442_v47, %v4416_v61  ;;  %v4266_v49 = vmax.f32 %v4224_v50, 0.0 }
 0x5cd   : > { %v4227_v15 = vadd.f32 %v4226_v8, %v9636_v19  ;;  %v9900_v16 = vsel %vm848_vm0, %v4307_v23, %v4308_v6  ;;  %v4269_v58 = vmax.f32 %v4235_v33, 0.0  ;;  %v9905_v31 = vsel %vm848_vm0, %v4309_v40, %v4310_v45 }
 0x5ce   : > { %v4313_v28 = vrot.slane %v4268_v39, 7  ;;  %6998 = vrot.lane.b32.xlu1 %v6997_v29, %s7075_s15  ;;  %v7007_v48 = vpack.i.bf16 %v4468_v25, %v4417_v24  ;;  %v4311_v57 = vrot.slane %v4266_v49, 7  ;;  %v4407_v62 = vrot.slane %v4266_v49, 1 }
 0x5cf   : > { %v4267_v0 = vmax.f32 %v4227_v15, 0.0  ;;  %v4409_v47 = vrot.slane %v4268_v39, 1  ;;  %v7022_v56 = vpack.i.bf16 %v4269_v58, %v4268_v39  ;;  %v4314_v52 = vrot.slane %v4269_v58, 7 }
 0x5d0   : > { %v4410_v19 = vrot.slane %v4269_v58, 1  ;;  %7008 = vrot.lane.b32.xlu0 %v7007_v48, %s7075_s15  ;;  %v9910_v23 = vsel %vm848_vm0, %v4310_v45, %v4311_v57  ;;  %v4414_v6 = vsel %vm945_vm1, %v4406_v34, %v4407_v62  ;;  %v10596_v15 = vrot.slane %v9641_v55, 7 }
 0x5d1   : > { %v4312_v61 = vrot.slane %v4267_v0, 7  ;;  %v4408_v50 = vrot.slane %v4267_v0, 1  ;;  %v10597_v24 = vrot.slane %v9641_v55, 1  ;;  %v7012_v39 = vpack.i.bf16 %v4267_v0, %v4266_v49 }
 0x5d2   : > { %v4346_v40 = vsel %vm848_vm0, %v4314_v52, %v10596_v15  ;;  %7003 = vrot.lane.b32.xlu1 %v7002_v27, %s7074_s4  ;;  %v4470_v45 = vmul.f32 %v7576_v36, %v4414_v6  ;;  %v4411_v55 = vsel %vm945_vm1, %v4409_v47, %v4410_v19  ;;  %v9943_v49 = vsel %vm848_vm0, %v4313_v28, %v4314_v52 }
 0x5d3   : > { %v4442_v58 = vsel %vm945_vm1, %v4410_v19, %v10597_v24  ;;  %v9926_v34 = vsel %vm848_vm0, %v4312_v61, %v4313_v28  ;;  %v4412_v33 = vsel %vm945_vm1, %v4408_v50, %v4409_v47  ;;  %v4413_v8 = vsel %vm945_vm1, %v4407_v62, %v4408_v50 }
 0x5d4   : > { %7013 = vrot.lane.b32.xlu0 %v7012_v39, %s7074_s4  ;;  %v7017_v29 = vpack.i.bf16 %v4470_v45, %v4415_v9  ;;  %v4472_v27 = vmul.f32 %v7581_v20, %v4412_v33  ;;  %v4474_v36 = vmul.f32 %v7628_v10, %v4442_v58  ;;  %v9939_v25 = vsel %vm848_vm0, %v4311_v57, %v4312_v61 }
 0x5d5   : > { %v4347_v57 = vmul.f32 %v7744_v42, %v4346_v40  ;;  %vm4763_vm1 = vcmask 523264   ;;  %vm4852_vm0 = vcmask 785408   ;;  %v4349_v42 = vmul.f32 %v10475_v35, %v9660_v32 }
 0x5d6   : > { %7018 = vrot.lane.b32.xlu1 %v7017_v29, %s7075_s15  ;;  %v7027_v48 = vpack.i.bf16 %v4472_v27, %v4413_v8  ;;  %v7032_v62 = vpack.i.bf16 %v4474_v36, %v4411_v55  ;;  %v4351_v29 = vmul.f32 %v7757_v30, %v9682_v43 }
 0x5d8   : > { %7028 = vrot.lane.b32.xlu0 %v7027_v48, %s7075_s15 }
 0x5da   : > { %7023 = vrot.lane.b32.xlu1 %v7022_v56, %s7074_s4 }
 0x5de   : > { %7033 = vrot.lane.b32.xlu1 %v7032_v62, %s7075_s15 }
 0x60b   : > { %v6879_v47 = vpop.permute.xlu1 %6878 }
 0x60c   : > { %v6884_v20 = vpop.permute.xlu0 %6883  ;;  %v6881_v50 = vunpack.i.h.bf16 %v6879_v47  ;;  %v6880_v15 = vunpack.i.l.bf16 %v6879_v47 }
 0x60d   : > { %v6886_v10 = vunpack.i.h.bf16 %v6884_v20  ;;  %v6885_v9 = vunpack.i.l.bf16 %v6884_v20 }
 0x60e   : > { %v4734_v55 = vsel %vm2091_vm9, %v9656_v46, %v6881_v50 }
 0x60f   : > { %v4731_v19 = vsel %vm2091_vm9, %v4347_v57, %v6885_v9  ;;  %v4732_v6 = vsel %vm2091_vm9, %v9677_v22, %v6886_v10  ;;  %v4733_v22 = vsel %vm2091_vm9, %v4349_v42, %v6880_v15  ;;  %v4355_v15 = vmul.f32 %v7780_v60, %v9720_v51 }
 0x611   : > { %v6889_v0 = vpop.permute.xlu0 %6888 }
 0x612   : > { %v6891_v28 = vunpack.i.h.bf16 %v6889_v0  ;;  %v6890_v52 = vunpack.i.l.bf16 %v6889_v0 }
 0x614   : > { %v4764_v61 = vsel %vm4763_vm1, %v4731_v19, %v6890_v52  ;;  %v4765_v56 = vsel %vm4763_vm1, %v4732_v6, %v6891_v28  ;;  %v4353_v28 = vmul.f32 %v7773_v41, %v9691_v3 }
 0x615   : > { %v4796_v24 = vpack.c.bf16 %v4765_v56, %v4764_v61  ;;  %v6894_v58 = vpop.permute.xlu0 %6893 }
 0x616   : > { %v6896_v40 = vunpack.i.h.bf16 %v6894_v58  ;;  %v6895_v39 = vunpack.i.l.bf16 %v6894_v58 }
 0x617   : > { %v6899_v45 = vpop.permute.xlu1 %6898  ;;  %6077 = vmatprep.mubr.msk.bf16.mxu1 %vm4852_vm0, %v4796_v24 }
 0x618   : > { %v6901_v33 = vunpack.i.h.bf16 %v6899_v45  ;;  %v6900_v8 = vunpack.i.l.bf16 %v6899_v45  ;;  %v4736_v62 = vsel %vm2091_vm9, %v9703_v26, %v6896_v40  ;;  %v4735_v20 = vsel %vm2091_vm9, %v4351_v29, %v6895_v39 }
 0x619   : > { %v6909_v27 = vpop.permute.xlu0 %6908  ;;  %v4357_v29 = vmul.f32 %v7795_v38, %v9731_v21 }
 0x61a   : > { %v4767_v36 = vsel %vm4763_vm1, %v4734_v55, %v6901_v33  ;;  %v4766_v35 = vsel %vm4763_vm1, %v4733_v22, %v6900_v8  ;;  %v6911_v32 = vunpack.i.h.bf16 %v6909_v27  ;;  %v6910_v48 = vunpack.i.l.bf16 %v6909_v27 }
 0x61b   : > { %v4797_v10 = vpack.c.bf16 %v4767_v36, %v4766_v35  ;;  %v6904_v9 = vpop.permute.xlu1 %6903 }
 0x61c   : > { %v4768_v57 = vsel %vm4763_vm1, %v4735_v20, %v6910_v48  ;;  %v4769_v46 = vsel %vm4763_vm1, %v4736_v62, %v6911_v32  ;;  %v6906_v30 = vunpack.i.h.bf16 %v6904_v9  ;;  %v6905_v43 = vunpack.i.l.bf16 %v6904_v9 }
 0x61d   : > { %v4798_v0 = vpack.c.bf16 %v4769_v46, %v4768_v57  ;;  %6078 = vmatmul.mubr.msk.bf16.vlgmr.msra.gmra.mrb[32].mxu1 %vm4852_vm0, %v4797_v10  ;;  %v6914_v47 = vpop.permute.xlu0 %6913  ;;  %v4359_v20 = vmul.f32 %v10570_v12, %v9759_v5 }
 0x61e   : > { %v6916_v26 = vunpack.i.h.bf16 %v6914_v47  ;;  %v6915_v52 = vunpack.i.l.bf16 %v6914_v47  ;;  %v4738_v56 = vsel %vm2091_vm9, %v9710_v63, %v6906_v30  ;;  %v4737_v50 = vsel %vm2091_vm9, %v4353_v28, %v6905_v43 }
 0x61f   : > { %6081 = vmatprep.mubr.msk.bf16.mxu1 %vm4852_vm0, %v4798_v0 }
 0x620   : > { %v6919_v19 = vpop.permute.xlu1 %6918  ;;  %v4740_v3 = vsel %vm2091_vm9, %v9746_v17, %v6916_v26  ;;  %v4739_v39 = vsel %vm2091_vm9, %v4355_v15, %v6915_v52  ;;  %v4361_v52 = vmul.f32 %v10571_v14, %v9770_v2 }
 0x621   : > { %v6921_v6 = vunpack.i.h.bf16 %v6919_v19  ;;  %v6920_v61 = vunpack.i.l.bf16 %v6919_v19 }
 0x622   : > { %v6929_v24 = vpop.permute.xlu0 %6928 }
 0x623   : > { %v4770_v58 = vsel %vm4763_vm1, %v4737_v50, %v6920_v61  ;;  %v4771_v42 = vsel %vm4763_vm1, %v4738_v56, %v6921_v6  ;;  %v6931_v40 = vunpack.i.h.bf16 %v6929_v24  ;;  %v6930_v41 = vunpack.i.l.bf16 %v6929_v24 }
 0x624   : > { %v4799_v45 = vpack.c.bf16 %v4771_v42, %v4770_v58  ;;  %v6924_v33 = vpop.permute.xlu1 %6923  ;;  %v4363_v24 = vmul.f32 %v10572_v4, %v9798_v53 }
 0x625   : > { %v4772_v63 = vsel %vm4763_vm1, %v4739_v39, %v6930_v41  ;;  %v4773_v8 = vsel %vm4763_vm1, %v4740_v3, %v6931_v40  ;;  %v6926_v60 = vunpack.i.h.bf16 %v6924_v33  ;;  %v6925_v51 = vunpack.i.l.bf16 %v6924_v33 }
 0x626   : > { %v4800_v22 = vpack.c.bf16 %v4773_v8, %v4772_v63  ;;  %v6934_v55 = vpop.permute.xlu0 %6933  ;;  %6082 = vmatmul.mubr.msk.bf16.gmra.mrb[36].mxu1 %vm4852_vm0, %v4799_v45 }
 0x627   : > { %v6936_v27 = vunpack.i.h.bf16 %v6934_v55  ;;  %v6935_v36 = vunpack.i.l.bf16 %v6934_v55  ;;  %v4742_v48 = vsel %vm2091_vm9, %v9752_v18, %v6926_v60  ;;  %v4741_v62 = vsel %vm2091_vm9, %v4357_v29, %v6925_v51 }
 0x628   : > { %v6939_v17 = vpop.permute.xlu1 %6938  ;;  %6085 = vmatprep.mubr.msk.bf16.mxu1 %vm4852_vm0, %v4800_v22  ;;  %v4365_v22 = vmul.f32 %v10573_v44, %v9809_v37 }
 0x629   : > { %v6941_v35 = vunpack.i.h.bf16 %v6939_v17  ;;  %v6940_v32 = vunpack.i.l.bf16 %v6939_v17  ;;  %v4744_v46 = vsel %vm2091_vm9, %v9785_v11, %v6936_v27  ;;  %v4743_v0 = vsel %vm2091_vm9, %v4359_v20, %v6935_v36  ;;  %v10598_v27 = vld [vmem:[#allocation20_spill] sm:$0xff] }
 0x62a   : > { %v6949_v10 = vpop.permute.xlu0 %6948 }
 0x62b   : > { %v4774_v9 = vsel %vm4763_vm1, %v4741_v62, %v6940_v32  ;;  %v4775_v38 = vsel %vm4763_vm1, %v4742_v48, %v6941_v35  ;;  %v6951_v21 = vunpack.i.h.bf16 %v6949_v10  ;;  %v6950_v57 = vunpack.i.l.bf16 %v6949_v10  ;;  %v10599_v35 = vld [vmem:[#allocation57_spill] sm:$0xff] }
 0x62c   : > { %v4801_v30 = vpack.c.bf16 %v4775_v38, %v4774_v9  ;;  %v6944_v43 = vpop.permute.xlu1 %6943  ;;  %v10600_v32 = vld [vmem:[#allocation25_spill] sm:$0xff] }
 0x62d   : > { %v4776_v18 = vsel %vm4763_vm1, %v4743_v0, %v6950_v57  ;;  %v4777_v47 = vsel %vm4763_vm1, %v4744_v46, %v6951_v21  ;;  %v6946_v12 = vunpack.i.h.bf16 %v6944_v43  ;;  %v6945_v5 = vunpack.i.l.bf16 %v6944_v43 }
 0x62e   : > { %v4802_v28 = vpack.c.bf16 %v4777_v47, %v4776_v18  ;;  %v6954_v26 = vpop.permute.xlu0 %6953  ;;  %6086 = vmatmul.mubr.msk.bf16.gmra.mrb[40].mxu1 %vm4852_vm0, %v4801_v30  ;;  %v4367_v48 = vmul.f32 %v10600_v32, %v10599_v35 }
 0x62f   : > { %v6956_v19 = vunpack.i.h.bf16 %v6954_v26  ;;  %v6955_v6 = vunpack.i.l.bf16 %v6954_v26  ;;  %v4746_v50 = vsel %vm2091_vm9, %v9791_v7, %v6946_v12  ;;  %v4745_v15 = vsel %vm2091_vm9, %v4361_v52, %v6945_v5  ;;  %v10602_v12 = vld [vmem:[#allocation26_spill] sm:$0xff] }
 0x630   : > { %v6959_v11 = vpop.permute.xlu1 %6958  ;;  %6089 = vmatprep.mubr.msk.bf16.mxu1 %vm4852_vm0, %v4802_v28  ;;  %v10601_v28 = vld [vmem:[#allocation59_spill] sm:$0xff] }
 0x631   : > { %v6961_v61 = vunpack.i.h.bf16 %v6959_v11  ;;  %v6960_v56 = vunpack.i.l.bf16 %v6959_v11  ;;  %v4748_v41 = vsel %vm2091_vm9, %v9824_v13, %v6956_v19  ;;  %v4747_v3 = vsel %vm2091_vm9, %v4363_v24, %v6955_v6 }
 0x632   : > { %v6969_v58 = vpop.permute.xlu0 %6968  ;;  %v4369_v5 = vmul.f32 %v10602_v12, %v10601_v28 }
 0x633   : > { %v4778_v42 = vsel %vm4763_vm1, %v4745_v15, %v6960_v56  ;;  %v4779_v14 = vsel %vm4763_vm1, %v4746_v50, %v6961_v61  ;;  %v6971_v2 = vunpack.i.h.bf16 %v6969_v58  ;;  %v6970_v40 = vunpack.i.l.bf16 %v6969_v58  ;;  %v10603_v56 = vld [vmem:[#allocation58_spill] sm:$0xff]  ;;  %v10604_v50 = vld [vmem:[#allocation27_spill] sm:$0xff] }
 0x634   : > { %v4803_v39 = vpack.c.bf16 %v4779_v14, %v4778_v42  ;;  %v6964_v45 = vpop.permute.xlu1 %6963  ;;  %v4371_v15 = vmul.f32 %v10604_v50, %v10603_v56 }
 0x635   : > { %v4780_v7 = vsel %vm4763_vm1, %v4747_v3, %v6970_v40  ;;  %v4781_v33 = vsel %vm4763_vm1, %v4748_v41, %v6971_v2  ;;  %v6966_v4 = vunpack.i.h.bf16 %v6964_v45  ;;  %v6965_v53 = vunpack.i.l.bf16 %v6964_v45 }
 0x636   : > { %v4804_v63 = vpack.c.bf16 %v4781_v33, %v4780_v7  ;;  %v6974_v8 = vpop.permute.xlu0 %6973  ;;  %6090 = vmatmul.mubr.msk.bf16.gmra.mrb[44].mxu1 %vm4852_vm0, %v4803_v39 }
 0x637   : > { %v6976_v60 = vunpack.i.h.bf16 %v6974_v8  ;;  %v6975_v51 = vunpack.i.l.bf16 %v6974_v8  ;;  %v4750_v36 = vsel %vm2091_vm9, %v10598_v27, %v6966_v4  ;;  %v4749_v17 = vsel %vm2091_vm9, %v4365_v22, %v6965_v53  ;;  %v10605_v53 = vld [vmem:[#allocation61_spill] sm:$0xff]  ;;  %v10606_v8 = vld [vmem:[#allocation11_spill] sm:$0xff] }
 0x638   : > { %v6979_v13 = vpop.permute.xlu1 %6978  ;;  %6093 = vmatprep.mubr.msk.bf16.mxu1 %vm4852_vm0, %v4804_v63  ;;  %v4373_v22 = vmul.f32 %v10606_v8, %v10605_v53 }
 0x639   : > { %v6981_v55 = vunpack.i.h.bf16 %v6979_v13  ;;  %v6980_v29 = vunpack.i.l.bf16 %v6979_v13  ;;  %v4752_v9 = vsel %vm2091_vm9, %v9863_v54, %v6976_v60  ;;  %v4751_v38 = vsel %vm2091_vm9, %v4367_v48, %v6975_v51 }
 0x63a   : > { %v6989_v62 = vpop.permute.xlu0 %6988 }
 0x63b   : > { %v4782_v20 = vsel %vm4763_vm1, %v4749_v17, %v6980_v29  ;;  %v4783_v44 = vsel %vm4763_vm1, %v4750_v36, %v6981_v55  ;;  %v6991_v37 = vunpack.i.h.bf16 %v6989_v62  ;;  %v6990_v10 = vunpack.i.l.bf16 %v6989_v62  ;;  %v10607_v36 = vld [vmem:[#allocation15_spill] sm:$0xff] }
 0x63c   : > { %v4805_v21 = vpack.c.bf16 %v4783_v44, %v4782_v20  ;;  %v6984_v57 = vpop.permute.xlu1 %6983  ;;  %v4375_v17 = vmul.f32 %v10607_v36, %v9910_v23 }
 0x63d   : > { %v4784_v46 = vsel %vm4763_vm1, %v4751_v38, %v6990_v10  ;;  %v4785_v0 = vsel %vm4763_vm1, %v4752_v9, %v6991_v37  ;;  %v6986_v43 = vunpack.i.h.bf16 %v6984_v57  ;;  %v6985_v18 = vunpack.i.l.bf16 %v6984_v57 }
 0x63e   : > { %v4806_v30 = vpack.c.bf16 %v4785_v0, %v4784_v46  ;;  %v6994_v47 = vpop.permute.xlu0 %6993  ;;  %6094 = vmatmul.mubr.msk.bf16.gmra.mrb[48].mxu1 %vm4852_vm0, %v4805_v21  ;;  %v10608_v46 = vld [vmem:[#allocation14_spill] sm:$0xff] }
 0x63f   : > { %v6996_v26 = vunpack.i.h.bf16 %v6994_v47  ;;  %v6995_v52 = vunpack.i.l.bf16 %v6994_v47  ;;  %v4754_v11 = vsel %vm2091_vm9, %v9869_v59, %v6986_v43  ;;  %v4753_v61 = vsel %vm2091_vm9, %v4369_v5, %v6985_v18 }
 0x640   : > { %v6999_v54 = vpop.permute.xlu1 %6998  ;;  %6097 = vmatprep.mubr.msk.bf16.mxu1 %vm4852_vm0, %v4806_v30  ;;  %v4377_v0 = vmul.f32 %v10608_v46, %v9926_v34  ;;  %v7054_v34 = vld [vmem:[%s10205_s1 + $0x120] sm:$0xff]  }
 0x641   : > { %v7001_v19 = vunpack.i.h.bf16 %v6999_v54  ;;  %v7000_v6 = vunpack.i.l.bf16 %v6999_v54  ;;  %v4756_v40 = vsel %vm2091_vm9, %v9900_v16, %v6996_v26  ;;  %v4755_v41 = vsel %vm2091_vm9, %v4371_v15, %v6995_v52  ;;  %6110 = vmatpush3.bf16.msra.mxu0 %v7054_v34 }
 0x642   : > { %v7009_v24 = vpop.permute.xlu0 %7008  ;;  %v10609_v26 = vmov 0.0   ;;  %v3255_v52 = vsub.s32 5, %v7107_v1  ;;  %v4814_v54 = vsub.s32 4, %v7107_v1 }
 0x643   : > { %v4786_v58 = vsel %vm4763_vm1, %v4753_v61, %v7000_v6  ;;  %v4787_v42 = vsel %vm4763_vm1, %v4754_v11, %v7001_v19  ;;  %v7011_v14 = vunpack.i.h.bf16 %v7009_v24  ;;  %v7010_v2 = vunpack.i.l.bf16 %v7009_v24  ;;  %6111 = vmatprep.subr.bf16.mxu0 %v10609_v26  ;;  %6113 = vmatprep.mubr.msk.bf16.mxu0 %vm7076_vm13, %v10609_v26  ;;  %v10091_v19 = vld [vmem:[%s10206_s2] sm:$0xff] }
 0x644   : > { %v4807_v3 = vpack.c.bf16 %v4787_v42, %v4786_v58  ;;  %v7004_v39 = vpop.permute.xlu1 %7003  ;;  %v3256_v6 = vrot.slane %v10091_v19, %v3255_v52  ;;  %v4815_v11 = vrot.slane %v10091_v19, %v4814_v54 }
 0x645   : > { %v4788_v59 = vsel %vm4763_vm1, %v4755_v41, %v7010_v2  ;;  %v4789_v45 = vsel %vm4763_vm1, %v4756_v40, %v7011_v14  ;;  %v7006_v33 = vunpack.i.h.bf16 %v7004_v39  ;;  %v7005_v63 = vunpack.i.l.bf16 %v7004_v39 }
 0x646   : > { %v4808_v7 = vpack.c.bf16 %v4789_v45, %v4788_v59  ;;  %v7014_v4 = vpop.permute.xlu0 %7013  ;;  %6098 = vmatmul.mubr.msk.bf16.gmra.mrb[52].mxu1 %vm4852_vm0, %v4807_v3  ;;  %v10095_v61 = vadd.f32 %v4815_v11, %v3256_v6 }
 0x647   : > { %v7016_v60 = vunpack.i.h.bf16 %v7014_v4  ;;  %v7015_v51 = vunpack.i.l.bf16 %v7014_v4  ;;  %v4758_v29 = vsel %vm2091_vm9, %v9905_v31, %v7006_v33  ;;  %v4757_v27 = vsel %vm2091_vm9, %v4373_v22, %v7005_v63 }
 0x648   : > { %v7019_v16 = vpop.permute.xlu1 %7018  ;;  %6101 = vmatprep.mubr.msk.bf16.mxu1 %vm4852_vm0, %v4808_v7 }
 0x649   : > { %v7021_v13 = vunpack.i.h.bf16 %v7019_v16  ;;  %v7020_v55 = vunpack.i.l.bf16 %v7019_v16  ;;  %v4760_v44 = vsel %vm2091_vm9, %v9939_v25, %v7016_v60  ;;  %v4759_v37 = vsel %vm2091_vm9, %v4375_v17, %v7015_v51 }
 0x64a   : > { %v7029_v35 = vpop.permute.xlu0 %7028 }
 0x64b   : > { %v4790_v32 = vsel %vm4763_vm1, %v4757_v27, %v7020_v55  ;;  %v4791_v48 = vsel %vm4763_vm1, %v4758_v29, %v7021_v13  ;;  %v7031_v62 = vunpack.i.h.bf16 %v7029_v35  ;;  %v7030_v20 = vunpack.i.l.bf16 %v7029_v35 }
 0x64c   : > { %v4809_v10 = vpack.c.bf16 %v4791_v48, %v4790_v32  ;;  %v7024_v9 = vpop.permute.xlu1 %7023 }
 0x64d   : > { %v4792_v31 = vsel %vm4763_vm1, %v4759_v37, %v7030_v20  ;;  %v4793_v38 = vsel %vm4763_vm1, %v4760_v44, %v7031_v62  ;;  %v7026_v23 = vunpack.i.h.bf16 %v7024_v9  ;;  %v7025_v57 = vunpack.i.l.bf16 %v7024_v9 }
 0x64e   : > { %v4810_v21 = vpack.c.bf16 %v4793_v38, %v4792_v31  ;;  %6102 = vmatmul.mubr.msk.bf16.gmra.mrb[56].mxu1 %vm4852_vm0, %v4809_v10 }
 0x64f   : > { %v4762_v18 = vsel %vm2091_vm9, %v9943_v49, %v7026_v23  ;;  %v4761_v47 = vsel %vm2091_vm9, %v4377_v0, %v7025_v57  ;;  %v7055_v49 = vld [vmem:[%s10205_s1 + $0x128] sm:$0xff]  }
 0x650   : > { %v7034_v30 = vpop.permute.xlu1 %7033  ;;  %6105 = vmatprep.mubr.msk.bf16.mxu1 %vm4852_vm0, %v4810_v21  ;;  %6112 = vmatpush3.bf16.msra.mxu0 %v7055_v49 }
 0x651   : > { %v7036_v25 = vunpack.i.h.bf16 %v7034_v30  ;;  %v7035_v43 = vunpack.i.l.bf16 %v7034_v30  ;;  %6117 = vmatprep.subr.bf16.mxu0 %v10609_v26 }
 0x653   : > { %v4795_v28 = vsel %vm4763_vm1, %v4762_v18, %v7036_v25  ;;  %v4794_v12 = vsel %vm4763_vm1, %v4761_v47, %v7035_v43 }
 0x654   : > { %v4811_v5 = vpack.c.bf16 %v4795_v28, %v4794_v12 }
 0x656   : > { %6106 = vmatmul.mubr.msk.bf16.gmra.mrb[60].mxu1 %vm4852_vm0, %v4811_v5 }
 0x6f0   : > { %v6079_v56 = vpop.f32.mrb[32].mxu1 }
 0x6f1   : > { %v6126_v50 = vadd.f32 %v10095_v61, %v6079_v56  ;;  %v4935_v15 = vpop.f32.mrb[33].mxu1 }
 0x6f2   : > { %v6128_v24 = vadd.f32 %v10095_v61, %v4935_v15  ;;  %v6080_v58 = vpop.f32.mrb[34].mxu1 }
 0x6f3   : > { %v5096_v42 = vmax.f32 %v6126_v50, 0.0  ;;  %v6130_v14 = vadd.f32 %v10095_v61, %v6080_v58  ;;  %v4938_v2 = vpop.f32.mrb[35].mxu1 }
 0x6f4   : > { %v5094_v40 = vmax.f32 %v6128_v24, 0.0  ;;  %v6132_v41 = vadd.f32 %v10095_v61, %v4938_v2 }
 0x6f5   : > { %v5097_v3 = vmax.f32 %v6130_v14, 0.0  ;;  %v5135_v59 = vsel %vm2091_vm9, %v5096_v42, 0.0 }
 0x6f6   : > { %v5095_v39 = vmax.f32 %v6132_v41, 0.0  ;;  %v5126_v7 = vsel %vm2091_vm9, %v5094_v40, 0.0 }
 0x6f7   : > { %v5136_v45 = vsel %vm2091_vm9, %v5097_v3, 0.0 }
 0x6f8   : > { %v5137_v33 = vadd.f32 %v5136_v45, %v5135_v59  ;;  %v5127_v63 = vsel %vm2091_vm9, %v5095_v39, 0.0 }
 0x6f9   : > { %v5128_v4 = vadd.f32 %v5127_v63, %v5126_v7  ;;  %v6083_v53 = vpop.f32.mrb[36].mxu1 }
 0x6fa   : > { %v5138_v8 = vrot.slane %v5137_v33, 4  ;;  %v6134_v22 = vadd.f32 %v10095_v61, %v6083_v53  ;;  %v4951_v60 = vpop.f32.mrb[37].mxu1 }
 0x6fb   : > { %v5129_v51 = vrot.slane %v5128_v4, 4  ;;  %v6136_v16 = vadd.f32 %v10095_v61, %v4951_v60  ;;  %v6084_v13 = vpop.f32.mrb[38].mxu1 }
 0x6fc   : > { %v5139_v55 = vadd.f32 %v5138_v8, %v5137_v33  ;;  %v5100_v29 = vmax.f32 %v6134_v22, 0.0  ;;  %v6138_v27 = vadd.f32 %v10095_v61, %v6084_v13  ;;  %v4954_v36 = vpop.f32.mrb[39].mxu1 }
 0x6fd   : > { %v5130_v17 = vadd.f32 %v5129_v51, %v5128_v4  ;;  %v5098_v35 = vmax.f32 %v6136_v16, 0.0  ;;  %v6140_v32 = vadd.f32 %v10095_v61, %v4954_v36 }
 0x6fe   : > { %v5140_v48 = vrot.slane %v5139_v55, 2  ;;  %v5101_v62 = vmax.f32 %v6138_v27, 0.0  ;;  %v5153_v10 = vsel %vm2091_vm9, %v5100_v29, 0.0 }
 0x6ff   : > { %v5131_v20 = vrot.slane %v5130_v17, 2  ;;  %v5099_v44 = vmax.f32 %v6140_v32, 0.0  ;;  %v5144_v38 = vsel %vm2091_vm9, %v5098_v35, 0.0 }
 0x700   : > { %v5141_v37 = vadd.f32 %v5140_v48, %v5139_v55  ;;  %v5154_v9 = vsel %vm2091_vm9, %v5101_v62, 0.0 }
 0x701   : > { %v5132_v31 = vadd.f32 %v5131_v20, %v5130_v17  ;;  %v5155_v21 = vadd.f32 %v5154_v9, %v5153_v10  ;;  %v5145_v23 = vsel %vm2091_vm9, %v5099_v44, 0.0  ;;  %v6087_v57 = vpop.f32.mrb[40].mxu1 }
 0x702   : > { %v5142_v46 = vrot.slane %v5141_v37, 1  ;;  %v5146_v0 = vadd.f32 %v5145_v23, %v5144_v38  ;;  %v6142_v30 = vadd.f32 %v10095_v61, %v6087_v57  ;;  %v4967_v25 = vpop.f32.mrb[41].mxu1 }
 0x703   : > { %v5133_v43 = vrot.slane %v5132_v31, 1  ;;  %v5156_v18 = vrot.slane %v5155_v21, 4  ;;  %v6144_v47 = vadd.f32 %v10095_v61, %v4967_v25  ;;  %v6088_v28 = vpop.f32.mrb[42].mxu1 }
 0x704   : > { %v5143_v12 = vadd.f32 %v5142_v46, %v5141_v37  ;;  %v5147_v5 = vrot.slane %v5146_v0, 4  ;;  %v5104_v34 = vmax.f32 %v6142_v30, 0.0  ;;  %v6146_v49 = vadd.f32 %v10095_v61, %v6088_v28  ;;  %v4970_v52 = vpop.f32.mrb[43].mxu1 }
 0x705   : > { %v5134_v54 = vadd.f32 %v5133_v43, %v5132_v31  ;;  %v5157_v6 = vadd.f32 %v5156_v18, %v5155_v21  ;;  %v5102_v11 = vmax.f32 %v6144_v47, 0.0  ;;  %v6148_v56 = vadd.f32 %v10095_v61, %v4970_v52 }
 0x706   : > { %v5272_v50 = vmul.f32 0.0625, %v5143_v12  ;;  %v5148_v15 = vadd.f32 %v5147_v5, %v5146_v0  ;;  %v5105_v24 = vmax.f32 %v6146_v49, 0.0  ;;  %v5171_v14 = vsel %vm2091_vm9, %v5104_v34, 0.0 }
 0x707   : > { %v5271_v58 = vmul.f32 0.0625, %v5134_v54  ;;  %v5158_v42 = vrot.slane %v5157_v6, 2  ;;  %v5103_v2 = vmax.f32 %v6148_v56, 0.0  ;;  %v5162_v3 = vsel %vm2091_vm9, %v5102_v11, 0.0 }
 0x708   : > { %v5293_v40 = vpack.c.bf16 %v5272_v50, %v5272_v50  ;;  %v5149_v41 = vrot.slane %v5148_v15, 2  ;;  %v5172_v39 = vsel %vm2091_vm9, %v5105_v24, 0.0 }
 0x709   : > { %v5292_v59 = vpack.c.bf16 %v5271_v58, %v5271_v58  ;;  %v5159_v45 = vadd.f32 %v5158_v42, %v5157_v6  ;;  %v5173_v7 = vadd.f32 %v5172_v39, %v5171_v14  ;;  %v5163_v33 = vsel %vm2091_vm9, %v5103_v2, 0.0  ;;  %v6091_v63 = vpop.f32.mrb[44].mxu1 }
 0x70a   : > { %v5329_v4 = vunpack.c.l.b16 %v5293_v40  ;;  %v5150_v53 = vadd.f32 %v5149_v41, %v5148_v15  ;;  %v5164_v8 = vadd.f32 %v5163_v33, %v5162_v3  ;;  %v6150_v22 = vadd.f32 %v10095_v61, %v6091_v63  ;;  %v4983_v60 = vpop.f32.mrb[45].mxu1 }
 0x70b   : > { %v5328_v51 = vunpack.c.l.b16 %v5292_v59  ;;  %v5160_v16 = vrot.slane %v5159_v45, 1  ;;  %v5174_v13 = vrot.slane %v5173_v7, 4  ;;  %v6152_v55 = vadd.f32 %v10095_v61, %v4983_v60  ;;  %v6092_v29 = vpop.f32.mrb[46].mxu1 }
 0x70c   : > { %v5151_v27 = vrot.slane %v5150_v53, 1  ;;  %v5165_v36 = vrot.slane %v5164_v8, 4  ;;  %v5108_v17 = vmax.f32 %v6150_v22, 0.0  ;;  %v6154_v35 = vadd.f32 %v10095_v61, %v6092_v29  ;;  %v4986_v32 = vpop.f32.mrb[47].mxu1 }
 0x70d   : > { %v5345_v48 = vsel %vm5344_vm14, %v5329_v4, %v5328_v51  ;;  %v5161_v62 = vadd.f32 %v5160_v16, %v5159_v45  ;;  %v5175_v20 = vadd.f32 %v5174_v13, %v5173_v7  ;;  %v5106_v10 = vmax.f32 %v6152_v55, 0.0 }
 0x70e   : > { %v5152_v44 = vadd.f32 %v5151_v27, %v5150_v53  ;;  %v5166_v37 = vadd.f32 %v5165_v36, %v5164_v8  ;;  %v5109_v9 = vmax.f32 %v6154_v35, 0.0  ;;  %v6156_v21 = vadd.f32 %v10095_v61, %v4986_v32 }
 0x70f   : > { %v5274_v31 = vmul.f32 0.0625, %v5161_v62  ;;  %v5176_v38 = vrot.slane %v5175_v20, 2  ;;  %v5189_v46 = vsel %vm2091_vm9, %v5108_v17, 0.0  ;;  %v5180_v5 = vsel %vm2091_vm9, %v5106_v10, 0.0 }
 0x710   : > { %v5273_v23 = vmul.f32 0.0625, %v5152_v44  ;;  %v5167_v57 = vrot.slane %v5166_v37, 2  ;;  %v5190_v0 = vsel %vm2091_vm9, %v5109_v9, 0.0  ;;  %v5107_v18 = vmax.f32 %v6156_v21, 0.0 }
 0x711   : > { %v5295_v30 = vpack.c.bf16 %v5274_v31, %v5274_v31  ;;  %v5177_v25 = vadd.f32 %v5176_v38, %v5175_v20  ;;  %v5191_v43 = vadd.f32 %v5190_v0, %v5189_v46  ;;  %v6095_v47 = vpop.f32.mrb[48].mxu1 }
 0x712   : > { %v5294_v28 = vpack.c.bf16 %v5273_v23, %v5273_v23  ;;  %v5168_v12 = vadd.f32 %v5167_v57, %v5166_v37  ;;  %v6158_v34 = vadd.f32 %v10095_v61, %v6095_v47  ;;  %v4999_v49 = vpop.f32.mrb[49].mxu1  ;;  %v5181_v11 = vsel %vm2091_vm9, %v5107_v18, 0.0 }
 0x713   : > { %v5331_v52 = vunpack.c.l.b16 %v5295_v30  ;;  %v5178_v54 = vrot.slane %v5177_v25, 1  ;;  %v5192_v6 = vrot.slane %v5191_v43, 4  ;;  %v6096_v56 = vpop.f32.mrb[50].mxu1  ;;  %v5182_v24 = vadd.f32 %v5181_v11, %v5180_v5 }
 0x714   : > { %v5330_v50 = vunpack.c.l.b16 %v5294_v28  ;;  %v5169_v15 = vrot.slane %v5168_v12, 1  ;;  %v5112_v58 = vmax.f32 %v6158_v34, 0.0  ;;  %v5002_v42 = vpop.f32.mrb[51].mxu1  ;;  %v6160_v40 = vadd.f32 %v10095_v61, %v4999_v49 }
 0x715   : > { %v5179_v14 = vadd.f32 %v5178_v54, %v5177_v25  ;;  %v5193_v2 = vadd.f32 %v5192_v6, %v5191_v43  ;;  %v6162_v41 = vadd.f32 %v10095_v61, %v6096_v56  ;;  %v5183_v59 = vrot.slane %v5182_v24, 4 }
 0x716   : > { %v5347_v3 = vsel %vm5346_vm15, %v5330_v50, %v5345_v48  ;;  %v5170_v39 = vadd.f32 %v5169_v15, %v5168_v12  ;;  %v5110_v63 = vmax.f32 %v6160_v40, 0.0  ;;  %v6164_v22 = vadd.f32 %v10095_v61, %v5002_v42 }
 0x717   : > { %v5276_v45 = vmul.f32 0.0625, %v5179_v14  ;;  %v5349_v7 = vsel %vm5348_vm2, %v5331_v52, %v5347_v3  ;;  %v5194_v33 = vrot.slane %v5193_v2, 2  ;;  %v5184_v53 = vadd.f32 %v5183_v59, %v5182_v24 }
 0x718   : > { %v5275_v4 = vmul.f32 0.0625, %v5170_v39  ;;  %v5113_v8 = vmax.f32 %v6162_v41, 0.0  ;;  %v5207_v16 = vsel %vm2091_vm9, %v5112_v58, 0.0  ;;  %v5198_v13 = vsel %vm2091_vm9, %v5110_v63, 0.0 }
 0x719   : > { %v5297_v60 = vpack.c.bf16 %v5276_v45, %v5276_v45  ;;  %v5195_v51 = vadd.f32 %v5194_v33, %v5193_v2  ;;  %v6099_v55 = vpop.f32.mrb[52].mxu1  ;;  %v5185_v27 = vrot.slane %v5184_v53, 2  ;;  %v5111_v17 = vmax.f32 %v6164_v22, 0.0 }
 0x71a   : > { %v5296_v29 = vpack.c.bf16 %v5275_v4, %v5275_v4  ;;  %v5208_v36 = vsel %vm2091_vm9, %v5113_v8, 0.0  ;;  %v5015_v35 = vpop.f32.mrb[53].mxu1  ;;  %v6166_v20 = vadd.f32 %v10095_v61, %v6099_v55 }
 0x71b   : > { %v5333_v32 = vunpack.c.l.b16 %v5297_v60  ;;  %v5196_v48 = vrot.slane %v5195_v51, 1  ;;  %v5209_v62 = vadd.f32 %v5208_v36, %v5207_v16  ;;  %v6100_v44 = vpop.f32.mrb[54].mxu1  ;;  %v5186_v10 = vadd.f32 %v5185_v27, %v5184_v53 }
 0x71c   : > { %v5332_v37 = vunpack.c.l.b16 %v5296_v29  ;;  %v5199_v9 = vsel %vm2091_vm9, %v5111_v17, 0.0  ;;  %v6168_v31 = vadd.f32 %v10095_v61, %v5015_v35  ;;  %v5018_v38 = vpop.f32.mrb[55].mxu1  ;;  %v5116_v46 = vmax.f32 %v6166_v20, 0.0 }
 0x71d   : > { %v5197_v21 = vadd.f32 %v5196_v48, %v5195_v51  ;;  %v5210_v23 = vrot.slane %v5209_v62, 4  ;;  %v5200_v57 = vadd.f32 %v5199_v9, %v5198_v13  ;;  %v5187_v30 = vrot.slane %v5186_v10, 1 }
 0x71e   : > { %v5351_v0 = vsel %vm5350_vm3, %v5332_v37, %v5349_v7  ;;  %v5114_v25 = vmax.f32 %v6168_v31, 0.0  ;;  %v6170_v43 = vadd.f32 %v10095_v61, %v6100_v44  ;;  %v5225_v54 = vsel %vm2091_vm9, %v5116_v46, 0.0 }
 0x71f   : > { %v5278_v18 = vmul.f32 0.0625, %v5197_v21  ;;  %v5353_v47 = vsel %vm5352_vm4, %v5333_v32, %v5351_v0  ;;  %v5211_v28 = vadd.f32 %v5210_v23, %v5209_v62  ;;  %v5201_v12 = vrot.slane %v5200_v57, 4 }
 0x720   : > { %v5188_v5 = vadd.f32 %v5187_v30, %v5186_v10  ;;  %v5117_v34 = vmax.f32 %v6170_v43, 0.0  ;;  %v6172_v6 = vadd.f32 %v10095_v61, %v5018_v38  ;;  %v5216_v2 = vsel %vm2091_vm9, %v5114_v25, 0.0 }
 0x721   : > { %v5212_v49 = vrot.slane %v5211_v28, 2  ;;  %v5202_v52 = vadd.f32 %v5201_v12, %v5200_v57  ;;  %v6103_v11 = vpop.f32.mrb[56].mxu1  ;;  %v5299_v56 = vpack.c.bf16 %v5278_v18, %v5278_v18 }
 0x722   : > { %v5277_v50 = vmul.f32 0.0625, %v5188_v5  ;;  %v5226_v15 = vsel %vm2091_vm9, %v5117_v34, 0.0  ;;  %v6174_v24 = vadd.f32 %v10095_v61, %v6103_v11  ;;  %v5031_v58 = vpop.f32.mrb[57].mxu1  ;;  %v5115_v39 = vmax.f32 %v6172_v6, 0.0 }
 0x723   : > { %v5213_v42 = vadd.f32 %v5212_v49, %v5211_v28  ;;  %v5203_v14 = vrot.slane %v5202_v52, 2  ;;  %v5227_v40 = vadd.f32 %v5226_v15, %v5225_v54  ;;  %v6104_v41 = vpop.f32.mrb[58].mxu1  ;;  %v6176_v45 = vadd.f32 %v10095_v61, %v5031_v58 }
 0x724   : > { %v5298_v3 = vpack.c.bf16 %v5277_v50, %v5277_v50  ;;  %v5120_v59 = vmax.f32 %v6174_v24, 0.0  ;;  %v5034_v7 = vpop.f32.mrb[59].mxu1  ;;  %v6178_v53 = vadd.f32 %v10095_v61, %v6104_v41  ;;  %v5335_v8 = vunpack.c.l.b16 %v5299_v56 }
 0x725   : > { %v5214_v33 = vrot.slane %v5213_v42, 1  ;;  %v5204_v63 = vadd.f32 %v5203_v14, %v5202_v52  ;;  %v5228_v4 = vrot.slane %v5227_v40, 4  ;;  %v5217_v60 = vsel %vm2091_vm9, %v5115_v39, 0.0 }
 0x726   : > { %v5334_v22 = vunpack.c.l.b16 %v5298_v3  ;;  %v5243_v51 = vsel %vm2091_vm9, %v5120_v59, 0.0  ;;  %v5218_v29 = vadd.f32 %v5217_v60, %v5216_v2  ;;  %v5118_v36 = vmax.f32 %v6176_v45, 0.0 }
 0x727   : > { %v5215_v16 = vadd.f32 %v5214_v33, %v5213_v42  ;;  %v5205_v13 = vrot.slane %v5204_v63, 1  ;;  %v5229_v55 = vadd.f32 %v5228_v4, %v5227_v40  ;;  %v5121_v17 = vmax.f32 %v6178_v53, 0.0 }
 0x728   : > { %v5355_v27 = vsel %vm5354_vm5, %v5334_v22, %v5353_v47  ;;  %v6180_v35 = vadd.f32 %v10095_v61, %v5034_v7  ;;  %v5219_v37 = vrot.slane %v5218_v29, 4  ;;  %v5234_v25 = vsel %vm2091_vm9, %v5118_v36, 0.0 }
 0x729   : > { %v10157_v32 = vsel %vm5356_vm6, %v5335_v8, %v5355_v27  ;;  %v5280_v48 = vmul.f32 0.0625, %v5215_v16  ;;  %v5206_v62 = vadd.f32 %v5205_v13, %v5204_v63  ;;  %v5230_v20 = vrot.slane %v5229_v55, 2  ;;  %v6107_v44 = vpop.f32.mrb[60].mxu1 }
 0x72a   : > { %v5244_v10 = vsel %vm2091_vm9, %v5121_v17, 0.0  ;;  %v5119_v9 = vmax.f32 %v6180_v35, 0.0  ;;  %v6182_v31 = vadd.f32 %v10095_v61, %v6107_v44  ;;  %v5047_v38 = vpop.f32.mrb[61].mxu1  ;;  %v5220_v30 = vadd.f32 %v5219_v37, %v5218_v29 }
 0x72b   : > { %v5301_v21 = vpack.c.bf16 %v5280_v48, %v5280_v48  ;;  %v5279_v23 = vmul.f32 0.0625, %v5206_v62  ;;  %v5231_v57 = vadd.f32 %v5230_v20, %v5229_v55  ;;  %v5245_v46 = vadd.f32 %v5244_v10, %v5243_v51  ;;  %v6108_v0 = vpop.f32.mrb[62].mxu1 }
 0x72c   : > { %v5235_v43 = vsel %vm2091_vm9, %v5119_v9, 0.0  ;;  %v6184_v18 = vadd.f32 %v10095_v61, %v5047_v38  ;;  %v5050_v47 = vpop.f32.mrb[63].mxu1  ;;  %v5221_v49 = vrot.slane %v5220_v30, 2  ;;  %v5124_v54 = vmax.f32 %v6182_v31, 0.0 }
 0x72d   : > { %v5337_v28 = vunpack.c.l.b16 %v5301_v21  ;;  %v5300_v12 = vpack.c.bf16 %v5279_v23, %v5279_v23  ;;  %v5232_v5 = vrot.slane %v5231_v57, 1  ;;  %v5246_v34 = vrot.slane %v5245_v46, 4 }
 0x72e   : > { %v5236_v52 = vadd.f32 %v5235_v43, %v5234_v25  ;;  %v5122_v6 = vmax.f32 %v6184_v18, 0.0  ;;  %v6186_v15 = vadd.f32 %v10095_v61, %v6108_v0  ;;  %v5222_v24 = vadd.f32 %v5221_v49, %v5220_v30 }
 0x72f   : > { %v5336_v11 = vunpack.c.l.b16 %v5300_v12  ;;  %v5233_v56 = vadd.f32 %v5232_v5, %v5231_v57  ;;  %v5247_v50 = vadd.f32 %v5246_v34, %v5245_v46  ;;  %v6188_v42 = vadd.f32 %v10095_v61, %v5050_v47 }
 0x730   : > { %v5237_v58 = vrot.slane %v5236_v52, 4  ;;  %v5125_v40 = vmax.f32 %v6186_v15, 0.0  ;;  %v5223_v41 = vrot.slane %v5222_v24, 1  ;;  %v5261_v39 = vsel %vm2091_vm9, %v5124_v54, 0.0 }
 0x731   : > { %v5358_v14 = vsel %vm5344_vm14, %v5337_v28, %v5336_v11  ;;  %v5248_v2 = vrot.slane %v5247_v50, 2  ;;  %v5123_v59 = vmax.f32 %v6188_v42, 0.0  ;;  %v5282_v45 = vmul.f32 0.0625, %v5233_v56 }
 0x732   : > { %v5238_v3 = vadd.f32 %v5237_v58, %v5236_v52  ;;  %v5252_v33 = vsel %vm2091_vm9, %v5122_v6, 0.0  ;;  %v5262_v63 = vsel %vm2091_vm9, %v5125_v40, 0.0  ;;  %v5224_v4 = vadd.f32 %v5223_v41, %v5222_v24  ;;  %v7056_v24 = vld [vmem:[%s10205_s1 + $0x150] sm:$0xff]   ;;  %v7057_v58 = vld [vmem:[%s10205_s1 + $0x158] sm:$0xff]  }
 0x733   : > { %v5249_v7 = vadd.f32 %v5248_v2, %v5247_v50  ;;  %v5263_v8 = vadd.f32 %v5262_v63, %v5261_v39  ;;  %v5253_v61 = vsel %vm2091_vm9, %v5123_v59, 0.0  ;;  %v5303_v55 = vpack.c.bf16 %v5282_v45, %v5282_v45 }
 0x734   : > { %v5239_v53 = vrot.slane %v5238_v3, 2  ;;  %v5254_v60 = vadd.f32 %v5253_v61, %v5252_v33  ;;  %v5281_v51 = vmul.f32 0.0625, %v5224_v4  ;;  %v5310_v42 = vsub.s32 6, %v7107_v1 }
 0x735   : > { %v5250_v22 = vrot.slane %v5249_v7, 1  ;;  %v5264_v13 = vrot.slane %v5263_v8, 4  ;;  %v5339_v10 = vunpack.c.l.b16 %v5303_v55 }
 0x736   : > { %v5240_v16 = vadd.f32 %v5239_v53, %v5238_v3  ;;  %v5255_v27 = vrot.slane %v5254_v60, 4  ;;  %v5302_v36 = vpack.c.bf16 %v5281_v51, %v5281_v51 }
 0x737   : > { %v5251_v29 = vadd.f32 %v5250_v22, %v5249_v7  ;;  %v5265_v35 = vadd.f32 %v5264_v13, %v5263_v8 }
 0x738   : > { %v5241_v17 = vrot.slane %v5240_v16, 1  ;;  %v5256_v62 = vadd.f32 %v5255_v27, %v5254_v60  ;;  %v5338_v20 = vunpack.c.l.b16 %v5302_v36 }
 0x739   : > { %v5284_v48 = vmul.f32 0.0625, %v5251_v29  ;;  %v5266_v37 = vrot.slane %v5265_v35, 2 }
 0x73a   : > { %v5242_v44 = vadd.f32 %v5241_v17, %v5240_v16  ;;  %v5257_v9 = vrot.slane %v5256_v62, 2  ;;  %v5359_v31 = vsel %vm5346_vm15, %v5338_v20, %v5358_v14 }
 0x73b   : > { %v5267_v21 = vadd.f32 %v5266_v37, %v5265_v35  ;;  %v5305_v23 = vpack.c.bf16 %v5284_v48, %v5284_v48  ;;  %v5360_v57 = vsel %vm5348_vm2, %v5339_v10, %v5359_v31 }
 0x73c   : > { %v5283_v38 = vmul.f32 0.0625, %v5242_v44  ;;  %v5258_v46 = vadd.f32 %v5257_v9, %v5256_v62 }
 0x73d   : > { %v5268_v30 = vrot.slane %v5267_v21, 1  ;;  %v5341_v47 = vunpack.c.l.b16 %v5305_v23 }
 0x73e   : > { %v5304_v0 = vpack.c.bf16 %v5283_v38, %v5283_v38  ;;  %v5259_v25 = vrot.slane %v5258_v46, 1 }
 0x73f   : > { %v5269_v18 = vadd.f32 %v5268_v30, %v5267_v21 }
 0x740   : > { %v5340_v43 = vunpack.c.l.b16 %v5304_v0  ;;  %v5260_v28 = vadd.f32 %v5259_v25, %v5258_v46 }
 0x741   : > { %v5286_v5 = vmul.f32 0.0625, %v5269_v18 }
 0x742   : > { %v5361_v12 = vsel %vm5350_vm3, %v5340_v43, %v5360_v57  ;;  %v5285_v34 = vmul.f32 0.0625, %v5260_v28 }
 0x743   : > { %v5362_v49 = vsel %vm5352_vm4, %v5341_v47, %v5361_v12  ;;  %v5307_v52 = vpack.c.bf16 %v5286_v5, %v5286_v5 }
 0x744   : > { %v5306_v54 = vpack.c.bf16 %v5285_v34, %v5285_v34 }
 0x745   : > { %v5343_v11 = vunpack.c.l.b16 %v5307_v52 }
 0x746   : > { %v5342_v6 = vunpack.c.l.b16 %v5306_v54 }
 0x748   : > { %v5363_v56 = vsel %vm5354_vm5, %v5342_v6, %v5362_v49 }
 0x749   : > { %v5364_v50 = vsel %vm5356_vm6, %v5343_v11, %v5363_v56 }
 0x74a   : > { %v5365_v15 = vpack.c.b16 %v5364_v50, %v10157_v32  ;;  %v5311_v32 = vrot.slane %v10091_v19, %v5310_v42 }
 0x74c   : > { %6114 = vmatmul.mubr.msk.bf16.vlgmr.msra.gmra.mrb[96].mxu0 %vm2091_vm9, %v5365_v15 }
 0x74d   : > { %6121 = vmatprep.mubr.msk.bf16.mxu0 %vm7076_vm13, %v10609_v26  ;;  %6118 = vmatpush3.bf16.msra.mxu0 %v7056_v24 }
 0x74e   : > { %6119 = vmatprep.subr.bf16.mxu0 %v10609_v26  ;;  %v5432_v26 = vsub.s32 7, %v7107_v1 }
 0x750   : > { %v5433_v33 = vrot.slane %v10091_v19, %v5432_v26 }
 0x751   : > { %6120 = vmatpush3.bf16.msra.mxu0 %v7057_v58 }
 0x81f   : > { %v5415_v14 = vpop.f32.mrb[96].mxu0 }
 0x820   : > { %v5416_v2 = vadd.f32 %v5415_v14, %v5311_v32  ;;  %v6115_v40 = vpop.f32.mrb[97].mxu0 }
 0x821   : > { %v5418_v41 = vpop.f32.mrb[98].mxu0 }
 0x822   : > { %v5419_v3 = vadd.f32 %v5418_v41, %v5311_v32  ;;  %v6116_v39 = vpop.f32.mrb[99].mxu0  ;;  %v5422_v59 = vmax.f32 %v5416_v2, 0.0 }
 0x824   : > { %v5423_v45 = vmax.f32 %v5419_v3, 0.0 }
 0x826   : > { %v5429_v7 = vpack.c.bf16 %v5423_v45, %v5422_v59 }
 0x828   : > { %6122 = vmatmul.mubr.msk.bf16.vlgmr.msra.gmra.mrb[100].mxu0 %vm2091_vm9, %v5429_v7 }
 0x8fb   : > { %v5483_v63 = vpop.f32.mrb[100].mxu0 }
 0x8fc   : > { %v5484_v4 = vadd.f32 %v5483_v63, %v5433_v33  ;;  %v6123_v53 = vpop.f32.mrb[101].mxu0 }
 0x8fd   : > { %v5486_v8 = vpop.f32.mrb[102].mxu0 }
 0x8fe   : > { %v5487_v61 = vadd.f32 %v5486_v8, %v5433_v33  ;;  %5492 = vrot.lane.b32.xlu0 %v5484_v4, %s7074_s4  ;;  %v6124_v22 = vpop.f32.mrb[103].mxu0 }
 0x900   : > { %5494 = vrot.lane.b32.xlu1 %v5487_v61, %s7074_s4 }
 0x970   : > { %v5493_v60 = vpop.permute.xlu0 %5492 }
 0x971   : > { %v5498_v1 = vsel %vm2091_vm9, %v5422_v59, %v5493_v60 }
 0x972   : > { %v5501_v19 = vsel %vm5500_vm7, %v5498_v1, 0.0  ;;  %v5495_v51 = vpop.permute.xlu1 %5494 }
 0x973   : > { %5503 = vst [vmem:[%s170_s29] sm:$0xff] %v5501_v19  ;;  %v5499_v16 = vsel %vm2091_vm9, %v5423_v45, %v5495_v51 }
 0x974   : > { %v5502_v13 = vsel %vm5500_vm7, %v5499_v16, 0.0 }
 0x975   : > { %5504 = vst [vmem:[%s170_s29 + $0x8] sm:$0xff] %v5502_v13 }
 0x976 PF: > { %s13_s12 = sadd.s32 1, %s7068_s12  }
 0x977   : > { %p10_p4 = scmp.ge.s32.totalorder %s13_s12, 4  }
 0x979   :  { %12 = sbr.rel (!%p10_p4) target bundleno = 1 (0x1), region = 69 }

</bundles_post_ra>
